<compile_context>
chip_gen: v7x
topology: tpu7x:2x2x1
jax: 0.10.0
libtpu: 0.0.40
codegen_flags: <defaults>
</compile_context>

<pallas_src>
import numpy as np
import jax
import jax.numpy as jnp
from jax.experimental import pallas as pl
from jax.experimental.pallas import tpu as pltpu


# ----------------------------- fused Pallas kernel -----------------------------

def _make_fused_kernel(nl, nr, nd, ni, ns):
    """Whole SPN forward for one batch tile, entirely in VMEM."""

    def kernel(zoh_ref, wleaf_ref, *refs):
        w_refs = refs[:nl]          # per-layer block-diagonal (G*K*K, G*ns) bf16
        root_ref = refs[nl]         # (1, nr*ns) f32 root mixture weights
        out_ref = refs[nl + 1]      # (TB, 1) f32 log-likelihood

        tb = zoh_ref.shape[0]

        # ---- leaf layer: one lane-dense MXU matmul --------------------------
        # zoh: (TB, nd*nk) one-hot rows; wleaf: (nd*nk, nr*nd*ni) block matrix of
        # categorical log-probs with the per-replica permutation baked in.
        # act[b, (r, p, i)] = leaf log-likelihood of tree position p, replica r.
        act = jnp.dot(zoh_ref[...], wleaf_ref[...],
                      preferred_element_type=jnp.float32)      # (TB, nr*nd*ni)

        # ---- log-einsum-exp sum/product layers up the binary tree -----------
        k = ni                       # current child width
        n_child = nr * nd            # current number of child regions
        for t in range(nl):
            g_cnt = n_child // 2
            pieces = []              # pairwise products -> one big matmul
            offs = []                # per-group (lmax + rmax) offsets
            for g in range(g_cnt):   # static unroll (g_cnt <= nr*nd/2, tiny)
                lg = act[:, (2 * g) * k:(2 * g + 1) * k]       # left  child (TB, k)
                rg = act[:, (2 * g + 1) * k:(2 * g + 2) * k]   # right child (TB, k)
                lm = jnp.max(lg, axis=-1, keepdims=True)
                rm = jnp.max(rg, axis=-1, keepdims=True)
                el = jnp.exp(lg - lm)
                er = jnp.exp(rg - rm)
                for j in range(k):                             # column block j*k + i
                    pieces.append(er[:, j:j + 1] * el)         # (TB, k)
                offs.append(jnp.broadcast_to(lm + rm, (tb, ns)))
            # ONE MXU matmul: (TB, G*k*k) @ block-diag (G*k*k, G*ns) -> (TB, G*ns)
            p2d = jnp.concatenate(pieces, axis=1).astype(jnp.bfloat16)
            lin = jnp.dot(p2d, w_refs[t][...],
                          preferred_element_type=jnp.float32)  # (TB, g_cnt*ns)
            off2d = jnp.concatenate(offs, axis=1)              # (TB, g_cnt*ns)
            # tiny floor only guards log(0); normally inert because max-subtraction
            # guarantees one term w * exp(0) > 0.
            act = jnp.log(jnp.maximum(lin, 1e-38)) + off2d
            k = ns
            n_child = g_cnt

        # ---- root mixture over (replica, sum): stable log-sum-exp epilogue --
        m = jnp.max(act, axis=-1, keepdims=True)               # (TB, 1)
        e = jnp.exp(act - m)                                   # (TB, nr*ns)
        lin = jnp.sum(e * root_ref[...], axis=-1, keepdims=True)
        out_ref[...] = m + jnp.log(jnp.maximum(lin, 1e-38))

    return kernel


def graphspn_forward(zoh2d, w_leaf, layer_w, root_w, *, nl, nr, nd, ni, ns):
    b, width = zoh2d.shape
    tb = b if b <= 512 else 512                    # B-tile (single tile when small)
    grid = (pl.cdiv(b, tb),)

    in_specs = [pl.BlockSpec((tb, width), lambda i: (i, 0)),
                pl.BlockSpec(w_leaf.shape, lambda i: (0, 0))]
    in_specs += [pl.BlockSpec(w.shape, lambda i: (0, 0)) for w in layer_w]
    in_specs += [pl.BlockSpec(root_w.shape, lambda i: (0, 0))]

    return pl.pallas_call(
        _make_fused_kernel(nl, nr, nd, ni, ns),
        out_shape=jax.ShapeDtypeStruct((b, 1), jnp.float32),
        grid=grid,
        in_specs=in_specs,
        out_specs=pl.BlockSpec((tb, 1), lambda i: (i, 0)),
        compiler_params=pltpu.CompilerParams(
            dimension_semantics=("parallel",)),    # shards B-tiles over v7x's 2 TCs
    )(zoh2d, w_leaf, *layer_w, root_w)


# ------------------------------ model wrapper -----------------------------------

class GraphSPNZeroFreePallas:
    def __init__(self, nd_n, nk_n, nk_e, ns, ni, nl, nr, key):
        self.nd_nodes = nd_n
        self.nk_nodes = nk_n
        self.nk_edges = nk_e
        self.nd = nd_n + 1
        self.nk = max(nk_n, nk_e)
        self.ns, self.ni, self.nl, self.nr = ns, ni, nl, nr
        assert self.nd == 2 ** nl, "singleton-leaf balanced binary tree needs nd == 2**nl"
        # TODO(synk): general Graph.random_binary_trees region graphs (multi-variable
        # leaf regions / arbitrary depth) are not replicated; a balanced singleton-leaf
        # tree with per-replica random variable permutations is used instead.

        keys = jax.random.split(key, 3 + nl)

        # per-replica variable permutation (the randomness of random_binary_trees)
        perms = np.stack([np.asarray(jax.random.permutation(kk, self.nd))
                          for kk in jax.random.split(keys[0], nr)])        # (nr, nd)
        self.perms = perms

        # Leaf categoricals (nd, nr, ni, nk), log-softmax over categories, baked
        # together with the permutation into ONE block matrix (nd*nk, nr*nd*ni):
        # column ((r*nd + p)*ni + i) is nonzero only on rows of variable perm[r, p],
        # so zoh @ w_leaf gathers the right log-prob for every (replica, position).
        raw = 0.5 * jax.random.normal(keys[1], (self.nd, nr, ni, self.nk), jnp.float32)
        leaf_logp = np.asarray(jax.nn.log_softmax(raw, axis=-1))
        w_leaf = np.zeros((self.nd * self.nk, nr * self.nd * ni), np.float32)
        for r in range(nr):
            for p in range(self.nd):
                v = int(perms[r, p])
                c0 = (r * self.nd + p) * ni
                w_leaf[v * self.nk:(v + 1) * self.nk, c0:c0 + ni] = leaf_logp[v, r].T
        self.w_leaf = jnp.asarray(w_leaf)

        # Sum/product layer weights: softmax-normalized over child combinations
        # (j, i) per (group, sum), stored block-diagonally as (G*K*K, G*ns) bf16 so
        # each layer is a single lane-dense MXU matmul inside the fused kernel.
        self.layer_w = []
        n_in = ni
        for t in range(nl):
            pairs = 2 ** (nl - 1 - t)
            g_cnt = nr * pairs
            raw = 0.5 * jax.random.normal(keys[2 + t], (g_cnt, n_in, n_in, ns),
                                          jnp.float32)
            w = np.asarray(jax.nn.softmax(raw.reshape(g_cnt, n_in * n_in, ns), axis=1))
            wbd = np.zeros((g_cnt * n_in * n_in, g_cnt * ns), np.float32)
            for g in range(g_cnt):
                wbd[g * n_in * n_in:(g + 1) * n_in * n_in,
                    g * ns:(g + 1) * ns] = w[g]
            self.layer_w.append(jnp.asarray(wbd, dtype=jnp.bfloat16))
            n_in = ns

        # root mixture over (replica, sum) -> num_classes = 1
        raw = 0.5 * jax.random.normal(keys[2 + nl], (1, nr * ns), jnp.float32)
        self.root_w = jax.nn.softmax(raw, axis=-1)

    def __call__(self, x, a):
        n = x.shape[0]
        # ---- ohe2cat + row assembly (glue, matches the PyTorch forward) ----
        xc = jnp.argmax(x, axis=2)                                  # (n, nd_n)
        ac = jnp.argmax(a, axis=3)                                  # (n, nd_n, nd_n)
        xx = xc.reshape(n * self.nd_nodes)
        aa = ac.reshape(n * self.nd_nodes, self.nd_nodes)
        z = jnp.concatenate([xx[:, None], aa], axis=1)              # (B, nd)
        zoh = jax.nn.one_hot(z, self.nk, dtype=jnp.float32)         # (B, nd, nk)
        zoh2d = zoh.reshape(z.shape[0], self.nd * self.nk)          # (B, nd*nk)
        return graphspn_forward(zoh2d, self.w_leaf, self.layer_w, self.root_w,
                                nl=self.nl, nr=self.nr, nd=self.nd,
                                ni=self.ni, ns=self.ns)             # (B, 1) log-lik

    def logpdf(self, x, a):
        return jnp.mean(self(x, a))


# ---------------------------------- main ----------------------------------------

if __name__ == "__main__":
    key = jax.random.PRNGKey(0)
    k_model, k_x, k_a = jax.random.split(key, 3)

    # small shapes consistent with the module: nd = nd_n + 1 = 2**nl
    nd_n, nk_n, nk_e = 7, 4, 3
    ns, ni, nl, nr = 8, 8, 3, 2
    n = 2

    model = GraphSPNZeroFreePallas(nd_n, nk_n, nk_e, ns, ni, nl, nr, k_model)

    xc = jax.random.randint(k_x, (n, nd_n), 0, nk_n)
    ac = jax.random.randint(k_a, (n, nd_n, nd_n), 0, nk_e)
    x = jax.nn.one_hot(xc, nk_n, dtype=jnp.float32)        # (2, 7, 4)
    a = jax.nn.one_hot(ac, nk_e, dtype=jnp.float32)        # (2, 7, 7, 3)

    out = model(x, a)
    out = jax.block_until_ready(out)

    assert out.shape == (n * nd_n, 1), out.shape
    assert bool(jnp.all(jnp.isfinite(out)))
    assert bool(jnp.all(out <= 0.0))   # log-likelihoods of a normalized SPN
    print("KERNEL_OK")
</pallas_src>

<mosaic_0001>
module attributes {stable_mosaic.version = 11 : i64} {
  func.func @kernel(%arg0: i32, %arg1: memref<14x32xf32, #tpu.memory_space<vmem>>, %arg2: memref<32x128xf32, #tpu.memory_space<vmem>>, %arg3: memref<512x64xbf16, #tpu.memory_space<vmem>>, %arg4: memref<256x32xbf16, #tpu.memory_space<vmem>>, %arg5: memref<128x16xbf16, #tpu.memory_space<vmem>>, %arg6: memref<1x16xf32, #tpu.memory_space<vmem>>, %arg7: memref<14x1xf32, #tpu.memory_space<vmem>>) attributes {dimension_semantics = [#tpu.dimension_semantics<parallel>], iteration_bounds = array<i64: 1>, scalar_prefetch = 0 : i64, scratch_operands = 0 : i64, tpu.core_type = #tpu.core_type<tc>, window_params = [{transform_indices = @transform_0, window_bounds = array<i64: 14, 32>}, {pipeline_mode = #tpu.pipeline_mode<synchronous>, transform_indices = @transform_1, window_bounds = array<i64: 32, 128>}, {pipeline_mode = #tpu.pipeline_mode<synchronous>, transform_indices = @transform_2, window_bounds = array<i64: 512, 64>}, {pipeline_mode = #tpu.pipeline_mode<synchronous>, transform_indices = @transform_3, window_bounds = array<i64: 256, 32>}, {pipeline_mode = #tpu.pipeline_mode<synchronous>, transform_indices = @transform_4, window_bounds = array<i64: 128, 16>}, {pipeline_mode = #tpu.pipeline_mode<synchronous>, transform_indices = @transform_5, window_bounds = array<i64: 1, 16>}, {transform_indices = @transform_6, window_bounds = array<i64: 14, 1>}]} {
    %c0 = arith.constant 0 : index
    %c0_0 = arith.constant 0 : index
    %0 = vector.load %arg1[%c0, %c0_0] : memref<14x32xf32, #tpu.memory_space<vmem>>, vector<14x32xf32>
    %c0_1 = arith.constant 0 : index
    %c0_2 = arith.constant 0 : index
    %1 = vector.load %arg2[%c0_1, %c0_2] : memref<32x128xf32, #tpu.memory_space<vmem>>, vector<32x128xf32>
    %cst = arith.constant dense<0.000000e+00> : vector<14x128xf32>
    %2 = tpu.matmul %0, %1, %cst {dimension_numbers = #tpu.dot_dimension_numbers<[1], [0], [0], [1], [0, 0, 1, 1], [], []>} : vector<14x32xf32>, vector<32x128xf32>, vector<14x128xf32> -> vector<14x128xf32>
    %3 = vector.extract_strided_slice %2 {offsets = [0, 0], sizes = [14, 8], strides = [1, 1]} : vector<14x128xf32> to vector<14x8xf32>
    %4 = vector.extract_strided_slice %2 {offsets = [0, 8], sizes = [14, 8], strides = [1, 1]} : vector<14x128xf32> to vector<14x8xf32>
    %cst_3 = arith.constant dense<0xFF800000> : vector<14xf32>
    %5 = vector.multi_reduction <maximumf>, %3, %cst_3 [1] : vector<14x8xf32> to vector<14xf32>
    %6 = vector.shape_cast %5 : vector<14xf32> to vector<14x1xf32>
    %cst_4 = arith.constant dense<0xFF800000> : vector<14xf32>
    %7 = vector.multi_reduction <maximumf>, %4, %cst_4 [1] : vector<14x8xf32> to vector<14xf32>
    %8 = vector.shape_cast %7 : vector<14xf32> to vector<14x1xf32>
    %9 = vector.broadcast %6 : vector<14x1xf32> to vector<14x8xf32>
    %10 = arith.subf %3, %9 : vector<14x8xf32>
    %11 = math.exp %10 : vector<14x8xf32>
    %12 = vector.broadcast %8 : vector<14x1xf32> to vector<14x8xf32>
    %13 = arith.subf %4, %12 : vector<14x8xf32>
    %14 = math.exp %13 : vector<14x8xf32>
    %15 = vector.extract_strided_slice %14 {offsets = [0, 0], sizes = [14, 1], strides = [1, 1]} : vector<14x8xf32> to vector<14x1xf32>
    %16 = vector.broadcast %15 : vector<14x1xf32> to vector<14x8xf32>
    %17 = arith.mulf %16, %11 : vector<14x8xf32>
    %18 = vector.extract_strided_slice %14 {offsets = [0, 1], sizes = [14, 1], strides = [1, 1]} : vector<14x8xf32> to vector<14x1xf32>
    %19 = vector.broadcast %18 : vector<14x1xf32> to vector<14x8xf32>
    %20 = arith.mulf %19, %11 : vector<14x8xf32>
    %21 = vector.extract_strided_slice %14 {offsets = [0, 2], sizes = [14, 1], strides = [1, 1]} : vector<14x8xf32> to vector<14x1xf32>
    %22 = vector.broadcast %21 : vector<14x1xf32> to vector<14x8xf32>
    %23 = arith.mulf %22, %11 : vector<14x8xf32>
    %24 = vector.extract_strided_slice %14 {offsets = [0, 3], sizes = [14, 1], strides = [1, 1]} : vector<14x8xf32> to vector<14x1xf32>
    %25 = vector.broadcast %24 : vector<14x1xf32> to vector<14x8xf32>
    %26 = arith.mulf %25, %11 : vector<14x8xf32>
    %27 = vector.extract_strided_slice %14 {offsets = [0, 4], sizes = [14, 1], strides = [1, 1]} : vector<14x8xf32> to vector<14x1xf32>
    %28 = vector.broadcast %27 : vector<14x1xf32> to vector<14x8xf32>
    %29 = arith.mulf %28, %11 : vector<14x8xf32>
    %30 = vector.extract_strided_slice %14 {offsets = [0, 5], sizes = [14, 1], strides = [1, 1]} : vector<14x8xf32> to vector<14x1xf32>
    %31 = vector.broadcast %30 : vector<14x1xf32> to vector<14x8xf32>
    %32 = arith.mulf %31, %11 : vector<14x8xf32>
    %33 = vector.extract_strided_slice %14 {offsets = [0, 6], sizes = [14, 1], strides = [1, 1]} : vector<14x8xf32> to vector<14x1xf32>
    %34 = vector.broadcast %33 : vector<14x1xf32> to vector<14x8xf32>
    %35 = arith.mulf %34, %11 : vector<14x8xf32>
    %36 = vector.extract_strided_slice %14 {offsets = [0, 7], sizes = [14, 1], strides = [1, 1]} : vector<14x8xf32> to vector<14x1xf32>
    %37 = vector.broadcast %36 : vector<14x1xf32> to vector<14x8xf32>
    %38 = arith.mulf %37, %11 : vector<14x8xf32>
    %39 = arith.addf %6, %8 : vector<14x1xf32>
    %40 = vector.shape_cast %39 : vector<14x1xf32> to vector<14x1xf32>
    %41 = vector.broadcast %40 : vector<14x1xf32> to vector<14x8xf32>
    %42 = vector.extract_strided_slice %2 {offsets = [0, 16], sizes = [14, 8], strides = [1, 1]} : vector<14x128xf32> to vector<14x8xf32>
    %43 = vector.extract_strided_slice %2 {offsets = [0, 24], sizes = [14, 8], strides = [1, 1]} : vector<14x128xf32> to vector<14x8xf32>
    %cst_5 = arith.constant dense<0xFF800000> : vector<14xf32>
    %44 = vector.multi_reduction <maximumf>, %42, %cst_5 [1] : vector<14x8xf32> to vector<14xf32>
    %45 = vector.shape_cast %44 : vector<14xf32> to vector<14x1xf32>
    %cst_6 = arith.constant dense<0xFF800000> : vector<14xf32>
    %46 = vector.multi_reduction <maximumf>, %43, %cst_6 [1] : vector<14x8xf32> to vector<14xf32>
    %47 = vector.shape_cast %46 : vector<14xf32> to vector<14x1xf32>
    %48 = vector.broadcast %45 : vector<14x1xf32> to vector<14x8xf32>
    %49 = arith.subf %42, %48 : vector<14x8xf32>
    %50 = math.exp %49 : vector<14x8xf32>
    %51 = vector.broadcast %47 : vector<14x1xf32> to vector<14x8xf32>
    %52 = arith.subf %43, %51 : vector<14x8xf32>
    %53 = math.exp %52 : vector<14x8xf32>
    %54 = vector.extract_strided_slice %53 {offsets = [0, 0], sizes = [14, 1], strides = [1, 1]} : vector<14x8xf32> to vector<14x1xf32>
    %55 = vector.broadcast %54 : vector<14x1xf32> to vector<14x8xf32>
    %56 = arith.mulf %55, %50 : vector<14x8xf32>
    %57 = vector.extract_strided_slice %53 {offsets = [0, 1], sizes = [14, 1], strides = [1, 1]} : vector<14x8xf32> to vector<14x1xf32>
    %58 = vector.broadcast %57 : vector<14x1xf32> to vector<14x8xf32>
    %59 = arith.mulf %58, %50 : vector<14x8xf32>
    %60 = vector.extract_strided_slice %53 {offsets = [0, 2], sizes = [14, 1], strides = [1, 1]} : vector<14x8xf32> to vector<14x1xf32>
    %61 = vector.broadcast %60 : vector<14x1xf32> to vector<14x8xf32>
    %62 = arith.mulf %61, %50 : vector<14x8xf32>
    %63 = vector.extract_strided_slice %53 {offsets = [0, 3], sizes = [14, 1], strides = [1, 1]} : vector<14x8xf32> to vector<14x1xf32>
    %64 = vector.broadcast %63 : vector<14x1xf32> to vector<14x8xf32>
    %65 = arith.mulf %64, %50 : vector<14x8xf32>
    %66 = vector.extract_strided_slice %53 {offsets = [0, 4], sizes = [14, 1], strides = [1, 1]} : vector<14x8xf32> to vector<14x1xf32>
    %67 = vector.broadcast %66 : vector<14x1xf32> to vector<14x8xf32>
    %68 = arith.mulf %67, %50 : vector<14x8xf32>
    %69 = vector.extract_strided_slice %53 {offsets = [0, 5], sizes = [14, 1], strides = [1, 1]} : vector<14x8xf32> to vector<14x1xf32>
    %70 = vector.broadcast %69 : vector<14x1xf32> to vector<14x8xf32>
    %71 = arith.mulf %70, %50 : vector<14x8xf32>
    %72 = vector.extract_strided_slice %53 {offsets = [0, 6], sizes = [14, 1], strides = [1, 1]} : vector<14x8xf32> to vector<14x1xf32>
    %73 = vector.broadcast %72 : vector<14x1xf32> to vector<14x8xf32>
    %74 = arith.mulf %73, %50 : vector<14x8xf32>
    %75 = vector.extract_strided_slice %53 {offsets = [0, 7], sizes = [14, 1], strides = [1, 1]} : vector<14x8xf32> to vector<14x1xf32>
    %76 = vector.broadcast %75 : vector<14x1xf32> to vector<14x8xf32>
    %77 = arith.mulf %76, %50 : vector<14x8xf32>
    %78 = arith.addf %45, %47 : vector<14x1xf32>
    %79 = vector.shape_cast %78 : vector<14x1xf32> to vector<14x1xf32>
    %80 = vector.broadcast %79 : vector<14x1xf32> to vector<14x8xf32>
    %81 = vector.extract_strided_slice %2 {offsets = [0, 32], sizes = [14, 8], strides = [1, 1]} : vector<14x128xf32> to vector<14x8xf32>
    %82 = vector.extract_strided_slice %2 {offsets = [0, 40], sizes = [14, 8], strides = [1, 1]} : vector<14x128xf32> to vector<14x8xf32>
    %cst_7 = arith.constant dense<0xFF800000> : vector<14xf32>
    %83 = vector.multi_reduction <maximumf>, %81, %cst_7 [1] : vector<14x8xf32> to vector<14xf32>
    %84 = vector.shape_cast %83 : vector<14xf32> to vector<14x1xf32>
    %cst_8 = arith.constant dense<0xFF800000> : vector<14xf32>
    %85 = vector.multi_reduction <maximumf>, %82, %cst_8 [1] : vector<14x8xf32> to vector<14xf32>
    %86 = vector.shape_cast %85 : vector<14xf32> to vector<14x1xf32>
    %87 = vector.broadcast %84 : vector<14x1xf32> to vector<14x8xf32>
    %88 = arith.subf %81, %87 : vector<14x8xf32>
    %89 = math.exp %88 : vector<14x8xf32>
    %90 = vector.broadcast %86 : vector<14x1xf32> to vector<14x8xf32>
    %91 = arith.subf %82, %90 : vector<14x8xf32>
    %92 = math.exp %91 : vector<14x8xf32>
    %93 = vector.extract_strided_slice %92 {offsets = [0, 0], sizes = [14, 1], strides = [1, 1]} : vector<14x8xf32> to vector<14x1xf32>
    %94 = vector.broadcast %93 : vector<14x1xf32> to vector<14x8xf32>
    %95 = arith.mulf %94, %89 : vector<14x8xf32>
    %96 = vector.extract_strided_slice %92 {offsets = [0, 1], sizes = [14, 1], strides = [1, 1]} : vector<14x8xf32> to vector<14x1xf32>
    %97 = vector.broadcast %96 : vector<14x1xf32> to vector<14x8xf32>
    %98 = arith.mulf %97, %89 : vector<14x8xf32>
    %99 = vector.extract_strided_slice %92 {offsets = [0, 2], sizes = [14, 1], strides = [1, 1]} : vector<14x8xf32> to vector<14x1xf32>
    %100 = vector.broadcast %99 : vector<14x1xf32> to vector<14x8xf32>
    %101 = arith.mulf %100, %89 : vector<14x8xf32>
    %102 = vector.extract_strided_slice %92 {offsets = [0, 3], sizes = [14, 1], strides = [1, 1]} : vector<14x8xf32> to vector<14x1xf32>
    %103 = vector.broadcast %102 : vector<14x1xf32> to vector<14x8xf32>
    %104 = arith.mulf %103, %89 : vector<14x8xf32>
    %105 = vector.extract_strided_slice %92 {offsets = [0, 4], sizes = [14, 1], strides = [1, 1]} : vector<14x8xf32> to vector<14x1xf32>
    %106 = vector.broadcast %105 : vector<14x1xf32> to vector<14x8xf32>
    %107 = arith.mulf %106, %89 : vector<14x8xf32>
    %108 = vector.extract_strided_slice %92 {offsets = [0, 5], sizes = [14, 1], strides = [1, 1]} : vector<14x8xf32> to vector<14x1xf32>
    %109 = vector.broadcast %108 : vector<14x1xf32> to vector<14x8xf32>
    %110 = arith.mulf %109, %89 : vector<14x8xf32>
    %111 = vector.extract_strided_slice %92 {offsets = [0, 6], sizes = [14, 1], strides = [1, 1]} : vector<14x8xf32> to vector<14x1xf32>
    %112 = vector.broadcast %111 : vector<14x1xf32> to vector<14x8xf32>
    %113 = arith.mulf %112, %89 : vector<14x8xf32>
    %114 = vector.extract_strided_slice %92 {offsets = [0, 7], sizes = [14, 1], strides = [1, 1]} : vector<14x8xf32> to vector<14x1xf32>
    %115 = vector.broadcast %114 : vector<14x1xf32> to vector<14x8xf32>
    %116 = arith.mulf %115, %89 : vector<14x8xf32>
    %117 = arith.addf %84, %86 : vector<14x1xf32>
    %118 = vector.shape_cast %117 : vector<14x1xf32> to vector<14x1xf32>
    %119 = vector.broadcast %118 : vector<14x1xf32> to vector<14x8xf32>
    %120 = vector.extract_strided_slice %2 {offsets = [0, 48], sizes = [14, 8], strides = [1, 1]} : vector<14x128xf32> to vector<14x8xf32>
    %121 = vector.extract_strided_slice %2 {offsets = [0, 56], sizes = [14, 8], strides = [1, 1]} : vector<14x128xf32> to vector<14x8xf32>
    %cst_9 = arith.constant dense<0xFF800000> : vector<14xf32>
    %122 = vector.multi_reduction <maximumf>, %120, %cst_9 [1] : vector<14x8xf32> to vector<14xf32>
    %123 = vector.shape_cast %122 : vector<14xf32> to vector<14x1xf32>
    %cst_10 = arith.constant dense<0xFF800000> : vector<14xf32>
    %124 = vector.multi_reduction <maximumf>, %121, %cst_10 [1] : vector<14x8xf32> to vector<14xf32>
    %125 = vector.shape_cast %124 : vector<14xf32> to vector<14x1xf32>
    %126 = vector.broadcast %123 : vector<14x1xf32> to vector<14x8xf32>
    %127 = arith.subf %120, %126 : vector<14x8xf32>
    %128 = math.exp %127 : vector<14x8xf32>
    %129 = vector.broadcast %125 : vector<14x1xf32> to vector<14x8xf32>
    %130 = arith.subf %121, %129 : vector<14x8xf32>
    %131 = math.exp %130 : vector<14x8xf32>
    %132 = vector.extract_strided_slice %131 {offsets = [0, 0], sizes = [14, 1], strides = [1, 1]} : vector<14x8xf32> to vector<14x1xf32>
    %133 = vector.broadcast %132 : vector<14x1xf32> to vector<14x8xf32>
    %134 = arith.mulf %133, %128 : vector<14x8xf32>
    %135 = vector.extract_strided_slice %131 {offsets = [0, 1], sizes = [14, 1], strides = [1, 1]} : vector<14x8xf32> to vector<14x1xf32>
    %136 = vector.broadcast %135 : vector<14x1xf32> to vector<14x8xf32>
    %137 = arith.mulf %136, %128 : vector<14x8xf32>
    %138 = vector.extract_strided_slice %131 {offsets = [0, 2], sizes = [14, 1], strides = [1, 1]} : vector<14x8xf32> to vector<14x1xf32>
    %139 = vector.broadcast %138 : vector<14x1xf32> to vector<14x8xf32>
    %140 = arith.mulf %139, %128 : vector<14x8xf32>
    %141 = vector.extract_strided_slice %131 {offsets = [0, 3], sizes = [14, 1], strides = [1, 1]} : vector<14x8xf32> to vector<14x1xf32>
    %142 = vector.broadcast %141 : vector<14x1xf32> to vector<14x8xf32>
    %143 = arith.mulf %142, %128 : vector<14x8xf32>
    %144 = vector.extract_strided_slice %131 {offsets = [0, 4], sizes = [14, 1], strides = [1, 1]} : vector<14x8xf32> to vector<14x1xf32>
    %145 = vector.broadcast %144 : vector<14x1xf32> to vector<14x8xf32>
    %146 = arith.mulf %145, %128 : vector<14x8xf32>
    %147 = vector.extract_strided_slice %131 {offsets = [0, 5], sizes = [14, 1], strides = [1, 1]} : vector<14x8xf32> to vector<14x1xf32>
    %148 = vector.broadcast %147 : vector<14x1xf32> to vector<14x8xf32>
    %149 = arith.mulf %148, %128 : vector<14x8xf32>
    %150 = vector.extract_strided_slice %131 {offsets = [0, 6], sizes = [14, 1], strides = [1, 1]} : vector<14x8xf32> to vector<14x1xf32>
    %151 = vector.broadcast %150 : vector<14x1xf32> to vector<14x8xf32>
    %152 = arith.mulf %151, %128 : vector<14x8xf32>
    %153 = vector.extract_strided_slice %131 {offsets = [0, 7], sizes = [14, 1], strides = [1, 1]} : vector<14x8xf32> to vector<14x1xf32>
    %154 = vector.broadcast %153 : vector<14x1xf32> to vector<14x8xf32>
    %155 = arith.mulf %154, %128 : vector<14x8xf32>
    %156 = arith.addf %123, %125 : vector<14x1xf32>
    %157 = vector.shape_cast %156 : vector<14x1xf32> to vector<14x1xf32>
    %158 = vector.broadcast %157 : vector<14x1xf32> to vector<14x8xf32>
    %159 = vector.extract_strided_slice %2 {offsets = [0, 64], sizes = [14, 8], strides = [1, 1]} : vector<14x128xf32> to vector<14x8xf32>
    %160 = vector.extract_strided_slice %2 {offsets = [0, 72], sizes = [14, 8], strides = [1, 1]} : vector<14x128xf32> to vector<14x8xf32>
    %cst_11 = arith.constant dense<0xFF800000> : vector<14xf32>
    %161 = vector.multi_reduction <maximumf>, %159, %cst_11 [1] : vector<14x8xf32> to vector<14xf32>
    %162 = vector.shape_cast %161 : vector<14xf32> to vector<14x1xf32>
    %cst_12 = arith.constant dense<0xFF800000> : vector<14xf32>
    %163 = vector.multi_reduction <maximumf>, %160, %cst_12 [1] : vector<14x8xf32> to vector<14xf32>
    %164 = vector.shape_cast %163 : vector<14xf32> to vector<14x1xf32>
    %165 = vector.broadcast %162 : vector<14x1xf32> to vector<14x8xf32>
    %166 = arith.subf %159, %165 : vector<14x8xf32>
    %167 = math.exp %166 : vector<14x8xf32>
    %168 = vector.broadcast %164 : vector<14x1xf32> to vector<14x8xf32>
    %169 = arith.subf %160, %168 : vector<14x8xf32>
    %170 = math.exp %169 : vector<14x8xf32>
    %171 = vector.extract_strided_slice %170 {offsets = [0, 0], sizes = [14, 1], strides = [1, 1]} : vector<14x8xf32> to vector<14x1xf32>
    %172 = vector.broadcast %171 : vector<14x1xf32> to vector<14x8xf32>
    %173 = arith.mulf %172, %167 : vector<14x8xf32>
    %174 = vector.extract_strided_slice %170 {offsets = [0, 1], sizes = [14, 1], strides = [1, 1]} : vector<14x8xf32> to vector<14x1xf32>
    %175 = vector.broadcast %174 : vector<14x1xf32> to vector<14x8xf32>
    %176 = arith.mulf %175, %167 : vector<14x8xf32>
    %177 = vector.extract_strided_slice %170 {offsets = [0, 2], sizes = [14, 1], strides = [1, 1]} : vector<14x8xf32> to vector<14x1xf32>
    %178 = vector.broadcast %177 : vector<14x1xf32> to vector<14x8xf32>
    %179 = arith.mulf %178, %167 : vector<14x8xf32>
    %180 = vector.extract_strided_slice %170 {offsets = [0, 3], sizes = [14, 1], strides = [1, 1]} : vector<14x8xf32> to vector<14x1xf32>
    %181 = vector.broadcast %180 : vector<14x1xf32> to vector<14x8xf32>
    %182 = arith.mulf %181, %167 : vector<14x8xf32>
    %183 = vector.extract_strided_slice %170 {offsets = [0, 4], sizes = [14, 1], strides = [1, 1]} : vector<14x8xf32> to vector<14x1xf32>
    %184 = vector.broadcast %183 : vector<14x1xf32> to vector<14x8xf32>
    %185 = arith.mulf %184, %167 : vector<14x8xf32>
    %186 = vector.extract_strided_slice %170 {offsets = [0, 5], sizes = [14, 1], strides = [1, 1]} : vector<14x8xf32> to vector<14x1xf32>
    %187 = vector.broadcast %186 : vector<14x1xf32> to vector<14x8xf32>
    %188 = arith.mulf %187, %167 : vector<14x8xf32>
    %189 = vector.extract_strided_slice %170 {offsets = [0, 6], sizes = [14, 1], strides = [1, 1]} : vector<14x8xf32> to vector<14x1xf32>
    %190 = vector.broadcast %189 : vector<14x1xf32> to vector<14x8xf32>
    %191 = arith.mulf %190, %167 : vector<14x8xf32>
    %192 = vector.extract_strided_slice %170 {offsets = [0, 7], sizes = [14, 1], strides = [1, 1]} : vector<14x8xf32> to vector<14x1xf32>
    %193 = vector.broadcast %192 : vector<14x1xf32> to vector<14x8xf32>
    %194 = arith.mulf %193, %167 : vector<14x8xf32>
    %195 = arith.addf %162, %164 : vector<14x1xf32>
    %196 = vector.shape_cast %195 : vector<14x1xf32> to vector<14x1xf32>
    %197 = vector.broadcast %196 : vector<14x1xf32> to vector<14x8xf32>
    %198 = vector.extract_strided_slice %2 {offsets = [0, 80], sizes = [14, 8], strides = [1, 1]} : vector<14x128xf32> to vector<14x8xf32>
    %199 = vector.extract_strided_slice %2 {offsets = [0, 88], sizes = [14, 8], strides = [1, 1]} : vector<14x128xf32> to vector<14x8xf32>
    %cst_13 = arith.constant dense<0xFF800000> : vector<14xf32>
    %200 = vector.multi_reduction <maximumf>, %198, %cst_13 [1] : vector<14x8xf32> to vector<14xf32>
    %201 = vector.shape_cast %200 : vector<14xf32> to vector<14x1xf32>
    %cst_14 = arith.constant dense<0xFF800000> : vector<14xf32>
    %202 = vector.multi_reduction <maximumf>, %199, %cst_14 [1] : vector<14x8xf32> to vector<14xf32>
    %203 = vector.shape_cast %202 : vector<14xf32> to vector<14x1xf32>
    %204 = vector.broadcast %201 : vector<14x1xf32> to vector<14x8xf32>
    %205 = arith.subf %198, %204 : vector<14x8xf32>
    %206 = math.exp %205 : vector<14x8xf32>
    %207 = vector.broadcast %203 : vector<14x1xf32> to vector<14x8xf32>
    %208 = arith.subf %199, %207 : vector<14x8xf32>
    %209 = math.exp %208 : vector<14x8xf32>
    %210 = vector.extract_strided_slice %209 {offsets = [0, 0], sizes = [14, 1], strides = [1, 1]} : vector<14x8xf32> to vector<14x1xf32>
    %211 = vector.broadcast %210 : vector<14x1xf32> to vector<14x8xf32>
    %212 = arith.mulf %211, %206 : vector<14x8xf32>
    %213 = vector.extract_strided_slice %209 {offsets = [0, 1], sizes = [14, 1], strides = [1, 1]} : vector<14x8xf32> to vector<14x1xf32>
    %214 = vector.broadcast %213 : vector<14x1xf32> to vector<14x8xf32>
    %215 = arith.mulf %214, %206 : vector<14x8xf32>
    %216 = vector.extract_strided_slice %209 {offsets = [0, 2], sizes = [14, 1], strides = [1, 1]} : vector<14x8xf32> to vector<14x1xf32>
    %217 = vector.broadcast %216 : vector<14x1xf32> to vector<14x8xf32>
    %218 = arith.mulf %217, %206 : vector<14x8xf32>
    %219 = vector.extract_strided_slice %209 {offsets = [0, 3], sizes = [14, 1], strides = [1, 1]} : vector<14x8xf32> to vector<14x1xf32>
    %220 = vector.broadcast %219 : vector<14x1xf32> to vector<14x8xf32>
    %221 = arith.mulf %220, %206 : vector<14x8xf32>
    %222 = vector.extract_strided_slice %209 {offsets = [0, 4], sizes = [14, 1], strides = [1, 1]} : vector<14x8xf32> to vector<14x1xf32>
    %223 = vector.broadcast %222 : vector<14x1xf32> to vector<14x8xf32>
    %224 = arith.mulf %223, %206 : vector<14x8xf32>
    %225 = vector.extract_strided_slice %209 {offsets = [0, 5], sizes = [14, 1], strides = [1, 1]} : vector<14x8xf32> to vector<14x1xf32>
    %226 = vector.broadcast %225 : vector<14x1xf32> to vector<14x8xf32>
    %227 = arith.mulf %226, %206 : vector<14x8xf32>
    %228 = vector.extract_strided_slice %209 {offsets = [0, 6], sizes = [14, 1], strides = [1, 1]} : vector<14x8xf32> to vector<14x1xf32>
    %229 = vector.broadcast %228 : vector<14x1xf32> to vector<14x8xf32>
    %230 = arith.mulf %229, %206 : vector<14x8xf32>
    %231 = vector.extract_strided_slice %209 {offsets = [0, 7], sizes = [14, 1], strides = [1, 1]} : vector<14x8xf32> to vector<14x1xf32>
    %232 = vector.broadcast %231 : vector<14x1xf32> to vector<14x8xf32>
    %233 = arith.mulf %232, %206 : vector<14x8xf32>
    %234 = arith.addf %201, %203 : vector<14x1xf32>
    %235 = vector.shape_cast %234 : vector<14x1xf32> to vector<14x1xf32>
    %236 = vector.broadcast %235 : vector<14x1xf32> to vector<14x8xf32>
    %237 = vector.extract_strided_slice %2 {offsets = [0, 96], sizes = [14, 8], strides = [1, 1]} : vector<14x128xf32> to vector<14x8xf32>
    %238 = vector.extract_strided_slice %2 {offsets = [0, 104], sizes = [14, 8], strides = [1, 1]} : vector<14x128xf32> to vector<14x8xf32>
    %cst_15 = arith.constant dense<0xFF800000> : vector<14xf32>
    %239 = vector.multi_reduction <maximumf>, %237, %cst_15 [1] : vector<14x8xf32> to vector<14xf32>
    %240 = vector.shape_cast %239 : vector<14xf32> to vector<14x1xf32>
    %cst_16 = arith.constant dense<0xFF800000> : vector<14xf32>
    %241 = vector.multi_reduction <maximumf>, %238, %cst_16 [1] : vector<14x8xf32> to vector<14xf32>
    %242 = vector.shape_cast %241 : vector<14xf32> to vector<14x1xf32>
    %243 = vector.broadcast %240 : vector<14x1xf32> to vector<14x8xf32>
    %244 = arith.subf %237, %243 : vector<14x8xf32>
    %245 = math.exp %244 : vector<14x8xf32>
    %246 = vector.broadcast %242 : vector<14x1xf32> to vector<14x8xf32>
    %247 = arith.subf %238, %246 : vector<14x8xf32>
    %248 = math.exp %247 : vector<14x8xf32>
    %249 = vector.extract_strided_slice %248 {offsets = [0, 0], sizes = [14, 1], strides = [1, 1]} : vector<14x8xf32> to vector<14x1xf32>
    %250 = vector.broadcast %249 : vector<14x1xf32> to vector<14x8xf32>
    %251 = arith.mulf %250, %245 : vector<14x8xf32>
    %252 = vector.extract_strided_slice %248 {offsets = [0, 1], sizes = [14, 1], strides = [1, 1]} : vector<14x8xf32> to vector<14x1xf32>
    %253 = vector.broadcast %252 : vector<14x1xf32> to vector<14x8xf32>
    %254 = arith.mulf %253, %245 : vector<14x8xf32>
    %255 = vector.extract_strided_slice %248 {offsets = [0, 2], sizes = [14, 1], strides = [1, 1]} : vector<14x8xf32> to vector<14x1xf32>
    %256 = vector.broadcast %255 : vector<14x1xf32> to vector<14x8xf32>
    %257 = arith.mulf %256, %245 : vector<14x8xf32>
    %258 = vector.extract_strided_slice %248 {offsets = [0, 3], sizes = [14, 1], strides = [1, 1]} : vector<14x8xf32> to vector<14x1xf32>
    %259 = vector.broadcast %258 : vector<14x1xf32> to vector<14x8xf32>
    %260 = arith.mulf %259, %245 : vector<14x8xf32>
    %261 = vector.extract_strided_slice %248 {offsets = [0, 4], sizes = [14, 1], strides = [1, 1]} : vector<14x8xf32> to vector<14x1xf32>
    %262 = vector.broadcast %261 : vector<14x1xf32> to vector<14x8xf32>
    %263 = arith.mulf %262, %245 : vector<14x8xf32>
    %264 = vector.extract_strided_slice %248 {offsets = [0, 5], sizes = [14, 1], strides = [1, 1]} : vector<14x8xf32> to vector<14x1xf32>
    %265 = vector.broadcast %264 : vector<14x1xf32> to vector<14x8xf32>
    %266 = arith.mulf %265, %245 : vector<14x8xf32>
    %267 = vector.extract_strided_slice %248 {offsets = [0, 6], sizes = [14, 1], strides = [1, 1]} : vector<14x8xf32> to vector<14x1xf32>
    %268 = vector.broadcast %267 : vector<14x1xf32> to vector<14x8xf32>
    %269 = arith.mulf %268, %245 : vector<14x8xf32>
    %270 = vector.extract_strided_slice %248 {offsets = [0, 7], sizes = [14, 1], strides = [1, 1]} : vector<14x8xf32> to vector<14x1xf32>
    %271 = vector.broadcast %270 : vector<14x1xf32> to vector<14x8xf32>
    %272 = arith.mulf %271, %245 : vector<14x8xf32>
    %273 = arith.addf %240, %242 : vector<14x1xf32>
    %274 = vector.shape_cast %273 : vector<14x1xf32> to vector<14x1xf32>
    %275 = vector.broadcast %274 : vector<14x1xf32> to vector<14x8xf32>
    %276 = vector.extract_strided_slice %2 {offsets = [0, 112], sizes = [14, 8], strides = [1, 1]} : vector<14x128xf32> to vector<14x8xf32>
    %277 = vector.extract_strided_slice %2 {offsets = [0, 120], sizes = [14, 8], strides = [1, 1]} : vector<14x128xf32> to vector<14x8xf32>
    %cst_17 = arith.constant dense<0xFF800000> : vector<14xf32>
    %278 = vector.multi_reduction <maximumf>, %276, %cst_17 [1] : vector<14x8xf32> to vector<14xf32>
    %279 = vector.shape_cast %278 : vector<14xf32> to vector<14x1xf32>
    %cst_18 = arith.constant dense<0xFF800000> : vector<14xf32>
    %280 = vector.multi_reduction <maximumf>, %277, %cst_18 [1] : vector<14x8xf32> to vector<14xf32>
    %281 = vector.shape_cast %280 : vector<14xf32> to vector<14x1xf32>
    %282 = vector.broadcast %279 : vector<14x1xf32> to vector<14x8xf32>
    %283 = arith.subf %276, %282 : vector<14x8xf32>
    %284 = math.exp %283 : vector<14x8xf32>
    %285 = vector.broadcast %281 : vector<14x1xf32> to vector<14x8xf32>
    %286 = arith.subf %277, %285 : vector<14x8xf32>
    %287 = math.exp %286 : vector<14x8xf32>
    %288 = vector.extract_strided_slice %287 {offsets = [0, 0], sizes = [14, 1], strides = [1, 1]} : vector<14x8xf32> to vector<14x1xf32>
    %289 = vector.broadcast %288 : vector<14x1xf32> to vector<14x8xf32>
    %290 = arith.mulf %289, %284 : vector<14x8xf32>
    %291 = vector.extract_strided_slice %287 {offsets = [0, 1], sizes = [14, 1], strides = [1, 1]} : vector<14x8xf32> to vector<14x1xf32>
    %292 = vector.broadcast %291 : vector<14x1xf32> to vector<14x8xf32>
    %293 = arith.mulf %292, %284 : vector<14x8xf32>
    %294 = vector.extract_strided_slice %287 {offsets = [0, 2], sizes = [14, 1], strides = [1, 1]} : vector<14x8xf32> to vector<14x1xf32>
    %295 = vector.broadcast %294 : vector<14x1xf32> to vector<14x8xf32>
    %296 = arith.mulf %295, %284 : vector<14x8xf32>
    %297 = vector.extract_strided_slice %287 {offsets = [0, 3], sizes = [14, 1], strides = [1, 1]} : vector<14x8xf32> to vector<14x1xf32>
    %298 = vector.broadcast %297 : vector<14x1xf32> to vector<14x8xf32>
    %299 = arith.mulf %298, %284 : vector<14x8xf32>
    %300 = vector.extract_strided_slice %287 {offsets = [0, 4], sizes = [14, 1], strides = [1, 1]} : vector<14x8xf32> to vector<14x1xf32>
    %301 = vector.broadcast %300 : vector<14x1xf32> to vector<14x8xf32>
    %302 = arith.mulf %301, %284 : vector<14x8xf32>
    %303 = vector.extract_strided_slice %287 {offsets = [0, 5], sizes = [14, 1], strides = [1, 1]} : vector<14x8xf32> to vector<14x1xf32>
    %304 = vector.broadcast %303 : vector<14x1xf32> to vector<14x8xf32>
    %305 = arith.mulf %304, %284 : vector<14x8xf32>
    %306 = vector.extract_strided_slice %287 {offsets = [0, 6], sizes = [14, 1], strides = [1, 1]} : vector<14x8xf32> to vector<14x1xf32>
    %307 = vector.broadcast %306 : vector<14x1xf32> to vector<14x8xf32>
    %308 = arith.mulf %307, %284 : vector<14x8xf32>
    %309 = vector.extract_strided_slice %287 {offsets = [0, 7], sizes = [14, 1], strides = [1, 1]} : vector<14x8xf32> to vector<14x1xf32>
    %310 = vector.broadcast %309 : vector<14x1xf32> to vector<14x8xf32>
    %311 = arith.mulf %310, %284 : vector<14x8xf32>
    %312 = arith.addf %279, %281 : vector<14x1xf32>
    %313 = vector.shape_cast %312 : vector<14x1xf32> to vector<14x1xf32>
    %314 = vector.broadcast %313 : vector<14x1xf32> to vector<14x8xf32>
    %315 = tpu.concatenate %17, %20, %23, %26, %29, %32, %35, %38, %56, %59, %62, %65, %68, %71, %74, %77 in 1 : vector<14x8xf32>, vector<14x8xf32>, vector<14x8xf32>, vector<14x8xf32>, vector<14x8xf32>, vector<14x8xf32>, vector<14x8xf32>, vector<14x8xf32>, vector<14x8xf32>, vector<14x8xf32>, vector<14x8xf32>, vector<14x8xf32>, vector<14x8xf32>, vector<14x8xf32>, vector<14x8xf32>, vector<14x8xf32> -> vector<14x128xf32>
    %316 = tpu.concatenate %95, %98, %101, %104, %107, %110, %113, %116, %134, %137, %140, %143, %146, %149, %152, %155 in 1 : vector<14x8xf32>, vector<14x8xf32>, vector<14x8xf32>, vector<14x8xf32>, vector<14x8xf32>, vector<14x8xf32>, vector<14x8xf32>, vector<14x8xf32>, vector<14x8xf32>, vector<14x8xf32>, vector<14x8xf32>, vector<14x8xf32>, vector<14x8xf32>, vector<14x8xf32>, vector<14x8xf32>, vector<14x8xf32> -> vector<14x128xf32>
    %317 = tpu.concatenate %173, %176, %179, %182, %185, %188, %191, %194, %212, %215, %218, %221, %224, %227, %230, %233 in 1 : vector<14x8xf32>, vector<14x8xf32>, vector<14x8xf32>, vector<14x8xf32>, vector<14x8xf32>, vector<14x8xf32>, vector<14x8xf32>, vector<14x8xf32>, vector<14x8xf32>, vector<14x8xf32>, vector<14x8xf32>, vector<14x8xf32>, vector<14x8xf32>, vector<14x8xf32>, vector<14x8xf32>, vector<14x8xf32> -> vector<14x128xf32>
    %318 = tpu.concatenate %251, %254, %257, %260, %263, %266, %269, %272, %290, %293, %296, %299, %302, %305, %308, %311 in 1 : vector<14x8xf32>, vector<14x8xf32>, vector<14x8xf32>, vector<14x8xf32>, vector<14x8xf32>, vector<14x8xf32>, vector<14x8xf32>, vector<14x8xf32>, vector<14x8xf32>, vector<14x8xf32>, vector<14x8xf32>, vector<14x8xf32>, vector<14x8xf32>, vector<14x8xf32>, vector<14x8xf32>, vector<14x8xf32> -> vector<14x128xf32>
    %319 = tpu.concatenate %315, %316, %317, %318 in 1 : vector<14x128xf32>, vector<14x128xf32>, vector<14x128xf32>, vector<14x128xf32> -> vector<14x512xf32>
    %320 = arith.truncf %319 : vector<14x512xf32> to vector<14x512xbf16>
    %c0_19 = arith.constant 0 : index
    %c0_20 = arith.constant 0 : index
    %321 = vector.load %arg3[%c0_19, %c0_20] : memref<512x64xbf16, #tpu.memory_space<vmem>>, vector<512x64xbf16>
    %cst_21 = arith.constant dense<0.000000e+00> : vector<14x64xf32>
    %322 = tpu.matmul %320, %321, %cst_21 {dimension_numbers = #tpu.dot_dimension_numbers<[1], [0], [0], [1], [0, 0, 1, 1], [], []>} : vector<14x512xbf16>, vector<512x64xbf16>, vector<14x64xf32> -> vector<14x64xf32>
    %323 = tpu.concatenate %41, %80, %119, %158, %197, %236, %275, %314 in 1 : vector<14x8xf32>, vector<14x8xf32>, vector<14x8xf32>, vector<14x8xf32>, vector<14x8xf32>, vector<14x8xf32>, vector<14x8xf32>, vector<14x8xf32> -> vector<14x64xf32>
    %cst_22 = arith.constant 9.99999935E-39 : f32
    %324 = vector.broadcast %cst_22 : f32 to vector<14x64xf32>
    %325 = arith.maximumf %322, %324 : vector<14x64xf32>
    %326 = math.log %325 : vector<14x64xf32>
    %327 = arith.addf %326, %323 : vector<14x64xf32>
    %328 = vector.extract_strided_slice %327 {offsets = [0, 0], sizes = [14, 8], strides = [1, 1]} : vector<14x64xf32> to vector<14x8xf32>
    %329 = vector.extract_strided_slice %327 {offsets = [0, 8], sizes = [14, 8], strides = [1, 1]} : vector<14x64xf32> to vector<14x8xf32>
    %cst_23 = arith.constant dense<0xFF800000> : vector<14xf32>
    %330 = vector.multi_reduction <maximumf>, %328, %cst_23 [1] : vector<14x8xf32> to vector<14xf32>
    %331 = vector.shape_cast %330 : vector<14xf32> to vector<14x1xf32>
    %cst_24 = arith.constant dense<0xFF800000> : vector<14xf32>
    %332 = vector.multi_reduction <maximumf>, %329, %cst_24 [1] : vector<14x8xf32> to vector<14xf32>
    %333 = vector.shape_cast %332 : vector<14xf32> to vector<14x1xf32>
    %334 = vector.broadcast %331 : vector<14x1xf32> to vector<14x8xf32>
    %335 = arith.subf %328, %334 : vector<14x8xf32>
    %336 = math.exp %335 : vector<14x8xf32>
    %337 = vector.broadcast %333 : vector<14x1xf32> to vector<14x8xf32>
    %338 = arith.subf %329, %337 : vector<14x8xf32>
    %339 = math.exp %338 : vector<14x8xf32>
    %340 = vector.extract_strided_slice %339 {offsets = [0, 0], sizes = [14, 1], strides = [1, 1]} : vector<14x8xf32> to vector<14x1xf32>
    %341 = vector.broadcast %340 : vector<14x1xf32> to vector<14x8xf32>
    %342 = arith.mulf %341, %336 : vector<14x8xf32>
    %343 = vector.extract_strided_slice %339 {offsets = [0, 1], sizes = [14, 1], strides = [1, 1]} : vector<14x8xf32> to vector<14x1xf32>
    %344 = vector.broadcast %343 : vector<14x1xf32> to vector<14x8xf32>
    %345 = arith.mulf %344, %336 : vector<14x8xf32>
    %346 = vector.extract_strided_slice %339 {offsets = [0, 2], sizes = [14, 1], strides = [1, 1]} : vector<14x8xf32> to vector<14x1xf32>
    %347 = vector.broadcast %346 : vector<14x1xf32> to vector<14x8xf32>
    %348 = arith.mulf %347, %336 : vector<14x8xf32>
    %349 = vector.extract_strided_slice %339 {offsets = [0, 3], sizes = [14, 1], strides = [1, 1]} : vector<14x8xf32> to vector<14x1xf32>
    %350 = vector.broadcast %349 : vector<14x1xf32> to vector<14x8xf32>
    %351 = arith.mulf %350, %336 : vector<14x8xf32>
    %352 = vector.extract_strided_slice %339 {offsets = [0, 4], sizes = [14, 1], strides = [1, 1]} : vector<14x8xf32> to vector<14x1xf32>
    %353 = vector.broadcast %352 : vector<14x1xf32> to vector<14x8xf32>
    %354 = arith.mulf %353, %336 : vector<14x8xf32>
    %355 = vector.extract_strided_slice %339 {offsets = [0, 5], sizes = [14, 1], strides = [1, 1]} : vector<14x8xf32> to vector<14x1xf32>
    %356 = vector.broadcast %355 : vector<14x1xf32> to vector<14x8xf32>
    %357 = arith.mulf %356, %336 : vector<14x8xf32>
    %358 = vector.extract_strided_slice %339 {offsets = [0, 6], sizes = [14, 1], strides = [1, 1]} : vector<14x8xf32> to vector<14x1xf32>
    %359 = vector.broadcast %358 : vector<14x1xf32> to vector<14x8xf32>
    %360 = arith.mulf %359, %336 : vector<14x8xf32>
    %361 = vector.extract_strided_slice %339 {offsets = [0, 7], sizes = [14, 1], strides = [1, 1]} : vector<14x8xf32> to vector<14x1xf32>
    %362 = vector.broadcast %361 : vector<14x1xf32> to vector<14x8xf32>
    %363 = arith.mulf %362, %336 : vector<14x8xf32>
    %364 = arith.addf %331, %333 : vector<14x1xf32>
    %365 = vector.shape_cast %364 : vector<14x1xf32> to vector<14x1xf32>
    %366 = vector.broadcast %365 : vector<14x1xf32> to vector<14x8xf32>
    %367 = vector.extract_strided_slice %327 {offsets = [0, 16], sizes = [14, 8], strides = [1, 1]} : vector<14x64xf32> to vector<14x8xf32>
    %368 = vector.extract_strided_slice %327 {offsets = [0, 24], sizes = [14, 8], strides = [1, 1]} : vector<14x64xf32> to vector<14x8xf32>
    %cst_25 = arith.constant dense<0xFF800000> : vector<14xf32>
    %369 = vector.multi_reduction <maximumf>, %367, %cst_25 [1] : vector<14x8xf32> to vector<14xf32>
    %370 = vector.shape_cast %369 : vector<14xf32> to vector<14x1xf32>
    %cst_26 = arith.constant dense<0xFF800000> : vector<14xf32>
    %371 = vector.multi_reduction <maximumf>, %368, %cst_26 [1] : vector<14x8xf32> to vector<14xf32>
    %372 = vector.shape_cast %371 : vector<14xf32> to vector<14x1xf32>
    %373 = vector.broadcast %370 : vector<14x1xf32> to vector<14x8xf32>
    %374 = arith.subf %367, %373 : vector<14x8xf32>
    %375 = math.exp %374 : vector<14x8xf32>
    %376 = vector.broadcast %372 : vector<14x1xf32> to vector<14x8xf32>
    %377 = arith.subf %368, %376 : vector<14x8xf32>
    %378 = math.exp %377 : vector<14x8xf32>
    %379 = vector.extract_strided_slice %378 {offsets = [0, 0], sizes = [14, 1], strides = [1, 1]} : vector<14x8xf32> to vector<14x1xf32>
    %380 = vector.broadcast %379 : vector<14x1xf32> to vector<14x8xf32>
    %381 = arith.mulf %380, %375 : vector<14x8xf32>
    %382 = vector.extract_strided_slice %378 {offsets = [0, 1], sizes = [14, 1], strides = [1, 1]} : vector<14x8xf32> to vector<14x1xf32>
    %383 = vector.broadcast %382 : vector<14x1xf32> to vector<14x8xf32>
    %384 = arith.mulf %383, %375 : vector<14x8xf32>
    %385 = vector.extract_strided_slice %378 {offsets = [0, 2], sizes = [14, 1], strides = [1, 1]} : vector<14x8xf32> to vector<14x1xf32>
    %386 = vector.broadcast %385 : vector<14x1xf32> to vector<14x8xf32>
    %387 = arith.mulf %386, %375 : vector<14x8xf32>
    %388 = vector.extract_strided_slice %378 {offsets = [0, 3], sizes = [14, 1], strides = [1, 1]} : vector<14x8xf32> to vector<14x1xf32>
    %389 = vector.broadcast %388 : vector<14x1xf32> to vector<14x8xf32>
    %390 = arith.mulf %389, %375 : vector<14x8xf32>
    %391 = vector.extract_strided_slice %378 {offsets = [0, 4], sizes = [14, 1], strides = [1, 1]} : vector<14x8xf32> to vector<14x1xf32>
    %392 = vector.broadcast %391 : vector<14x1xf32> to vector<14x8xf32>
    %393 = arith.mulf %392, %375 : vector<14x8xf32>
    %394 = vector.extract_strided_slice %378 {offsets = [0, 5], sizes = [14, 1], strides = [1, 1]} : vector<14x8xf32> to vector<14x1xf32>
    %395 = vector.broadcast %394 : vector<14x1xf32> to vector<14x8xf32>
    %396 = arith.mulf %395, %375 : vector<14x8xf32>
    %397 = vector.extract_strided_slice %378 {offsets = [0, 6], sizes = [14, 1], strides = [1, 1]} : vector<14x8xf32> to vector<14x1xf32>
    %398 = vector.broadcast %397 : vector<14x1xf32> to vector<14x8xf32>
    %399 = arith.mulf %398, %375 : vector<14x8xf32>
    %400 = vector.extract_strided_slice %378 {offsets = [0, 7], sizes = [14, 1], strides = [1, 1]} : vector<14x8xf32> to vector<14x1xf32>
    %401 = vector.broadcast %400 : vector<14x1xf32> to vector<14x8xf32>
    %402 = arith.mulf %401, %375 : vector<14x8xf32>
    %403 = arith.addf %370, %372 : vector<14x1xf32>
    %404 = vector.shape_cast %403 : vector<14x1xf32> to vector<14x1xf32>
    %405 = vector.broadcast %404 : vector<14x1xf32> to vector<14x8xf32>
    %406 = vector.extract_strided_slice %327 {offsets = [0, 32], sizes = [14, 8], strides = [1, 1]} : vector<14x64xf32> to vector<14x8xf32>
    %407 = vector.extract_strided_slice %327 {offsets = [0, 40], sizes = [14, 8], strides = [1, 1]} : vector<14x64xf32> to vector<14x8xf32>
    %cst_27 = arith.constant dense<0xFF800000> : vector<14xf32>
    %408 = vector.multi_reduction <maximumf>, %406, %cst_27 [1] : vector<14x8xf32> to vector<14xf32>
    %409 = vector.shape_cast %408 : vector<14xf32> to vector<14x1xf32>
    %cst_28 = arith.constant dense<0xFF800000> : vector<14xf32>
    %410 = vector.multi_reduction <maximumf>, %407, %cst_28 [1] : vector<14x8xf32> to vector<14xf32>
    %411 = vector.shape_cast %410 : vector<14xf32> to vector<14x1xf32>
    %412 = vector.broadcast %409 : vector<14x1xf32> to vector<14x8xf32>
    %413 = arith.subf %406, %412 : vector<14x8xf32>
    %414 = math.exp %413 : vector<14x8xf32>
    %415 = vector.broadcast %411 : vector<14x1xf32> to vector<14x8xf32>
    %416 = arith.subf %407, %415 : vector<14x8xf32>
    %417 = math.exp %416 : vector<14x8xf32>
    %418 = vector.extract_strided_slice %417 {offsets = [0, 0], sizes = [14, 1], strides = [1, 1]} : vector<14x8xf32> to vector<14x1xf32>
    %419 = vector.broadcast %418 : vector<14x1xf32> to vector<14x8xf32>
    %420 = arith.mulf %419, %414 : vector<14x8xf32>
    %421 = vector.extract_strided_slice %417 {offsets = [0, 1], sizes = [14, 1], strides = [1, 1]} : vector<14x8xf32> to vector<14x1xf32>
    %422 = vector.broadcast %421 : vector<14x1xf32> to vector<14x8xf32>
    %423 = arith.mulf %422, %414 : vector<14x8xf32>
    %424 = vector.extract_strided_slice %417 {offsets = [0, 2], sizes = [14, 1], strides = [1, 1]} : vector<14x8xf32> to vector<14x1xf32>
    %425 = vector.broadcast %424 : vector<14x1xf32> to vector<14x8xf32>
    %426 = arith.mulf %425, %414 : vector<14x8xf32>
    %427 = vector.extract_strided_slice %417 {offsets = [0, 3], sizes = [14, 1], strides = [1, 1]} : vector<14x8xf32> to vector<14x1xf32>
    %428 = vector.broadcast %427 : vector<14x1xf32> to vector<14x8xf32>
    %429 = arith.mulf %428, %414 : vector<14x8xf32>
    %430 = vector.extract_strided_slice %417 {offsets = [0, 4], sizes = [14, 1], strides = [1, 1]} : vector<14x8xf32> to vector<14x1xf32>
    %431 = vector.broadcast %430 : vector<14x1xf32> to vector<14x8xf32>
    %432 = arith.mulf %431, %414 : vector<14x8xf32>
    %433 = vector.extract_strided_slice %417 {offsets = [0, 5], sizes = [14, 1], strides = [1, 1]} : vector<14x8xf32> to vector<14x1xf32>
    %434 = vector.broadcast %433 : vector<14x1xf32> to vector<14x8xf32>
    %435 = arith.mulf %434, %414 : vector<14x8xf32>
    %436 = vector.extract_strided_slice %417 {offsets = [0, 6], sizes = [14, 1], strides = [1, 1]} : vector<14x8xf32> to vector<14x1xf32>
    %437 = vector.broadcast %436 : vector<14x1xf32> to vector<14x8xf32>
    %438 = arith.mulf %437, %414 : vector<14x8xf32>
    %439 = vector.extract_strided_slice %417 {offsets = [0, 7], sizes = [14, 1], strides = [1, 1]} : vector<14x8xf32> to vector<14x1xf32>
    %440 = vector.broadcast %439 : vector<14x1xf32> to vector<14x8xf32>
    %441 = arith.mulf %440, %414 : vector<14x8xf32>
    %442 = arith.addf %409, %411 : vector<14x1xf32>
    %443 = vector.shape_cast %442 : vector<14x1xf32> to vector<14x1xf32>
    %444 = vector.broadcast %443 : vector<14x1xf32> to vector<14x8xf32>
    %445 = vector.extract_strided_slice %327 {offsets = [0, 48], sizes = [14, 8], strides = [1, 1]} : vector<14x64xf32> to vector<14x8xf32>
    %446 = vector.extract_strided_slice %327 {offsets = [0, 56], sizes = [14, 8], strides = [1, 1]} : vector<14x64xf32> to vector<14x8xf32>
    %cst_29 = arith.constant dense<0xFF800000> : vector<14xf32>
    %447 = vector.multi_reduction <maximumf>, %445, %cst_29 [1] : vector<14x8xf32> to vector<14xf32>
    %448 = vector.shape_cast %447 : vector<14xf32> to vector<14x1xf32>
    %cst_30 = arith.constant dense<0xFF800000> : vector<14xf32>
    %449 = vector.multi_reduction <maximumf>, %446, %cst_30 [1] : vector<14x8xf32> to vector<14xf32>
    %450 = vector.shape_cast %449 : vector<14xf32> to vector<14x1xf32>
    %451 = vector.broadcast %448 : vector<14x1xf32> to vector<14x8xf32>
    %452 = arith.subf %445, %451 : vector<14x8xf32>
    %453 = math.exp %452 : vector<14x8xf32>
    %454 = vector.broadcast %450 : vector<14x1xf32> to vector<14x8xf32>
    %455 = arith.subf %446, %454 : vector<14x8xf32>
    %456 = math.exp %455 : vector<14x8xf32>
    %457 = vector.extract_strided_slice %456 {offsets = [0, 0], sizes = [14, 1], strides = [1, 1]} : vector<14x8xf32> to vector<14x1xf32>
    %458 = vector.broadcast %457 : vector<14x1xf32> to vector<14x8xf32>
    %459 = arith.mulf %458, %453 : vector<14x8xf32>
    %460 = vector.extract_strided_slice %456 {offsets = [0, 1], sizes = [14, 1], strides = [1, 1]} : vector<14x8xf32> to vector<14x1xf32>
    %461 = vector.broadcast %460 : vector<14x1xf32> to vector<14x8xf32>
    %462 = arith.mulf %461, %453 : vector<14x8xf32>
    %463 = vector.extract_strided_slice %456 {offsets = [0, 2], sizes = [14, 1], strides = [1, 1]} : vector<14x8xf32> to vector<14x1xf32>
    %464 = vector.broadcast %463 : vector<14x1xf32> to vector<14x8xf32>
    %465 = arith.mulf %464, %453 : vector<14x8xf32>
    %466 = vector.extract_strided_slice %456 {offsets = [0, 3], sizes = [14, 1], strides = [1, 1]} : vector<14x8xf32> to vector<14x1xf32>
    %467 = vector.broadcast %466 : vector<14x1xf32> to vector<14x8xf32>
    %468 = arith.mulf %467, %453 : vector<14x8xf32>
    %469 = vector.extract_strided_slice %456 {offsets = [0, 4], sizes = [14, 1], strides = [1, 1]} : vector<14x8xf32> to vector<14x1xf32>
    %470 = vector.broadcast %469 : vector<14x1xf32> to vector<14x8xf32>
    %471 = arith.mulf %470, %453 : vector<14x8xf32>
    %472 = vector.extract_strided_slice %456 {offsets = [0, 5], sizes = [14, 1], strides = [1, 1]} : vector<14x8xf32> to vector<14x1xf32>
    %473 = vector.broadcast %472 : vector<14x1xf32> to vector<14x8xf32>
    %474 = arith.mulf %473, %453 : vector<14x8xf32>
    %475 = vector.extract_strided_slice %456 {offsets = [0, 6], sizes = [14, 1], strides = [1, 1]} : vector<14x8xf32> to vector<14x1xf32>
    %476 = vector.broadcast %475 : vector<14x1xf32> to vector<14x8xf32>
    %477 = arith.mulf %476, %453 : vector<14x8xf32>
    %478 = vector.extract_strided_slice %456 {offsets = [0, 7], sizes = [14, 1], strides = [1, 1]} : vector<14x8xf32> to vector<14x1xf32>
    %479 = vector.broadcast %478 : vector<14x1xf32> to vector<14x8xf32>
    %480 = arith.mulf %479, %453 : vector<14x8xf32>
    %481 = arith.addf %448, %450 : vector<14x1xf32>
    %482 = vector.shape_cast %481 : vector<14x1xf32> to vector<14x1xf32>
    %483 = vector.broadcast %482 : vector<14x1xf32> to vector<14x8xf32>
    %484 = tpu.concatenate %342, %345, %348, %351, %354, %357, %360, %363, %381, %384, %387, %390, %393, %396, %399, %402 in 1 : vector<14x8xf32>, vector<14x8xf32>, vector<14x8xf32>, vector<14x8xf32>, vector<14x8xf32>, vector<14x8xf32>, vector<14x8xf32>, vector<14x8xf32>, vector<14x8xf32>, vector<14x8xf32>, vector<14x8xf32>, vector<14x8xf32>, vector<14x8xf32>, vector<14x8xf32>, vector<14x8xf32>, vector<14x8xf32> -> vector<14x128xf32>
    %485 = tpu.concatenate %420, %423, %426, %429, %432, %435, %438, %441, %459, %462, %465, %468, %471, %474, %477, %480 in 1 : vector<14x8xf32>, vector<14x8xf32>, vector<14x8xf32>, vector<14x8xf32>, vector<14x8xf32>, vector<14x8xf32>, vector<14x8xf32>, vector<14x8xf32>, vector<14x8xf32>, vector<14x8xf32>, vector<14x8xf32>, vector<14x8xf32>, vector<14x8xf32>, vector<14x8xf32>, vector<14x8xf32>, vector<14x8xf32> -> vector<14x128xf32>
    %486 = tpu.concatenate %484, %485 in 1 : vector<14x128xf32>, vector<14x128xf32> -> vector<14x256xf32>
    %487 = arith.truncf %486 : vector<14x256xf32> to vector<14x256xbf16>
    %c0_31 = arith.constant 0 : index
    %c0_32 = arith.constant 0 : index
    %488 = vector.load %arg4[%c0_31, %c0_32] : memref<256x32xbf16, #tpu.memory_space<vmem>>, vector<256x32xbf16>
    %cst_33 = arith.constant dense<0.000000e+00> : vector<14x32xf32>
    %489 = tpu.matmul %487, %488, %cst_33 {dimension_numbers = #tpu.dot_dimension_numbers<[1], [0], [0], [1], [0, 0, 1, 1], [], []>} : vector<14x256xbf16>, vector<256x32xbf16>, vector<14x32xf32> -> vector<14x32xf32>
    %490 = tpu.concatenate %366, %405, %444, %483 in 1 : vector<14x8xf32>, vector<14x8xf32>, vector<14x8xf32>, vector<14x8xf32> -> vector<14x32xf32>
    %cst_34 = arith.constant 9.99999935E-39 : f32
    %491 = vector.broadcast %cst_34 : f32 to vector<14x32xf32>
    %492 = arith.maximumf %489, %491 : vector<14x32xf32>
    %493 = math.log %492 : vector<14x32xf32>
    %494 = arith.addf %493, %490 : vector<14x32xf32>
    %495 = vector.extract_strided_slice %494 {offsets = [0, 0], sizes = [14, 8], strides = [1, 1]} : vector<14x32xf32> to vector<14x8xf32>
    %496 = vector.extract_strided_slice %494 {offsets = [0, 8], sizes = [14, 8], strides = [1, 1]} : vector<14x32xf32> to vector<14x8xf32>
    %cst_35 = arith.constant dense<0xFF800000> : vector<14xf32>
    %497 = vector.multi_reduction <maximumf>, %495, %cst_35 [1] : vector<14x8xf32> to vector<14xf32>
    %498 = vector.shape_cast %497 : vector<14xf32> to vector<14x1xf32>
    %cst_36 = arith.constant dense<0xFF800000> : vector<14xf32>
    %499 = vector.multi_reduction <maximumf>, %496, %cst_36 [1] : vector<14x8xf32> to vector<14xf32>
    %500 = vector.shape_cast %499 : vector<14xf32> to vector<14x1xf32>
    %501 = vector.broadcast %498 : vector<14x1xf32> to vector<14x8xf32>
    %502 = arith.subf %495, %501 : vector<14x8xf32>
    %503 = math.exp %502 : vector<14x8xf32>
    %504 = vector.broadcast %500 : vector<14x1xf32> to vector<14x8xf32>
    %505 = arith.subf %496, %504 : vector<14x8xf32>
    %506 = math.exp %505 : vector<14x8xf32>
    %507 = vector.extract_strided_slice %506 {offsets = [0, 0], sizes = [14, 1], strides = [1, 1]} : vector<14x8xf32> to vector<14x1xf32>
    %508 = vector.broadcast %507 : vector<14x1xf32> to vector<14x8xf32>
    %509 = arith.mulf %508, %503 : vector<14x8xf32>
    %510 = vector.extract_strided_slice %506 {offsets = [0, 1], sizes = [14, 1], strides = [1, 1]} : vector<14x8xf32> to vector<14x1xf32>
    %511 = vector.broadcast %510 : vector<14x1xf32> to vector<14x8xf32>
    %512 = arith.mulf %511, %503 : vector<14x8xf32>
    %513 = vector.extract_strided_slice %506 {offsets = [0, 2], sizes = [14, 1], strides = [1, 1]} : vector<14x8xf32> to vector<14x1xf32>
    %514 = vector.broadcast %513 : vector<14x1xf32> to vector<14x8xf32>
    %515 = arith.mulf %514, %503 : vector<14x8xf32>
    %516 = vector.extract_strided_slice %506 {offsets = [0, 3], sizes = [14, 1], strides = [1, 1]} : vector<14x8xf32> to vector<14x1xf32>
    %517 = vector.broadcast %516 : vector<14x1xf32> to vector<14x8xf32>
    %518 = arith.mulf %517, %503 : vector<14x8xf32>
    %519 = vector.extract_strided_slice %506 {offsets = [0, 4], sizes = [14, 1], strides = [1, 1]} : vector<14x8xf32> to vector<14x1xf32>
    %520 = vector.broadcast %519 : vector<14x1xf32> to vector<14x8xf32>
    %521 = arith.mulf %520, %503 : vector<14x8xf32>
    %522 = vector.extract_strided_slice %506 {offsets = [0, 5], sizes = [14, 1], strides = [1, 1]} : vector<14x8xf32> to vector<14x1xf32>
    %523 = vector.broadcast %522 : vector<14x1xf32> to vector<14x8xf32>
    %524 = arith.mulf %523, %503 : vector<14x8xf32>
    %525 = vector.extract_strided_slice %506 {offsets = [0, 6], sizes = [14, 1], strides = [1, 1]} : vector<14x8xf32> to vector<14x1xf32>
    %526 = vector.broadcast %525 : vector<14x1xf32> to vector<14x8xf32>
    %527 = arith.mulf %526, %503 : vector<14x8xf32>
    %528 = vector.extract_strided_slice %506 {offsets = [0, 7], sizes = [14, 1], strides = [1, 1]} : vector<14x8xf32> to vector<14x1xf32>
    %529 = vector.broadcast %528 : vector<14x1xf32> to vector<14x8xf32>
    %530 = arith.mulf %529, %503 : vector<14x8xf32>
    %531 = arith.addf %498, %500 : vector<14x1xf32>
    %532 = vector.shape_cast %531 : vector<14x1xf32> to vector<14x1xf32>
    %533 = vector.broadcast %532 : vector<14x1xf32> to vector<14x8xf32>
    %534 = vector.extract_strided_slice %494 {offsets = [0, 16], sizes = [14, 8], strides = [1, 1]} : vector<14x32xf32> to vector<14x8xf32>
    %535 = vector.extract_strided_slice %494 {offsets = [0, 24], sizes = [14, 8], strides = [1, 1]} : vector<14x32xf32> to vector<14x8xf32>
    %cst_37 = arith.constant dense<0xFF800000> : vector<14xf32>
    %536 = vector.multi_reduction <maximumf>, %534, %cst_37 [1] : vector<14x8xf32> to vector<14xf32>
    %537 = vector.shape_cast %536 : vector<14xf32> to vector<14x1xf32>
    %cst_38 = arith.constant dense<0xFF800000> : vector<14xf32>
    %538 = vector.multi_reduction <maximumf>, %535, %cst_38 [1] : vector<14x8xf32> to vector<14xf32>
    %539 = vector.shape_cast %538 : vector<14xf32> to vector<14x1xf32>
    %540 = vector.broadcast %537 : vector<14x1xf32> to vector<14x8xf32>
    %541 = arith.subf %534, %540 : vector<14x8xf32>
    %542 = math.exp %541 : vector<14x8xf32>
    %543 = vector.broadcast %539 : vector<14x1xf32> to vector<14x8xf32>
    %544 = arith.subf %535, %543 : vector<14x8xf32>
    %545 = math.exp %544 : vector<14x8xf32>
    %546 = vector.extract_strided_slice %545 {offsets = [0, 0], sizes = [14, 1], strides = [1, 1]} : vector<14x8xf32> to vector<14x1xf32>
    %547 = vector.broadcast %546 : vector<14x1xf32> to vector<14x8xf32>
    %548 = arith.mulf %547, %542 : vector<14x8xf32>
    %549 = vector.extract_strided_slice %545 {offsets = [0, 1], sizes = [14, 1], strides = [1, 1]} : vector<14x8xf32> to vector<14x1xf32>
    %550 = vector.broadcast %549 : vector<14x1xf32> to vector<14x8xf32>
    %551 = arith.mulf %550, %542 : vector<14x8xf32>
    %552 = vector.extract_strided_slice %545 {offsets = [0, 2], sizes = [14, 1], strides = [1, 1]} : vector<14x8xf32> to vector<14x1xf32>
    %553 = vector.broadcast %552 : vector<14x1xf32> to vector<14x8xf32>
    %554 = arith.mulf %553, %542 : vector<14x8xf32>
    %555 = vector.extract_strided_slice %545 {offsets = [0, 3], sizes = [14, 1], strides = [1, 1]} : vector<14x8xf32> to vector<14x1xf32>
    %556 = vector.broadcast %555 : vector<14x1xf32> to vector<14x8xf32>
    %557 = arith.mulf %556, %542 : vector<14x8xf32>
    %558 = vector.extract_strided_slice %545 {offsets = [0, 4], sizes = [14, 1], strides = [1, 1]} : vector<14x8xf32> to vector<14x1xf32>
    %559 = vector.broadcast %558 : vector<14x1xf32> to vector<14x8xf32>
    %560 = arith.mulf %559, %542 : vector<14x8xf32>
    %561 = vector.extract_strided_slice %545 {offsets = [0, 5], sizes = [14, 1], strides = [1, 1]} : vector<14x8xf32> to vector<14x1xf32>
    %562 = vector.broadcast %561 : vector<14x1xf32> to vector<14x8xf32>
    %563 = arith.mulf %562, %542 : vector<14x8xf32>
    %564 = vector.extract_strided_slice %545 {offsets = [0, 6], sizes = [14, 1], strides = [1, 1]} : vector<14x8xf32> to vector<14x1xf32>
    %565 = vector.broadcast %564 : vector<14x1xf32> to vector<14x8xf32>
    %566 = arith.mulf %565, %542 : vector<14x8xf32>
    %567 = vector.extract_strided_slice %545 {offsets = [0, 7], sizes = [14, 1], strides = [1, 1]} : vector<14x8xf32> to vector<14x1xf32>
    %568 = vector.broadcast %567 : vector<14x1xf32> to vector<14x8xf32>
    %569 = arith.mulf %568, %542 : vector<14x8xf32>
    %570 = arith.addf %537, %539 : vector<14x1xf32>
    %571 = vector.shape_cast %570 : vector<14x1xf32> to vector<14x1xf32>
    %572 = vector.broadcast %571 : vector<14x1xf32> to vector<14x8xf32>
    %573 = tpu.concatenate %509, %512, %515, %518, %521, %524, %527, %530, %548, %551, %554, %557, %560, %563, %566, %569 in 1 : vector<14x8xf32>, vector<14x8xf32>, vector<14x8xf32>, vector<14x8xf32>, vector<14x8xf32>, vector<14x8xf32>, vector<14x8xf32>, vector<14x8xf32>, vector<14x8xf32>, vector<14x8xf32>, vector<14x8xf32>, vector<14x8xf32>, vector<14x8xf32>, vector<14x8xf32>, vector<14x8xf32>, vector<14x8xf32> -> vector<14x128xf32>
    %574 = arith.truncf %573 : vector<14x128xf32> to vector<14x128xbf16>
    %c0_39 = arith.constant 0 : index
    %c0_40 = arith.constant 0 : index
    %575 = vector.load %arg5[%c0_39, %c0_40] : memref<128x16xbf16, #tpu.memory_space<vmem>>, vector<128x16xbf16>
    %cst_41 = arith.constant dense<0.000000e+00> : vector<14x16xf32>
    %576 = tpu.matmul %574, %575, %cst_41 {dimension_numbers = #tpu.dot_dimension_numbers<[1], [0], [0], [1], [0, 0, 1, 1], [], []>} : vector<14x128xbf16>, vector<128x16xbf16>, vector<14x16xf32> -> vector<14x16xf32>
    %577 = tpu.concatenate %533, %572 in 1 : vector<14x8xf32>, vector<14x8xf32> -> vector<14x16xf32>
    %cst_42 = arith.constant 9.99999935E-39 : f32
    %578 = vector.broadcast %cst_42 : f32 to vector<14x16xf32>
    %579 = arith.maximumf %576, %578 : vector<14x16xf32>
    %580 = math.log %579 : vector<14x16xf32>
    %581 = arith.addf %580, %577 : vector<14x16xf32>
    %cst_43 = arith.constant dense<0xFF800000> : vector<14xf32>
    %582 = vector.multi_reduction <maximumf>, %581, %cst_43 [1] : vector<14x16xf32> to vector<14xf32>
    %583 = vector.shape_cast %582 : vector<14xf32> to vector<14x1xf32>
    %584 = vector.broadcast %583 : vector<14x1xf32> to vector<14x16xf32>
    %585 = arith.subf %581, %584 : vector<14x16xf32>
    %586 = math.exp %585 : vector<14x16xf32>
    %c0_44 = arith.constant 0 : index
    %c0_45 = arith.constant 0 : index
    %587 = vector.load %arg6[%c0_44, %c0_45] : memref<1x16xf32, #tpu.memory_space<vmem>>, vector<1x16xf32>
    %588 = vector.broadcast %587 : vector<1x16xf32> to vector<14x16xf32>
    %589 = arith.mulf %586, %588 : vector<14x16xf32>
    %cst_46 = arith.constant dense<0.000000e+00> : vector<14xf32>
    %590 = vector.multi_reduction <add>, %589, %cst_46 [1] : vector<14x16xf32> to vector<14xf32>
    %591 = vector.shape_cast %590 : vector<14xf32> to vector<14x1xf32>
    %cst_47 = arith.constant 9.99999935E-39 : f32
    %592 = vector.broadcast %cst_47 : f32 to vector<14x1xf32>
    %593 = arith.maximumf %591, %592 : vector<14x1xf32>
    %594 = math.log %593 : vector<14x1xf32>
    %595 = arith.addf %583, %594 : vector<14x1xf32>
    %c0_48 = arith.constant 0 : index
    %c0_49 = arith.constant 0 : index
    %596 = vector.load %arg7[%c0_48, %c0_49] : memref<14x1xf32, #tpu.memory_space<vmem>>, vector<14x1xf32>
    tpu.vector_store %arg7[%c0_48, %c0_49], %595 {strides = array<i32>} : memref<14x1xf32, #tpu.memory_space<vmem>>, vector<14x1xf32>,
    return
  }
  func.func @transform_0(%arg0: i32) -> (i32, i32) {
    %c0_i32 = arith.constant 0 : i32
    %c0_i32_0 = arith.constant 0 : i32
    return %arg0, %c0_i32 : i32, i32
  }
  func.func @transform_1(%arg0: i32) -> (i32, i32) {
    %c0_i32 = arith.constant 0 : i32
    %c0_i32_0 = arith.constant 0 : i32
    %c0_i32_1 = arith.constant 0 : i32
    return %c0_i32, %c0_i32_0 : i32, i32
  }
  func.func @transform_2(%arg0: i32) -> (i32, i32) {
    %c0_i32 = arith.constant 0 : i32
    %c0_i32_0 = arith.constant 0 : i32
    %c0_i32_1 = arith.constant 0 : i32
    return %c0_i32, %c0_i32_0 : i32, i32
  }
  func.func @transform_3(%arg0: i32) -> (i32, i32) {
    %c0_i32 = arith.constant 0 : i32
    %c0_i32_0 = arith.constant 0 : i32
    %c0_i32_1 = arith.constant 0 : i32
    return %c0_i32, %c0_i32_0 : i32, i32
  }
  func.func @transform_4(%arg0: i32) -> (i32, i32) {
    %c0_i32 = arith.constant 0 : i32
    %c0_i32_0 = arith.constant 0 : i32
    %c0_i32_1 = arith.constant 0 : i32
    return %c0_i32, %c0_i32_0 : i32, i32
  }
  func.func @transform_5(%arg0: i32) -> (i32, i32) {
    %c0_i32 = arith.constant 0 : i32
    %c0_i32_0 = arith.constant 0 : i32
    %c0_i32_1 = arith.constant 0 : i32
    return %c0_i32, %c0_i32_0 : i32, i32
  }
  func.func @transform_6(%arg0: i32) -> (i32, i32) {
    %c0_i32 = arith.constant 0 : i32
    %c0_i32_0 = arith.constant 0 : i32
    return %arg0, %c0_i32 : i32, i32
  }
}

</mosaic_0001>

<bundles_post_ra>
// kernel: tpu_custom_call.1
= control target key start
LH: loop header
LB: loop body
LE: loop exit
PB: predicated region body
PF: predicated region fallthrough
CT: control target
= control target key end

     0   :  { %vm30_vm0 = vcmask 261120   ;;  %vm7214_vm1 = vcmask 128064   ;;  %vm7081_vm2 = vcmask 62464   ;;  %vm7210_vm3 = vcmask 324864   ;;  %s4674_s9 = smov 72   ;;  %s4675_s10 = smov 16   ;;  %s7071_s1 = inlined_call_operand.vmem [shape: f32[32,128], index: 1, kind: input, shape index: {}]   ;;  %s7072_s0 = inlined_call_operand.vmem [shape: f32[14,32], index: 0, kind: input, shape index: {}]   ;;  %s7073_s2 = inlined_call_operand.vmem [shape: bf16[512,64], index: 2, kind: input, shape index: {}]   ;;  %s7074_s3 = inlined_call_operand.vmem [shape: bf16[256,32], index: 3, kind: input, shape index: {}]   ;;  %s7075_s4 = inlined_call_operand.vmem [shape: bf16[128,16], index: 4, kind: input, shape index: {}]   ;;  %s7076_s5 = inlined_call_operand.vmem [shape: f32[1,16], index: 5, kind: input, shape index: {}]   ;;  %s7077_s6 = inlined_call_operand.vmem [shape: f32[14,1], index: 6, kind: output, shape index: {}]  }
   0x1   :  { %v26_v0 = vld [vmem:[%s7071_s1] sm:$0xff]  ;;  %v27_v1 = vld [vmem:[%s7071_s1 + $0x8] sm:$0xff]  ;;  %v28_v2 = vld [vmem:[%s7071_s1 + $0x10] sm:$0xff]  ;;  %vm7078_vm4 = vcmask 193664   ;;  %vm796_vm5 = vcmask 915264   ;;  %vm7212_vm6 = vcmask 259264  }
   0x2   :  { %v3599_v3 = vpack.c.bf16 %v27_v1, %v26_v0  ;;  %v29_v4 = vld [vmem:[%s7071_s1 + $0x18] sm:$0xff]  ;;  %v24_v5 = vld [vmem:[%s7072_s0] sm:$0xff]  ;;  %v25_v7 = vld [vmem:[%s7072_s0 + $0x8] sm:$0x3f]  ;;  %vm572_vm7 = vcmask 652864   ;;  %vm7080_vm8 = vcmask 390464  }
   0x3   :  { %v3603_v6 = vpack.c.bf16 %v29_v4, %v28_v2  ;;  %3576 = vmatprep.mubr.msk.f32.mxu0 %vm30_vm0, %v24_v5  ;;  %vm7213_vm9 = vcmask 521664   ;;  %vm7079_vm10 = vcmask 456064   ;;  %vm908_vm11 = vcmask 1046464   ;;  %s4670_s0 = smov 32   ;;  %s4671_s1 = smov 112  }
   0x4   :  { %3600 = vmatprep.subr.bf16.mxu0 %v3599_v3  ;;  %vm112_vm12 = vcmask 64512   ;;  %vm684_vm13 = vcmask 784064   ;;  %vm7215_vm14 = vcmask 326912   ;;  %vm7216_vm15 = vcmask 130112   ;;  %s4677_s11 = smov 80   ;;  %s4678_s12 = smov 24  }
   0x5   :  { %3602 = vmatpush3.bf16.msra.mxu0 %v3599_v3  ;;  %v7094_v28 = vmov 12   ;;  %v7082_v29 = vmov 8   ;;  %v7106_v52 = vmov 9   ;;  %v7088_v53 = vmov 15   ;;  %s4680_s13 = smov 64   ;;  %s4681_s14 = smov 96  }
   0x6   :  { %3604 = vmatprep.subr.bf16.mxu0 %v3603_v6  ;;  %3692 = vset.pattern.permute.xlu0 %v7094_v28  ;;  %v7100_v57 = vmov 10   ;;  %v7086_v58 = vmov 24   ;;  %v7098_v62 = vmov 11   ;;  %v7114_v63 = vmov 30   ;;  %s4682_s15 = smov 40   ;;  %s4684_s16 = smov 104  }
   0x7   :  { %3688 = vset.pattern.permute.xlu1 %v7082_v29  ;;  %v7092_v5 = vmov 13   ;;  %s4685_s17 = smov 48   ;;  %s4686_s18 = smov 56  }
   0x8   :  { %s4687_s19 = smov 120   ;;  %s4688_s20 = smov 8  }
   0x9   :  { %3606 = vmatpush3.bf16.msra.mxu0 %v3603_v6  ;;  %v7131_v6 = vmov 44   ;;  %s4689_s21 = smov 88  }
   0xc   :  { %3577 = vmatmul.mubr.msk.f32.vlgmr.msra.gmra.mrb[0].mxu0 %vm30_vm0, %v25_v7 }
  0xdf   :  { %v4747_v8 = vpop.f32.mrb[0].mxu0 }
  0xe0   :  { %v4749_v9 = vpop.f32.mrb[1].mxu0  ;;  %v125_v10 = vsel %vm7214_vm1, %v4747_v8, -inf  ;;  %v117_v11 = vsel %vm7081_vm2, %v4747_v8, -inf  ;;  %v341_v12 = vsel %vm7210_vm3, %v4747_v8, -inf  ;;  %v229_v13 = vsel %vm7078_vm4, %v4747_v8, -inf }
  0xe1   :  { %126 = vmax.xlane.f32.xlu1 %v125_v10  ;;  %118 = vmax.xlane.f32.xlu0 %v117_v11  ;;  %v797_v14 = vsel %vm796_vm5, %v4747_v8, -inf  ;;  %v237_v15 = vsel %vm7212_vm6, %v4747_v8, -inf  ;;  %v573_v16 = vsel %vm572_vm7, %v4747_v8, -inf  ;;  %v349_v17 = vsel %vm7080_vm8, %v4747_v8, -inf }
  0xe2   :  { %v461_v18 = vsel %vm7213_vm9, %v4747_v8, -inf  ;;  %v453_v19 = vsel %vm7079_vm10, %v4747_v8, -inf  ;;  %v909_v20 = vsel %vm908_vm11, %v4747_v8, -inf  ;;  %v113_v21 = vsel %vm112_vm12, %v4749_v9, -inf }
  0xe3   :  { %v685_v22 = vsel %vm684_vm13, %v4747_v8, -inf  ;;  %v337_v23 = vsel %vm7215_vm14, %v4749_v9, -inf  ;;  %vm344_vm5 = vcmask 392512   ;;  %v121_v24 = vsel %vm7216_vm15, %v4749_v9, -inf }
  0xe4   :  { %v345_v25 = vsel %vm344_vm5, %v4749_v9, -inf  ;;  %vm7158_vm7 = vcmask 195712   ;;  %vm792_vm11 = vcmask 917312   ;;  %vm7221_vm13 = vcmask 261312  }
  0xe5   :  { %342 = vmax.xlane.f32.xlu1 %v341_v12  ;;  %230 = vmax.xlane.f32.xlu0 %v229_v13  ;;  %v225_v26 = vsel %vm7158_vm7, %v4749_v9, -inf  ;;  %v793_v27 = vsel %vm792_vm11, %v4749_v9, -inf  ;;  %vm568_vm4 = vcmask 654912   ;;  %v233_v30 = vsel %vm7221_vm13, %v4749_v9, -inf }
  0xe6   :  { %v569_v31 = vsel %vm568_vm4, %v4749_v9, -inf  ;;  %vm7211_vm10 = vcmask 458112   ;;  %vm456_vm8 = vcmask 523712   ;;  %vm904_vm11 = vcmask 1048512  }
  0xe7   :  { %v449_v32 = vsel %vm7211_vm10, %v4749_v9, -inf  ;;  %v457_v33 = vsel %vm456_vm8, %v4749_v9, -inf  ;;  %v905_v34 = vsel %vm904_vm11, %v4749_v9, -inf  ;;  %vm680_vm2 = vcmask 786112  }
  0xe8   :  { %v681_v35 = vsel %vm680_vm2, %v4749_v9, -inf  ;;  %v7110_v12 = vmov 14   ;;  %v7137_v13 = vmov 47   ;;  %vm788_vm2 = vcmask 849664  }
  0xe9   :  { %798 = vmax.xlane.f32.xlu1 %v797_v14  ;;  %238 = vmax.xlane.f32.xlu0 %v237_v15  ;;  %vm896_vm4 = vcmask 982912   ;;  %vm672_vm11 = vcmask 720512   ;;  %vm900_vm7 = vcmask 980864   ;;  %vm1144_vm3 = vcmask 457728  }
  0xea   :  { %vm7217_vm10 = vcmask 523264   ;;  %vm7218_vm6 = vcmask 588800   ;;  %vm1153_vm9 = vcmask 654336   ;;  %vm1156_vm1 = vcmask 719872  }
  0xeb   :  { %vm1159_vm14 = vcmask 785408   ;;  %vm7222_vm15 = vcmask 850944  }
  0xed   :  { %574 = vmax.xlane.f32.xlu1 %v573_v16  ;;  %350 = vmax.xlane.f32.xlu0 %v349_v17  ;;  %v7102_v17 = vmov 25  }
  0xf1   :  { %462 = vmax.xlane.f32.xlu1 %v461_v18  ;;  %454 = vmax.xlane.f32.xlu0 %v453_v19  ;;  %v7139_v18 = vmov 56  }
  0xf5   :  { %910 = vmax.xlane.f32.xlu1 %v909_v20  ;;  %114 = vmax.xlane.f32.xlu0 %v113_v21 }
  0xf9   :  { %686 = vmax.xlane.f32.xlu1 %v685_v22  ;;  %338 = vmax.xlane.f32.xlu0 %v337_v23  ;;  %v7096_v22 = vmov 26  }
  0xfd   :  { %122 = vmax.xlane.f32.xlu1 %v121_v24  ;;  %346 = vmax.xlane.f32.xlu0 %v345_v25  ;;  %v7104_v24 = vmov 27  }
 0x101   :  { %226 = vmax.xlane.f32.xlu1 %v225_v26  ;;  %794 = vmax.xlane.f32.xlu0 %v793_v27  ;;  %v7108_v26 = vmov 28   ;;  %v7084_v27 = vmov 29  }
 0x105   :  { %234 = vmax.xlane.f32.xlu1 %v233_v30  ;;  %570 = vmax.xlane.f32.xlu0 %v569_v31  ;;  %v7112_v31 = vmov 40  }
 0x109   :  { %450 = vmax.xlane.f32.xlu1 %v449_v32  ;;  %458 = vmax.xlane.f32.xlu0 %v457_v33  ;;  %v7118_v32 = vmov 31   ;;  %v7090_v33 = vmov 46  }
 0x10d   :  { %906 = vmax.xlane.f32.xlu0 %v905_v34  ;;  %v4632_v34 = vmov 104  }
 0x111   :  { %682 = vmax.xlane.f32.xlu0 %v681_v35  ;;  %v7120_v35 = vmov 41  }
 0x16e   :  { %v4793_v36 = vpop.xlane.xlu1 %126  ;;  %v4795_v37 = vpop.xlane.xlu0 %118 }
 0x16f   :  { %7237 = vst [vmem:[#allocation2_spill] sm:$0xff] %v4793_v36  ;;  %7238 = vst [vmem:[#allocation3_spill] sm:$0xff] %v4795_v37  ;;  %v135_v38 = vsub.f32 %v4747_v8, %v4793_v36 }
 0x171   :  { %v138_v39 = vmul.f32 1.442695, %v135_v38  ;;  %v7124_v38 = vmov 42  }
 0x172   :  { %v4799_v40 = vpop.xlane.xlu1 %342  ;;  %v4801_v41 = vpop.xlane.xlu0 %230 }
 0x173   :  { %7239 = vst [vmem:[#allocation4_spill] sm:$0xff] %v4799_v40  ;;  %7240 = vst [vmem:[#allocation5_spill] sm:$0xff] %v4801_v41  ;;  %4479 = vpow2.f32 %v138_v39  ;;  %v7127_v39 = vmov 43  }
 0x176   :  { %v4803_v42 = vpop.xlane.xlu1 %798  ;;  %v4805_v43 = vpop.xlane.xlu0 %238 }
 0x177   :  { %7241 = vst [vmem:[#allocation6_spill] sm:$0xff] %v4803_v42  ;;  %7242 = vst [vmem:[#allocation7_spill] sm:$0xff] %v4805_v43  ;;  %v247_v44 = vsub.f32 %v4747_v8, %v4805_v43 }
 0x179   :  { %v250_v45 = vmul.f32 1.442695, %v247_v44  ;;  %v7133_v44 = vmov 45  }
 0x17a   :  { %v4809_v46 = vpop.xlane.xlu1 %574  ;;  %v4811_v47 = vpop.xlane.xlu0 %350 }
 0x17b   :  { %7243 = vst [vmem:[#allocation8_spill] sm:$0xff] %v4809_v46  ;;  %7244 = vst [vmem:[#allocation9_spill] sm:$0xff] %v4811_v47  ;;  %4481 = vpow2.f32 %v250_v45  ;;  %v359_v50 = vsub.f32 %v4747_v8, %v4811_v47  ;;  %v789_v45 = vsel %vm788_vm2, %v4747_v8, -inf  ;;  %vm784_vm2 = vcmask 851712  }
 0x17c   :  { %v4662_v47 = vmov 72  }
 0x17d   :  { %v4480_v48 = vpop.eup %4479  ;;  %v362_v54 = vmul.f32 1.442695, %v359_v50  ;;  %v897_v50 = vsel %vm896_vm4, %v4749_v9, -inf  ;;  %vm560_vm4 = vcmask 589312  }
 0x17e   :  { %v4813_v49 = vpop.xlane.xlu1 %462  ;;  %147 = vperm.xlu1 %3688, %v4480_v48   ;;  %187 = vperm.xlu0 %3692, %v4480_v48   ;;  %v4827_v59 = vpop.xlane.xlu0 %454 }
 0x17f   :  { %7245 = vst [vmem:[#allocation10_spill] sm:$0xff] %v4813_v49  ;;  %4483 = vpow2.f32 %v362_v54  ;;  %7248 = vst [vmem:[#allocation13_spill] sm:$0xff] %v4827_v59  ;;  %v471_v60 = vsub.f32 %v4747_v8, %v4813_v49  ;;  %v673_v54 = vsel %vm672_vm11, %v4749_v9, -inf  ;;  %vm564_vm11 = vcmask 587264  }
 0x181   :  { %v474_v0 = vmul.f32 1.442695, %v471_v60  ;;  %v7146_v60 = vmov 58  }
 0x182   :  { %v4817_v51 = vpop.xlane.xlu1 %910  ;;  %3689 = vset.pattern.permute.xlu1 %v7106_v52  ;;  %3695 = vset.pattern.permute.xlu0 %v7088_v53  ;;  %v4837_v1 = vpop.xlane.xlu0 %114 }
 0x183   :  { %7246 = vst [vmem:[#allocation11_spill] sm:$0xff] %v4817_v51  ;;  %157 = vperm.xlu1 %3689, %v4480_v48   ;;  %217 = vperm.xlu0 %3695, %v4480_v48   ;;  %7250 = vst [vmem:[#allocation15_spill] sm:$0xff] %v4837_v1  ;;  %4485 = vpow2.f32 %v474_v0 }
 0x185   :  { %v4823_v56 = vpop.eup %4481 }
 0x186   :  { %v4821_v55 = vpop.xlane.xlu1 %686  ;;  %v4848_v10 = vpop.xlane.xlu0 %338 }
 0x187   :  { %7247 = vst [vmem:[#allocation12_spill] sm:$0xff] %v4821_v55  ;;  %3690 = vset.pattern.permute.xlu1 %v7100_v57  ;;  %3696 = vset.pattern.permute.xlu0 %v7086_v58  ;;  %7252 = vst [vmem:[#allocation17_spill] sm:$0xff] %v4848_v10 }
 0x188   :  { %167 = vperm.xlu1 %3690, %v4480_v48   ;;  %259 = vperm.xlu0 %3696, %v4823_v56  }
 0x189   :  { %v4843_v4 = vpop.eup %4483 }
 0x18a   :  { %v4832_v61 = vpop.xlane.xlu1 %122  ;;  %v4857_v15 = vpop.xlane.xlu0 %346 }
 0x18b   :  { %7249 = vst [vmem:[#allocation14_spill] sm:$0xff] %v4832_v61  ;;  %v134_v2 = vsub.f32 %v4749_v9, %v4832_v61  ;;  %7254 = vst [vmem:[#allocation19_spill] sm:$0xff] %v4857_v15  ;;  %v358_v20 = vsub.f32 %v4749_v9, %v4857_v15 }
 0x18c   :  { %3691 = vset.pattern.permute.xlu1 %v7098_v62  ;;  %3702 = vset.pattern.permute.xlu0 %v7114_v63 }
 0x18d   :  { %177 = vperm.xlu1 %3691, %v4480_v48   ;;  %319 = vperm.xlu0 %3702, %v4823_v56   ;;  %v136_v7 = vmul.f32 1.442695, %v134_v2  ;;  %v4859_v16 = vpop.eup %4485  ;;  %v360_v23 = vmul.f32 1.442695, %v358_v20 }
 0x18e   :  { %v4841_v3 = vpop.xlane.xlu1 %226 }
 0x18f   :  { %7251 = vst [vmem:[#allocation16_spill] sm:$0xff] %v4841_v3  ;;  %4487 = vpow2.f32 %v136_v7 }
 0x191   :  { %3693 = vset.pattern.permute.xlu1 %v7092_v5  ;;  %3708 = vset.pattern.permute.xlu0 %v7131_v6 }
 0x192   :  { %197 = vperm.xlu1 %3693, %v4480_v48   ;;  %411 = vperm.xlu0 %3708, %v4843_v4   ;;  %v4850_v11 = vpop.xlane.xlu1 %234 }
 0x193   :  { %7253 = vst [vmem:[#allocation18_spill] sm:$0xff] %v4850_v11  ;;  %v246_v14 = vsub.f32 %v4749_v9, %v4850_v11  ;;  %v7273_v11 = vmov 106  }
 0x195   :  { %v248_v19 = vmul.f32 1.442695, %v246_v14  ;;  %v583_v14 = vsub.f32 %v4747_v8, %v4809_v46 }
 0x196   :  { %3694 = vset.pattern.permute.xlu1 %v7110_v12  ;;  %3711 = vset.pattern.permute.xlu0 %v7137_v13 }
 0x197   :  { %207 = vperm.xlu1 %3694, %v4480_v48   ;;  %441 = vperm.xlu0 %3711, %v4843_v4   ;;  %4489 = vpow2.f32 %v248_v19  ;;  %v7142_v48 = vmov 57  }
 0x198   :  { %4491 = vpow2.f32 %v360_v23  ;;  %v586_v23 = vmul.f32 1.442695, %v583_v14 }
 0x199   :  { %v4867_v21 = vpop.eup %4487 }
 0x19b   :  { %3697 = vset.pattern.permute.xlu1 %v7102_v17  ;;  %3712 = vset.pattern.permute.xlu0 %v7139_v18 }
 0x19c   :  { %269 = vperm.xlu1 %3697, %v4823_v56   ;;  %483 = vperm.xlu0 %3712, %v4859_v16  }
 0x1a0   :  { %3698 = vset.pattern.permute.xlu1 %v7096_v22  ;;  %3715 = vset.pattern.permute.xlu0 %v7082_v29 }
 0x1a1   :  { %279 = vperm.xlu1 %3698, %v4823_v56   ;;  %142 = vperm.xlu0 %3715, %v4867_v21   ;;  %v4877_v25 = vpop.eup %4489 }
 0x1a2   :  { %v4883_v30 = vpop.eup %4491 }
 0x1a5   :  { %3699 = vset.pattern.permute.xlu1 %v7104_v24  ;;  %3721 = vset.pattern.permute.xlu0 %v7110_v12 }
 0x1a6   :  { %289 = vperm.xlu1 %3699, %v4823_v56   ;;  %203 = vperm.xlu0 %3721, %v4867_v21  }
 0x1aa   :  { %3700 = vset.pattern.permute.xlu1 %v7108_v26  ;;  %3728 = vset.pattern.permute.xlu0 %v7084_v27 }
 0x1ab   :  { %299 = vperm.xlu1 %3700, %v4823_v56   ;;  %305 = vperm.xlu0 %3728, %v4877_v25  }
 0x1af   :  { %3701 = vset.pattern.permute.xlu1 %v7084_v27  ;;  %3731 = vset.pattern.permute.xlu0 %v7112_v31 }
 0x1b0   :  { %309 = vperm.xlu1 %3701, %v4823_v56   ;;  %366 = vperm.xlu0 %3731, %v4883_v30  }
 0x1b4   :  { %3703 = vset.pattern.permute.xlu1 %v7118_v32  ;;  %3737 = vset.pattern.permute.xlu0 %v7090_v33 }
 0x1b5   :  { %329 = vperm.xlu1 %3703, %v4823_v56   ;;  %427 = vperm.xlu0 %3737, %v4883_v30   ;;  %v4911_v56 = vpop.xlane.xlu0 %794 }
 0x1b6   :  { %7255 = vst [vmem:[#allocation20_spill] sm:$0xff] %v4911_v56  ;;  %v806_v0 = vsub.f32 %v4749_v9, %v4911_v56  ;;  %v4660_v56 = vmov 105  }
 0x1b8   :  { %v808_v2 = vmul.f32 1.442695, %v806_v0 }
 0x1b9   :  { %3704 = vset.pattern.permute.xlu1 %v7112_v31  ;;  %3742 = vset.pattern.permute.xlu0 %v4632_v34  ;;  %v4927_v19 = vpop.xlane.xlu0 %570 }
 0x1ba   :  { %371 = vperm.xlu1 %3704, %v4843_v4   ;;  %4493 = vpow2.f32 %v808_v2  ;;  %7256 = vst [vmem:[#allocation21_spill] sm:$0xff] %v4927_v19  ;;  %v4942_v2 = vpop.xlane.xlu1 %450 }
 0x1bb   :  { %7257 = vst [vmem:[#allocation22_spill] sm:$0xff] %v4942_v2  ;;  %v464_v61 = vsub.f32 %v4749_v9, %v4942_v2 }
 0x1bd   :  { %v4966_v27 = vpop.xlane.xlu0 %458 }
 0x1be   :  { %3705 = vset.pattern.permute.xlu1 %v7120_v35  ;;  %7259 = vst [vmem:[#allocation24_spill] sm:$0xff] %v4966_v27 }
 0x1bf   :  { %381 = vperm.xlu1 %3705, %v4843_v4  }
 0x1c3   :  { %3706 = vset.pattern.permute.xlu1 %v7124_v38 }
 0x1c4   :  { %391 = vperm.xlu1 %3706, %v4843_v4   ;;  %v4930_v20 = vpop.eup %4493 }
 0x1c8   :  { %3707 = vset.pattern.permute.xlu1 %v7127_v39 }
 0x1c9   :  { %401 = vperm.xlu1 %3707, %v4843_v4  }
 0x1cd   :  { %3709 = vset.pattern.permute.xlu1 %v7133_v44 }
 0x1ce   :  { %421 = vperm.xlu1 %3709, %v4843_v4  }
 0x1d2   :  { %3710 = vset.pattern.permute.xlu1 %v7090_v33 }
 0x1d3   :  { %431 = vperm.xlu1 %3710, %v4843_v4   ;;  %v807_v4 = vsub.f32 %v4747_v8, %v4803_v42  ;;  %v901_v42 = vsel %vm900_vm7, %v4747_v8, -inf  ;;  %vm1130_vm7 = vcmask 130048  }
 0x1d4   :  { %790 = vmax.xlane.f32.xlu0 %v789_v45  ;;  %v582_v45 = vsub.f32 %v4749_v9, %v4927_v19  ;;  %v4663_v19 = vmov 73  }
 0x1d5   :  { %v810_v7 = vmul.f32 1.442695, %v807_v4  ;;  %v7155_v4 = vmov 107  }
 0x1d6   :  { %v584_v0 = vmul.f32 1.442695, %v582_v45 }
 0x1d7   :  { %3713 = vset.pattern.permute.xlu1 %v7142_v48  ;;  %4495 = vpow2.f32 %v810_v7 }
 0x1d8   :  { %493 = vperm.xlu1 %3713, %v4859_v16   ;;  %898 = vmax.xlane.f32.xlu0 %v897_v50  ;;  %4497 = vpow2.f32 %v586_v23  ;;  %v7154_v23 = vmov 75  }
 0x1d9   :  { %4499 = vpow2.f32 %v584_v0  ;;  %v7152_v0 = vmov 76  }
 0x1dc   :  { %3714 = vset.pattern.permute.xlu1 %v7146_v60  ;;  %674 = vmax.xlane.f32.xlu0 %v673_v54  ;;  %v7157_v54 = vmov 106  }
 0x1dd   :  { %503 = vperm.xlu1 %3714, %v4859_v16  }
 0x1e1   :  { %3716 = vset.pattern.permute.xlu1 %v7106_v52  ;;  %v4937_v50 = vpop.eup %4495 }
 0x1e2   :  { %153 = vperm.xlu1 %3716, %v4867_v21   ;;  %v4951_v14 = vpop.eup %4497 }
 0x1e6   :  { %3717 = vset.pattern.permute.xlu1 %v7100_v57 }
 0x1e7   :  { %163 = vperm.xlu1 %3717, %v4867_v21  }
 0x1eb   :  { %3718 = vset.pattern.permute.xlu1 %v7098_v62 }
 0x1ec   :  { %173 = vperm.xlu1 %3718, %v4867_v21  }
 0x1f0   :  { %3719 = vset.pattern.permute.xlu1 %v7094_v28  ;;  %v7126_v28 = vmov 110  }
 0x1f1   :  { %183 = vperm.xlu1 %3719, %v4867_v21  }
 0x1f2   :  { %814 = vperm.xlu0 %3742, %v4930_v20  }
 0x1f5   :  { %3720 = vset.pattern.permute.xlu1 %v7092_v5  ;;  %v4976_v5 = vpop.xlane.xlu0 %906 }
 0x1f6   :  { %193 = vperm.xlu1 %3720, %v4867_v21   ;;  %3748 = vset.pattern.permute.xlu0 %v7157_v54  ;;  %7260 = vst [vmem:[#allocation25_spill] sm:$0xff] %v4976_v5  ;;  %v918_v62 = vsub.f32 %v4749_v9, %v4976_v5  ;;  %v565_v54 = vsel %vm564_vm11, %v4747_v8, -inf  ;;  %vm1138_vm11 = vcmask 326656  }
 0x1f7   :  { %839 = vperm.xlu0 %3748, %v4937_v50  }
 0x1fa   :  { %3722 = vset.pattern.permute.xlu1 %v7088_v53  ;;  %v919_v53 = vsub.f32 %v4747_v8, %v4817_v51 }
 0x1fb   :  { %213 = vperm.xlu1 %3722, %v4867_v21   ;;  %3750 = vset.pattern.permute.xlu0 %v7155_v4  ;;  %v4959_v21 = vpop.eup %4499  ;;  %v561_v4 = vsel %vm560_vm4, %v4749_v9, -inf  ;;  %vm1133_vm4 = vcmask 195584  }
 0x1fc   :  { %845 = vperm.xlu0 %3750, %v4930_v20  }
 0x1fd   :  { %v4948_v7 = vpop.permute.xlu1 %147 }
 0x1fe   :  { %7258 = vst [vmem:[#allocation23_spill] sm:$0xff] %v4948_v7 }
 0x1ff   :  { %3723 = vset.pattern.permute.xlu1 %v7086_v58  ;;  %v7149_v58 = vmov 109  }
 0x200   :  { %254 = vperm.xlu1 %3723, %v4877_v25   ;;  %3753 = vset.pattern.permute.xlu0 %v7154_v23 }
 0x201   :  { %625 = vperm.xlu0 %3753, %v4951_v14  }
 0x202   :  { %v4956_v45 = vpop.permute.xlu1 %157 }
 0x204   :  { %3724 = vset.pattern.permute.xlu1 %v7102_v17  ;;  %v7117_v17 = vmov 78  }
 0x205   :  { %265 = vperm.xlu1 %3724, %v4877_v25   ;;  %3755 = vset.pattern.permute.xlu0 %v7152_v0 }
 0x206   :  { %631 = vperm.xlu0 %3755, %v4959_v21  }
 0x207   :  { %v4964_v29 = vpop.permute.xlu1 %167 }
 0x209   :  { %3725 = vset.pattern.permute.xlu1 %v7096_v22  ;;  %v922_v22 = vmul.f32 1.442695, %v919_v53  ;;  %v695_v53 = vsub.f32 %v4747_v8, %v4821_v55 }
 0x20a   :  { %275 = vperm.xlu1 %3725, %v4877_v25   ;;  %3758 = vset.pattern.permute.xlu0 %v7149_v58 }
 0x20b   :  { %869 = vperm.xlu0 %3758, %v4937_v50   ;;  %4501 = vpow2.f32 %v922_v22  ;;  %v698_v22 = vmul.f32 1.442695, %v695_v53 }
 0x20c   :  { %v4974_v33 = vpop.permute.xlu1 %177 }
 0x20e   :  { %3726 = vset.pattern.permute.xlu1 %v7104_v24  ;;  %v920_v24 = vmul.f32 1.442695, %v918_v62  ;;  %v470_v62 = vsub.f32 %v4749_v9, %v4966_v27  ;;  %v465_v27 = vsub.f32 %v4747_v8, %v4827_v59 }
 0x20f   :  { %285 = vperm.xlu1 %3726, %v4877_v25   ;;  %3760 = vset.pattern.permute.xlu0 %v7126_v28 }
 0x210   :  { %875 = vperm.xlu0 %3760, %v4930_v20   ;;  %4503 = vpow2.f32 %v920_v24  ;;  %v7123_v24 = vmov 120  }
 0x211   :  { %v4984_v57 = vpop.permute.xlu1 %197  ;;  %4505 = vpow2.f32 %v698_v22  ;;  %v7122_v22 = vmov 121  }
 0x213   :  { %3727 = vset.pattern.permute.xlu1 %v7108_v26  ;;  %v7116_v26 = vmov 79  }
 0x214   :  { %295 = vperm.xlu1 %3727, %v4877_v25   ;;  %3763 = vset.pattern.permute.xlu0 %v7117_v17 }
 0x215   :  { %655 = vperm.xlu0 %3763, %v4951_v14   ;;  %v5003_v31 = vpop.eup %4501 }
 0x216   :  { %v4992_v52 = vpop.permute.xlu1 %207 }
 0x218   :  { %3729 = vset.pattern.permute.xlu1 %v7114_v63  ;;  %v472_v63 = vmul.f32 1.442695, %v470_v62 }
 0x219   :  { %315 = vperm.xlu1 %3729, %v4877_v25   ;;  %3765 = vset.pattern.permute.xlu0 %v7116_v26  ;;  %v5010_v26 = vpop.xlane.xlu0 %682 }
 0x21a   :  { %661 = vperm.xlu0 %3765, %v4959_v21   ;;  %7261 = vst [vmem:[#allocation26_spill] sm:$0xff] %v5010_v26  ;;  %v5013_v17 = vpop.eup %4503  ;;  %4507 = vpow2.f32 %v472_v63 }
 0x21b   :  { %v5000_v12 = vpop.permute.xlu1 %269 }
 0x21d   :  { %3730 = vset.pattern.permute.xlu1 %v7118_v32  ;;  %v5023_v32 = vpop.eup %4505  ;;  %v5121_v49 = vpop.permute.xlu0 %187 }
 0x21e   :  { %325 = vperm.xlu1 %3730, %v4877_v25   ;;  %3768 = vset.pattern.permute.xlu0 %v7123_v24  ;;  %v694_v25 = vsub.f32 %v4749_v9, %v5010_v26 }
 0x21f   :  { %931 = vperm.xlu0 %3768, %v5003_v31  }
 0x220   :  { %v5008_v53 = vpop.permute.xlu1 %279  ;;  %v696_v63 = vmul.f32 1.442695, %v694_v25  ;;  %v7132_v25 = vmov 123  }
 0x221   :  { %v5127_v26 = vpop.permute.xlu0 %217 }
 0x222   :  { %3732 = vset.pattern.permute.xlu1 %v7120_v35  ;;  %v7136_v35 = vmov 89   ;;  %4509 = vpow2.f32 %v696_v63 }
 0x223   :  { %377 = vperm.xlu1 %3732, %v4883_v30   ;;  %3770 = vset.pattern.permute.xlu0 %v7122_v22 }
 0x224   :  { %937 = vperm.xlu0 %3770, %v5013_v17   ;;  %v5031_v24 = vpop.eup %4507 }
 0x225   :  { %v5020_v62 = vpop.permute.xlu1 %289  ;;  %v5132_v43 = vpop.permute.xlu0 %259 }
 0x226   :  { %7262 = vst [vmem:[#allocation27_spill] sm:$0xff] %v5020_v62 }
 0x227   :  { %3733 = vset.pattern.permute.xlu1 %v7124_v38  ;;  %v7129_v38 = vmov 59  }
 0x228   :  { %387 = vperm.xlu1 %3733, %v4883_v30   ;;  %3773 = vset.pattern.permute.xlu0 %v7136_v35 }
 0x229   :  { %717 = vperm.xlu0 %3773, %v5023_v32  }
 0x22a   :  { %v5028_v22 = vpop.permute.xlu1 %299 }
 0x22b   :  { %7263 = vst [vmem:[#allocation28_spill] sm:$0xff] %v5028_v22 }
 0x22c   :  { %3734 = vset.pattern.permute.xlu1 %v7127_v39  ;;  %v5045_v63 = vpop.eup %4509 }
 0x22d   :  { %397 = vperm.xlu1 %3734, %v4883_v30   ;;  %3775 = vset.pattern.permute.xlu0 %v7129_v38  ;;  %v7135_v38 = vmov 91  }
 0x22e   :  { %509 = vperm.xlu0 %3775, %v5031_v24  }
 0x22f   :  { %v5036_v28 = vpop.permute.xlu1 %309 }
 0x230   :  { %7264 = vst [vmem:[#allocation29_spill] sm:$0xff] %v5036_v28  ;;  %v4664_v28 = vmov 74  }
 0x231   :  { %3735 = vset.pattern.permute.xlu1 %v7131_v6 }
 0x232   :  { %407 = vperm.xlu1 %3735, %v4883_v30   ;;  %3778 = vset.pattern.permute.xlu0 %v7132_v25  ;;  %v7145_v25 = vmov 124  }
 0x233   :  { %961 = vperm.xlu0 %3778, %v5003_v31  }
 0x234   :  { %v5042_v39 = vpop.permute.xlu1 %329 }
 0x235   :  { %7265 = vst [vmem:[#allocation30_spill] sm:$0xff] %v5042_v39  ;;  %v466_v39 = vmul.f32 1.442695, %v464_v61 }
 0x236   :  { %3736 = vset.pattern.permute.xlu1 %v7133_v44 }
 0x237   :  { %417 = vperm.xlu1 %3736, %v4883_v30   ;;  %3780 = vset.pattern.permute.xlu0 %v7135_v38  ;;  %v7141_v38 = vmov 92  }
 0x238   :  { %733 = vperm.xlu0 %3780, %v5045_v63  }
 0x239   :  { %v5050_v6 = vpop.permute.xlu1 %371 }
 0x23b   :  { %3738 = vset.pattern.permute.xlu1 %v7137_v13 }
 0x23c   :  { %437 = vperm.xlu1 %3738, %v4883_v30   ;;  %3783 = vset.pattern.permute.xlu0 %v7145_v25  ;;  %v7144_v30 = vmov 125   ;;  %v7153_v25 = vmov 127  }
 0x23d   :  { %971 = vperm.xlu0 %3783, %v5003_v31  }
 0x23e   :  { %v5056_v44 = vpop.permute.xlu1 %381 }
 0x240   :  { %3739 = vset.pattern.permute.xlu1 %v7139_v18  ;;  %v7148_v18 = vmov 93  }
 0x241   :  { %478 = vperm.xlu1 %3739, %v5031_v24   ;;  %3785 = vset.pattern.permute.xlu0 %v7141_v38 }
 0x242   :  { %743 = vperm.xlu0 %3785, %v5045_v63  }
 0x243   :  { %v5062_v35 = vpop.permute.xlu1 %391 }
 0x245   :  { %3740 = vset.pattern.permute.xlu1 %v7142_v48  ;;  %v7150_v48 = vmov 63  }
 0x246   :  { %489 = vperm.xlu1 %3740, %v5031_v24   ;;  %3788 = vset.pattern.permute.xlu0 %v7144_v30 }
 0x247   :  { %981 = vperm.xlu0 %3788, %v5003_v31  }
 0x248   :  { %v5068_v13 = vpop.permute.xlu1 %401 }
 0x24a   :  { %3741 = vset.pattern.permute.xlu1 %v7146_v60 }
 0x24b   :  { %499 = vperm.xlu1 %3741, %v5031_v24   ;;  %3790 = vset.pattern.permute.xlu0 %v7148_v18  ;;  %v7156_v18 = vmov 95  }
 0x24c   :  { %753 = vperm.xlu0 %3790, %v5045_v63  }
 0x24d   :  { %v5074_v38 = vpop.permute.xlu1 %421 }
 0x24e   :  { %7266 = vst [vmem:[#allocation31_spill] sm:$0xff] %v5074_v38  ;;  %v7192_v38 = vmov 126  }
 0x24f   :  { %3743 = vset.pattern.permute.xlu1 %v4632_v34 }
 0x250   :  { %3793 = vset.pattern.permute.xlu0 %v7150_v48 }
 0x251   :  { %553 = vperm.xlu0 %3793, %v4859_v16  }
 0x252   :  { %v5079_v30 = vpop.permute.xlu1 %431 }
 0x253   :  { %7267 = vst [vmem:[#allocation32_spill] sm:$0xff] %v5079_v30  ;;  %v7308_v30 = vmov 59  }
 0x255   :  { %3795 = vset.pattern.permute.xlu0 %v7153_v25  ;;  %v785_v25 = vsel %vm784_vm2, %v4749_v9, -inf  ;;  %vm676_vm2 = vcmask 718464  }
 0x256   :  { %997 = vperm.xlu0 %3795, %v5013_v17  }
 0x257   :  { %v5083_v60 = vpop.permute.xlu1 %493 }
 0x25a   :  { %3798 = vset.pattern.permute.xlu0 %v7156_v18 }
 0x25b   :  { %777 = vperm.xlu0 %3798, %v5023_v32  }
 0x25c   :  { %v5087_v34 = vpop.permute.xlu1 %503 }
 0x261   :  { %v5089_v58 = vpop.permute.xlu1 %153 }
 0x266   :  { %v5091_v48 = vpop.permute.xlu1 %163 }
 0x26b   :  { %v5093_v0 = vpop.permute.xlu1 %173 }
 0x26f   :  { %786 = vmax.xlane.f32.xlu1 %v785_v25  ;;  %v677_v25 = vsel %vm676_vm2, %v4747_v8, -inf  ;;  %vm1141_vm2 = vcmask 392192  }
 0x270   :  { %v5096_v23 = vpop.permute.xlu1 %183 }
 0x273   :  { %562 = vmax.xlane.f32.xlu1 %v561_v4 }
 0x275   :  { %v5099_v18 = vpop.permute.xlu1 %193 }
 0x277   :  { %566 = vmax.xlane.f32.xlu1 %v565_v54 }
 0x27a   :  { %v5102_v51 = vpop.permute.xlu1 %213 }
 0x27b   :  { %902 = vmax.xlane.f32.xlu1 %v901_v42 }
 0x27f   :  { %v5106_v5 = vpop.permute.xlu1 %254  ;;  %678 = vmax.xlane.f32.xlu1 %v677_v25  ;;  %v7172_v25 = vmov 90  }
 0x280   :  { %3819 = vset.pattern.permute.xlu0 %v7172_v25  ;;  %v5138_v25 = vpop.permute.xlu0 %319 }
 0x281   :  { %7272 = vst [vmem:[#allocation37_spill] sm:$0xff] %v5138_v25 }
 0x284   :  { %v5108_v55 = vpop.permute.xlu1 %265 }
 0x289   :  { %v5110_v4 = vpop.permute.xlu1 %275 }
 0x28e   :  { %v5112_v46 = vpop.permute.xlu1 %285 }
 0x28f   :  { %7268 = vst [vmem:[#allocation33_spill] sm:$0xff] %v5112_v46  ;;  %v4667_v46 = vmov 111  }
 0x290   :  { %819 = vperm.xlu1 %3743, %v4937_v50  }
 0x293   :  { %v5115_v54 = vpop.permute.xlu1 %295 }
 0x294   :  { %7269 = vst [vmem:[#allocation34_spill] sm:$0xff] %v5115_v54  ;;  %3744 = vset.pattern.permute.xlu1 %v4660_v56 }
 0x295   :  { %825 = vperm.xlu1 %3744, %v4930_v20  }
 0x298   :  { %v5118_v42 = vpop.permute.xlu1 %315 }
 0x299   :  { %7270 = vst [vmem:[#allocation35_spill] sm:$0xff] %v5118_v42  ;;  %829 = vperm.xlu1 %3744, %v4937_v50  }
 0x29d   :  { %v5124_v36 = vpop.permute.xlu1 %325  ;;  %3745 = vset.pattern.permute.xlu1 %v4662_v47 }
 0x29e   :  { %7271 = vst [vmem:[#allocation36_spill] sm:$0xff] %v5124_v36  ;;  %590 = vperm.xlu1 %3745, %v4959_v21   ;;  %v5150_v36 = vpop.permute.xlu0 %411 }
 0x29f   :  { %7275 = vst [vmem:[#allocation39_spill] sm:$0xff] %v5150_v36  ;;  %v7284_v36 = vmov 75  }
 0x2a2   :  { %v5129_v56 = vpop.permute.xlu1 %377  ;;  %595 = vperm.xlu1 %3745, %v4951_v14   ;;  %v5155_v22 = vpop.permute.xlu0 %441 }
 0x2a3   :  { %7277 = vst [vmem:[#allocation41_spill] sm:$0xff] %v5155_v22 }
 0x2a6   :  { %3746 = vset.pattern.permute.xlu1 %v4663_v19  ;;  %v468_v19 = vmul.f32 1.442695, %v465_v27  ;;  %v7279_v27 = vmov 107   ;;  %v484_v2 = vpop.permute.xlu0 %483 }
 0x2a7   :  { %v5134_v15 = vpop.permute.xlu1 %387  ;;  %601 = vperm.xlu1 %3746, %v4959_v21  }
 0x2a8   :  { %4511 = vpow2.f32 %v468_v19 }
 0x2a9   :  { %4513 = vpow2.f32 %v466_v39 }
 0x2ab   :  { %605 = vperm.xlu1 %3746, %v4951_v14  }
 0x2ac   :  { %v5140_v47 = vpop.permute.xlu1 %397 }
 0x2af   :  { %3747 = vset.pattern.permute.xlu1 %v7273_v11 }
 0x2b0   :  { %835 = vperm.xlu1 %3747, %v4930_v20  }
 0x2b1   :  { %v5148_v7 = vpop.permute.xlu1 %407 }
 0x2b2   :  { %7274 = vst [vmem:[#allocation38_spill] sm:$0xff] %v5148_v7  ;;  %v5162_v61 = vpop.eup %4511 }
 0x2b3   :  { %7280 = vst [vmem:[#allocation43_spill] sm:$0xff] %v5162_v61  ;;  %v5167_v39 = vmul.f32 %v5162_v61, %v484_v2  ;;  %v5178_v25 = vmul.f32 %v5162_v61, %v5083_v60  ;;  %v4665_v2 = vmov 108   ;;  %v5188_v54 = vmul.f32 %v5162_v61, %v5087_v34  ;;  %v5201_v34 = vpop.permute.xlu0 %142 }
 0x2b4   :  { %3749 = vset.pattern.permute.xlu1 %v4664_v28  ;;  %v5164_v28 = vpop.eup %4513  ;;  %7291 = vst [vmem:[#allocation51_spill] sm:$0xff] %v5201_v34  ;;  %v7295_v34 = vmov 79  }
 0x2b5   :  { %611 = vperm.xlu1 %3749, %v4959_v21   ;;  %7281 = vst [vmem:[#allocation44_spill] sm:$0xff] %v5164_v28  ;;  %7282 = vst [vmem:[#allocation45_spill] sm:$0xff] %v5167_v39  ;;  %v4669_v39 = vmov 122  }
 0x2b6   :  { %v5153_v59 = vpop.permute.xlu1 %417  ;;  %7285 = vst [vmem:[#allocation47_spill] sm:$0xff] %v5178_v25  ;;  %7287 = vst [vmem:[#allocation49_spill] sm:$0xff] %v5188_v54 }
 0x2b7   :  { %7276 = vst [vmem:[#allocation40_spill] sm:$0xff] %v5153_v59  ;;  %v5206_v60 = vpop.permute.xlu0 %203  ;;  %v7316_v59 = vmov 63  }
 0x2b9   :  { %615 = vperm.xlu1 %3749, %v4951_v14  }
 0x2bb   :  { %v5158_v11 = vpop.permute.xlu1 %437 }
 0x2bc   :  { %7278 = vst [vmem:[#allocation42_spill] sm:$0xff] %v5158_v11 }
 0x2bd   :  { %3751 = vset.pattern.permute.xlu1 %v7279_v27 }
 0x2be   :  { %849 = vperm.xlu1 %3751, %v4937_v50  }
 0x2c0   :  { %v479_v19 = vpop.permute.xlu1 %478 }
 0x2c1   :  { %v5170_v7 = vmul.f32 %v5164_v28, %v479_v19  ;;  %v4666_v19 = vmov 77  }
 0x2c2   :  { %3752 = vset.pattern.permute.xlu1 %v7284_v36 }
 0x2c3   :  { %7283 = vst [vmem:[#allocation46_spill] sm:$0xff] %v5170_v7  ;;  %621 = vperm.xlu1 %3752, %v4959_v21  }
 0x2c5   :  { %v490_v27 = vpop.permute.xlu1 %489 }
 0x2c6   :  { %v5181_v42 = vmul.f32 %v5164_v28, %v490_v27  ;;  %v7289_v27 = vmov 76  }
 0x2c7   :  { %3754 = vset.pattern.permute.xlu1 %v4665_v2  ;;  %v7290_v2 = vmov 109  }
 0x2c8   :  { %7286 = vst [vmem:[#allocation48_spill] sm:$0xff] %v5181_v42  ;;  %855 = vperm.xlu1 %3754, %v4930_v20  }
 0x2ca   :  { %v500_v36 = vpop.permute.xlu1 %499 }
 0x2cb   :  { %v5191_v62 = vmul.f32 %v5164_v28, %v500_v36  ;;  %v7292_v36 = vmov 110  }
 0x2cc   :  { %859 = vperm.xlu1 %3754, %v4937_v50  }
 0x2cd   :  { %7288 = vst [vmem:[#allocation50_spill] sm:$0xff] %v5191_v62 }
 0x2d0   :  { %3756 = vset.pattern.permute.xlu1 %v7289_v27  ;;  %v7293_v27 = vmov 78  }
 0x2d1   :  { %635 = vperm.xlu1 %3756, %v4951_v14  }
 0x2d5   :  { %3757 = vset.pattern.permute.xlu1 %v7290_v2  ;;  %v5210_v2 = vpop.permute.xlu0 %305 }
 0x2d6   :  { %865 = vperm.xlu1 %3757, %v4930_v20   ;;  %7294 = vst [vmem:[#allocation52_spill] sm:$0xff] %v5210_v2  ;;  %v4668_v2 = vmov 88  }
 0x2da   :  { %3759 = vset.pattern.permute.xlu1 %v4666_v19  ;;  %v5213_v19 = vpop.permute.xlu0 %366 }
 0x2db   :  { %641 = vperm.xlu1 %3759, %v4959_v21  }
 0x2df   :  { %645 = vperm.xlu1 %3759, %v4951_v14  }
 0x2e3   :  { %3761 = vset.pattern.permute.xlu1 %v7292_v36  ;;  %v5217_v36 = vpop.permute.xlu0 %427 }
 0x2e4   :  { %879 = vperm.xlu1 %3761, %v4937_v50   ;;  %7296 = vst [vmem:[#allocation53_spill] sm:$0xff] %v5217_v36 }
 0x2e7   :  { %v5220_v62 = vpop.xlane.xlu0 %790 }
 0x2e8   :  { %3762 = vset.pattern.permute.xlu1 %v7293_v27  ;;  %7297 = vst [vmem:[#allocation54_spill] sm:$0xff] %v5220_v62  ;;  %v7298_v27 = vmov 120  }
 0x2e9   :  { %651 = vperm.xlu1 %3762, %v4959_v21  }
 0x2ed   :  { %3764 = vset.pattern.permute.xlu1 %v4667_v46 }
 0x2ee   :  { %885 = vperm.xlu1 %3764, %v4930_v20   ;;  %v801_v20 = vsub.f32 %v4747_v8, %v5220_v62 }
 0x2f2   :  { %889 = vperm.xlu1 %3764, %v4937_v50  }
 0x2f6   :  { %3766 = vset.pattern.permute.xlu1 %v7295_v34 }
 0x2f7   :  { %665 = vperm.xlu1 %3766, %v4951_v14   ;;  %v804_v14 = vmul.f32 1.442695, %v801_v20 }
 0x2fb   :  { %3767 = vset.pattern.permute.xlu1 %v7298_v27  ;;  %v352_v27 = vsub.f32 %v4749_v9, %v4848_v10 }
 0x2fc   :  { %v5223_v21 = vpop.xlane.xlu1 %786  ;;  %926 = vperm.xlu1 %3767, %v5013_v17  }
 0x2fd   :  { %7299 = vst [vmem:[#allocation55_spill] sm:$0xff] %v5223_v21  ;;  %v800_v46 = vsub.f32 %v4749_v9, %v5223_v21  ;;  %v353_v21 = vsub.f32 %v4747_v8, %v4799_v40  ;;  %v354_v62 = vmul.f32 1.442695, %v352_v27  ;;  %v7307_v40 = vmov 89  }
 0x2ff   :  { %v802_v50 = vmul.f32 1.442695, %v800_v46  ;;  %v5240_v46 = vpop.xlane.xlu0 %898  ;;  %v356_v20 = vmul.f32 1.442695, %v353_v21 }
 0x300   :  { %v5230_v34 = vpop.xlane.xlu1 %562  ;;  %3769 = vset.pattern.permute.xlu1 %v4668_v2  ;;  %7302 = vst [vmem:[#allocation58_spill] sm:$0xff] %v5240_v46  ;;  %v7304_v2 = vmov 121  }
 0x301   :  { %7300 = vst [vmem:[#allocation56_spill] sm:$0xff] %v5230_v34  ;;  %702 = vperm.xlu1 %3769, %v5045_v63   ;;  %4515 = vpow2.f32 %v802_v50 }
 0x302   :  { %4517 = vpow2.f32 %v804_v14 }
 0x303   :  { %4519 = vpow2.f32 %v354_v62  ;;  %v5246_v50 = vpop.xlane.xlu0 %674 }
 0x304   :  { %v5235_v54 = vpop.xlane.xlu1 %566  ;;  %7305 = vst [vmem:[#allocation60_spill] sm:$0xff] %v5246_v50  ;;  %4521 = vpow2.f32 %v356_v20 }
 0x305   :  { %7301 = vst [vmem:[#allocation57_spill] sm:$0xff] %v5235_v54  ;;  %707 = vperm.xlu1 %3769, %v5023_v32  }
 0x307   :  { %v815_v27 = vpop.permute.xlu0 %814 }
 0x308   :  { %v5242_v42 = vpop.xlane.xlu1 %902 }
 0x309   :  { %7303 = vst [vmem:[#allocation59_spill] sm:$0xff] %v5242_v42  ;;  %3771 = vset.pattern.permute.xlu1 %v7304_v2 }
 0x30a   :  { %941 = vperm.xlu1 %3771, %v5003_v31  }
 0x30b   :  { %v5250_v25 = vpop.eup %4515 }
 0x30c   :  { %v5248_v10 = vpop.xlane.xlu1 %678  ;;  %v5254_v14 = vpop.eup %4517  ;;  %v822_v21 = vmul.f32 %v5250_v25, %v815_v27  ;;  %v576_v27 = vsub.f32 %v4749_v9, %v5230_v34  ;;  %v129_v34 = vsub.f32 %v4747_v8, %v4795_v37 }
 0x30d   :  { %7306 = vst [vmem:[#allocation61_spill] sm:$0xff] %v5248_v10 }
 0x30e   :  { %3772 = vset.pattern.permute.xlu1 %v7307_v40  ;;  %v5262_v40 = vpop.eup %4519 }
 0x30f   :  { %713 = vperm.xlu1 %3772, %v5045_v63   ;;  %v394_v20 = vmul.f32 %v5262_v40, %v5134_v15  ;;  %v5268_v11 = vpop.eup %4521  ;;  %v128_v15 = vsub.f32 %v4749_v9, %v4837_v1  ;;  %v7310_v1 = vmov 91  }
 0x310   :  { %v820_v7 = vpop.permute.xlu1 %819 }
 0x311   :  { %v823_v2 = vmul.f32 %v5254_v14, %v820_v7  ;;  %v577_v7 = vsub.f32 %v4747_v8, %v5235_v54 }
 0x313   :  { %v3809_v62 = vpack.i.bf16 %v823_v2, %v822_v21  ;;  %3774 = vset.pattern.permute.xlu1 %v4669_v39  ;;  %v395_v21 = vmul.f32 %v5268_v11, %v5062_v35  ;;  %v580_v36 = vmul.f32 1.442695, %v577_v7  ;;  %v130_v35 = vmul.f32 1.442695, %v128_v15 }
 0x314   :  { %v5258_v22 = vpop.permute.xlu1 %825  ;;  %947 = vperm.xlu1 %3774, %v5013_v17  }
 0x315   :  { %3810 = vrot.lane.b32.xlu0 %v3809_v62, %s4670_s0  ;;  %v3826_v2 = vpack.i.bf16 %v395_v21, %v394_v20  ;;  %v578_v62 = vmul.f32 1.442695, %v576_v27  ;;  %v132_v20 = vmul.f32 1.442695, %v129_v34  ;;  %v7309_v21 = vmov 123  }
 0x317   :  { %4523 = vpow2.f32 %v578_v62 }
 0x318   :  { %v5272_v39 = vpop.permute.xlu1 %829  ;;  %951 = vperm.xlu1 %3774, %v5003_v31   ;;  %4525 = vpow2.f32 %v580_v36 }
 0x319   :  { %723 = vperm.xlu0 %3819, %v5045_v63   ;;  %4527 = vpow2.f32 %v130_v35 }
 0x31a   :  { %4529 = vpow2.f32 %v132_v20 }
 0x31c   :  { %3776 = vset.pattern.permute.xlu1 %v7308_v30  ;;  %v7190_v30 = vmov 60  }
 0x31d   :  { %v5283_v54 = vpop.permute.xlu1 %590  ;;  %513 = vperm.xlu1 %3776, %v4859_v16   ;;  %3827 = vrot.lane.b32.xlu0 %v3826_v2, %s4671_s1 }
 0x31e   :  { %3882 = vset.pattern.permute.xlu0 %v7192_v38 }
 0x321   :  { %v5288_v27 = vpop.permute.xlu1 %595  ;;  %3777 = vset.pattern.permute.xlu1 %v7309_v21  ;;  %v5294_v15 = vpop.eup %4523 }
 0x322   :  { %957 = vperm.xlu1 %3777, %v5013_v17   ;;  %v5296_v2 = vpop.eup %4525 }
 0x323   :  { %v5301_v35 = vpop.eup %4527 }
 0x324   :  { %v170_v20 = vmul.f32 %v5301_v35, %v5091_v48 }
 0x326   :  { %v602_v7 = vpop.permute.xlu1 %601  ;;  %3779 = vset.pattern.permute.xlu1 %v7190_v30  ;;  %v5305_v30 = vpop.eup %4529 }
 0x327   :  { %519 = vperm.xlu1 %3779, %v5031_v24   ;;  %v608_v36 = vmul.f32 %v5294_v15, %v602_v7  ;;  %v171_v38 = vmul.f32 %v5305_v30, %v4964_v29 }
 0x329   :  { %v3846_v7 = vpack.i.bf16 %v171_v38, %v170_v20  ;;  %v180_v38 = vmul.f32 %v5301_v35, %v5093_v0  ;;  %v7312_v0 = vmov 92  }
 0x32a   :  { %v606_v34 = vpop.permute.xlu1 %605 }
 0x32b   :  { %v609_v62 = vmul.f32 %v5296_v2, %v606_v34  ;;  %523 = vperm.xlu1 %3779, %v4859_v16   ;;  %v7311_v34 = vmov 124  }
 0x32d   :  { %v3836_v21 = vpack.i.bf16 %v609_v62, %v608_v36 }
 0x32f   :  { %v5309_v37 = vpop.permute.xlu1 %835  ;;  %3781 = vset.pattern.permute.xlu1 %v7310_v1  ;;  %3837 = vrot.lane.b32.xlu0 %v3836_v21, %s4674_s9  ;;  %v7195_v1 = vmov 61   ;;  %v181_v21 = vmul.f32 %v5305_v30, %v4974_v33 }
 0x330   :  { %737 = vperm.xlu1 %3781, %v5023_v32  }
 0x333   :  { %3847 = vrot.lane.b32.xlu0 %v3846_v7, %s4675_s10 }
 0x334   :  { %v612_v48 = vpop.permute.xlu1 %611  ;;  %3782 = vset.pattern.permute.xlu1 %v7311_v34  ;;  %v5329_v34 = vpop.permute.xlu0 %839 }
 0x335   :  { %967 = vperm.xlu1 %3782, %v5013_v17   ;;  %v618_v29 = vmul.f32 %v5294_v15, %v612_v48  ;;  %v3866_v48 = vpack.i.bf16 %v181_v21, %v180_v38 }
 0x338   :  { %v616_v36 = vpop.permute.xlu1 %615  ;;  %v5336_v33 = vpop.permute.xlu0 %845 }
 0x339   :  { %v619_v62 = vmul.f32 %v5296_v2, %v616_v36  ;;  %3784 = vset.pattern.permute.xlu1 %v7195_v1  ;;  %v7201_v1 = vmov 62  }
 0x33a   :  { %529 = vperm.xlu1 %3784, %v5031_v24  }
 0x33b   :  { %v3856_v20 = vpack.i.bf16 %v619_v62, %v618_v29  ;;  %v7313_v62 = vmov 125  }
 0x33d   :  { %v5325_v7 = vpop.permute.xlu1 %849  ;;  %3857 = vrot.lane.b32.xlu0 %v3856_v20, %s4677_s11 }
 0x33e   :  { %533 = vperm.xlu1 %3784, %v4859_v16  }
 0x341   :  { %3867 = vrot.lane.b32.xlu0 %v3866_v48, %s4678_s12  ;;  %v5343_v48 = vpop.permute.xlu0 %625 }
 0x342   :  { %v5332_v36 = vpop.permute.xlu1 %621  ;;  %3786 = vset.pattern.permute.xlu1 %v7312_v0 }
 0x343   :  { %747 = vperm.xlu1 %3786, %v5023_v32  }
 0x345   :  { %v632_v28 = vpop.permute.xlu0 %631 }
 0x347   :  { %v856_v29 = vpop.permute.xlu1 %855  ;;  %3787 = vset.pattern.permute.xlu1 %v7313_v62 }
 0x348   :  { %977 = vperm.xlu1 %3787, %v5013_v17   ;;  %v862_v38 = vmul.f32 %v5250_v25, %v856_v29  ;;  %v638_v29 = vmul.f32 %v5294_v15, %v632_v28 }
 0x34b   :  { %v860_v20 = vpop.permute.xlu1 %859 }
 0x34c   :  { %v863_v21 = vmul.f32 %v5254_v14, %v860_v20  ;;  %3789 = vset.pattern.permute.xlu1 %v7201_v1  ;;  %v7314_v1 = vmov 93  }
 0x34d   :  { %539 = vperm.xlu1 %3789, %v5031_v24  }
 0x34e   :  { %v3876_v0 = vpack.i.bf16 %v863_v21, %v862_v38  ;;  %v200_v38 = vmul.f32 %v5301_v35, %v5099_v18 }
 0x350   :  { %v636_v61 = vpop.permute.xlu1 %635  ;;  %3877 = vrot.lane.b32.xlu0 %v3876_v0, %s4680_s13 }
 0x351   :  { %543 = vperm.xlu1 %3789, %v4859_v16   ;;  %v639_v62 = vmul.f32 %v5296_v2, %v636_v61  ;;  %v201_v16 = vmul.f32 %v5305_v30, %v4984_v57  ;;  %v7315_v61 = vmov 43  }
 0x353   :  { %v3893_v21 = vpack.i.bf16 %v639_v62, %v638_v29  ;;  %v3903_v28 = vpack.i.bf16 %v201_v16, %v200_v38  ;;  %v4683_v29 = vmov 94   ;;  %v210_v38 = vmul.f32 %v5301_v35, %v5206_v60 }
 0x354   :  { %991 = vperm.xlu0 %3882, %v5003_v31   ;;  %v241_v60 = vsub.f32 %v4747_v8, %v4801_v41  ;;  %v221_v41 = vmul.f32 %v5305_v30, %v5127_v26  ;;  %v688_v26 = vsub.f32 %v4749_v9, %v5246_v50 }
 0x355   :  { %v5351_v20 = vpop.permute.xlu1 %865  ;;  %3791 = vset.pattern.permute.xlu1 %v7314_v1  ;;  %v5363_v1 = vpop.permute.xlu0 %869 }
 0x356   :  { %757 = vperm.xlu1 %3791, %v5023_v32  }
 0x358   :  { %3894 = vrot.lane.b32.xlu0 %v3893_v21, %s4681_s14 }
 0x359   :  { %4108 = vset.pattern.permute.xlu0 %v7315_v61  ;;  %v5371_v16 = vpop.permute.xlu0 %875 }
 0x35a   :  { %v642_v0 = vpop.permute.xlu1 %641  ;;  %3792 = vset.pattern.permute.xlu1 %v7316_v59  ;;  %v244_v59 = vmul.f32 1.442695, %v241_v60 }
 0x35b   :  { %549 = vperm.xlu1 %3792, %v5031_v24   ;;  %v648_v62 = vmul.f32 %v5294_v15, %v642_v0  ;;  %v211_v24 = vmul.f32 %v5305_v30, %v4992_v52  ;;  %v240_v0 = vsub.f32 %v4749_v9, %v4841_v3  ;;  %v7317_v52 = vmov 127  }
 0x35c   :  { %3904 = vrot.lane.b32.xlu0 %v3903_v28, %s4682_s15 }
 0x35d   :  { %v3923_v28 = vpack.i.bf16 %v211_v24, %v210_v38  ;;  %v242_v38 = vmul.f32 1.442695, %v240_v0 }
 0x35e   :  { %v646_v18 = vpop.permute.xlu1 %645 }
 0x35f   :  { %v649_v57 = vmul.f32 %v5296_v2, %v646_v18  ;;  %3794 = vset.pattern.permute.xlu1 %v4683_v29  ;;  %v656_v18 = vpop.permute.xlu0 %655  ;;  %4531 = vpow2.f32 %v242_v38 }
 0x360   :  { %763 = vperm.xlu1 %3794, %v5045_v63   ;;  %v659_v29 = vmul.f32 %v5296_v2, %v656_v18  ;;  %4533 = vpow2.f32 %v244_v59  ;;  %v385_v18 = vmul.f32 %v5268_v11, %v5056_v44 }
 0x361   :  { %v3913_v21 = vpack.i.bf16 %v649_v57, %v648_v62 }
 0x363   :  { %v5375_v61 = vpop.permute.xlu1 %879  ;;  %3914 = vrot.lane.b32.xlu0 %v3913_v21, %s4684_s16  ;;  %v220_v21 = vmul.f32 %v5301_v35, %v5102_v51 }
 0x364   :  { %767 = vperm.xlu1 %3794, %v5023_v32  }
 0x365   :  { %v3943_v51 = vpack.i.bf16 %v221_v41, %v220_v21  ;;  %v7319_v41 = vmov 90  }
 0x367   :  { %3924 = vrot.lane.b32.xlu0 %v3923_v28, %s4685_s17  ;;  %v375_v28 = vmul.f32 %v5268_v11, %v5050_v6  ;;  %v384_v6 = vmul.f32 %v5262_v40, %v5129_v56  ;;  %v833_v56 = vmul.f32 %v5254_v14, %v5272_v39 }
 0x368   :  { %v652_v62 = vpop.permute.xlu1 %651  ;;  %3796 = vset.pattern.permute.xlu1 %v7317_v52  ;;  %v7318_v52 = vmov 95  }
 0x369   :  { %v658_v57 = vmul.f32 %v5294_v15, %v652_v62  ;;  %1001 = vperm.xlu1 %3796, %v5003_v31   ;;  %v374_v31 = vmul.f32 %v5262_v40, %v5213_v19  ;;  %v3804_v59 = vpack.i.bf16 %v385_v18, %v384_v6  ;;  %v690_v19 = vmul.f32 1.442695, %v688_v26  ;;  %v662_v62 = vpop.permute.xlu0 %661 }
 0x36a   :  { %v668_v44 = vmul.f32 %v5294_v15, %v662_v62 }
 0x36b   :  { %v3933_v24 = vpack.i.bf16 %v659_v29, %v658_v57  ;;  %v3799_v0 = vpack.i.bf16 %v375_v28, %v374_v31  ;;  %v832_v29 = vmul.f32 %v5250_v25, %v5258_v22  ;;  %4535 = vpow2.f32 %v690_v19 }
 0x36d   :  { %v5394_v3 = vpop.permute.xlu1 %885  ;;  %3797 = vset.pattern.permute.xlu1 %v7318_v52  ;;  %3934 = vrot.lane.b32.xlu0 %v3933_v24, %s4671_s1  ;;  %v5421_v24 = vpop.eup %4531  ;;  %v3814_v28 = vpack.i.bf16 %v833_v56, %v832_v29  ;;  %v842_v56 = vmul.f32 %v5250_v25, %v5309_v37 }
 0x36e   :  { %773 = vperm.xlu1 %3797, %v5045_v63   ;;  %v689_v63 = vsub.f32 %v4747_v8, %v5248_v10  ;;  %v262_v39 = vmul.f32 %v5421_v24, %v5106_v5  ;;  %v5425_v31 = vpop.eup %4533  ;;  %v161_v5 = vmul.f32 %v5305_v30, %v4956_v45  ;;  %v7320_v45 = vmov 126  }
 0x36f   :  { %v263_v22 = vmul.f32 %v5425_v31, %v5132_v43  ;;  %v599_v43 = vmul.f32 %v5296_v2, %v5288_v27 }
 0x370   :  { %v692_v57 = vmul.f32 1.442695, %v689_v63  ;;  %v5441_v63 = vpop.permute.xlu0 %931 }
 0x371   :  { %v5405_v60 = vpop.permute.xlu1 %889  ;;  %3944 = vrot.lane.b32.xlu0 %v3943_v51, %s4686_s18  ;;  %v3963_v6 = vpack.i.bf16 %v263_v22, %v262_v39  ;;  %v852_v22 = vmul.f32 %v5250_v25, %v5336_v33  ;;  %v629_v33 = vmul.f32 %v5296_v2, %v5343_v48 }
 0x372   :  { %3800 = vrot.lane.b32.xlu1 %v3799_v0, %s4681_s14  ;;  %4537 = vpow2.f32 %v692_v57  ;;  %v160_v0 = vmul.f32 %v5301_v35, %v5089_v58  ;;  %v272_v57 = vmul.f32 %v5421_v24, %v5108_v55 }
 0x373   :  { %3820 = vset.pattern.permute.xlu1 %v7319_v41  ;;  %v598_v41 = vmul.f32 %v5294_v15, %v5283_v54  ;;  %v843_v54 = vmul.f32 %v5254_v14, %v5329_v34  ;;  %v405_v34 = vmul.f32 %v5268_v11, %v5068_v13  ;;  %v912_v13 = vsub.f32 %v4749_v9, %v5240_v46 }
 0x374   :  { %v3821_v26 = vpack.i.bf16 %v161_v5, %v160_v0  ;;  %v283_v9 = vmul.f32 %v5425_v31, %v5008_v53  ;;  %v191_v53 = vmul.f32 %v5305_v30, %v5121_v49 }
 0x375   :  { %v5446_v58 = vpop.eup %4535  ;;  %v3841_v37 = vpack.i.bf16 %v843_v54, %v842_v56  ;;  %v7321_v56 = vld [vmem:[#allocation40_spill] sm:$0xff] }
 0x376   :  { %v666_v38 = vpop.permute.xlu1 %665  ;;  %3805 = vrot.lane.b32.xlu1 %v3804_v59, %s4684_s16  ;;  %v3831_v59 = vpack.i.bf16 %v599_v43, %v598_v41  ;;  %v914_v41 = vmul.f32 1.442695, %v912_v13 }
 0x377   :  { %v669_v21 = vmul.f32 %v5296_v2, %v666_v38  ;;  %v5460_v38 = vpop.permute.xlu0 %937  ;;  %v190_v2 = vmul.f32 %v5301_v35, %v5096_v23 }
 0x379   :  { %v3953_v52 = vpack.i.bf16 %v669_v21, %v668_v44  ;;  %v404_v44 = vmul.f32 %v5262_v40, %v5140_v47  ;;  %v273_v21 = vmul.f32 %v5425_v31, %v5000_v12  ;;  %v913_v47 = vsub.f32 %v4747_v8, %v5242_v42 }
 0x37a   :  { %3815 = vrot.lane.b32.xlu1 %v3814_v28, %s4682_s15  ;;  %v628_v8 = vmul.f32 %v5294_v15, %v5332_v36  ;;  %v3883_v48 = vpack.i.bf16 %v191_v53, %v190_v2 }
 0x37b   :  { %v5430_v51 = vpop.permute.xlu1 %926  ;;  %3954 = vrot.lane.b32.xlu0 %v3953_v52, %s4687_s19  ;;  %v3983_v55 = vpack.i.bf16 %v273_v21, %v272_v57  ;;  %v3851_v39 = vpack.i.bf16 %v405_v34, %v404_v44  ;;  %v853_v52 = vmul.f32 %v5254_v14, %v5325_v7  ;;  %v718_v12 = vpop.permute.xlu0 %717  ;;  %v916_v43 = vmul.f32 1.442695, %v913_v47  ;;  %v7323_v57 = vld [vmem:[#allocation43_spill] sm:$0xff] }
 0x37c   :  { %v7324_v44 = vld [vmem:[#allocation31_spill] sm:$0xff]  ;;  %v872_v34 = vmul.f32 %v5250_v25, %v5351_v20  ;;  %v873_v47 = vmul.f32 %v5254_v14, %v5363_v1 }
 0x37d   :  { %v3861_v7 = vpack.i.bf16 %v853_v52, %v852_v22  ;;  %4539 = vpow2.f32 %v916_v43  ;;  %v425_v23 = vmul.f32 %v5268_v11, %v7324_v44  ;;  %v883_v43 = vmul.f32 %v5254_v14, %v5375_v61 }
 0x37e   :  { %727 = vperm.xlu1 %3820, %v5023_v32   ;;  %v5449_v32 = vpop.eup %4537  ;;  %4541 = vpow2.f32 %v914_v41 }
 0x37f   :  { %3964 = vrot.lane.b32.xlu0 %v3963_v6, %s4685_s17  ;;  %v721_v5 = vmul.f32 %v5449_v32, %v718_v12  ;;  %v510_v36 = vpop.permute.xlu0 %509 }
 0x380   :  { %v703_v18 = vpop.permute.xlu1 %702 }
 0x381   :  { %v710_v19 = vmul.f32 %v5446_v58, %v703_v18 }
 0x382   :  { %3822 = vrot.lane.b32.xlu1 %v3821_v26, %s4688_s20  ;;  %v282_v26 = vmul.f32 %v5421_v24, %v5110_v4 }
 0x383   :  { %3881 = vset.pattern.permute.xlu1 %v7320_v45 }
 0x384   :  { %v708_v27 = vpop.permute.xlu1 %707  ;;  %v4003_v15 = vpack.i.bf16 %v283_v9, %v282_v26 }
 0x385   :  { %v711_v62 = vmul.f32 %v5449_v32, %v708_v27  ;;  %v424_v27 = vmul.f32 %v5262_v40, %v7321_v56 }
 0x386   :  { %3832 = vrot.lane.b32.xlu1 %v3831_v59, %s4680_s13  ;;  %v3871_v59 = vpack.i.bf16 %v629_v33, %v628_v8 }
 0x387   :  { %v3973_v29 = vpack.i.bf16 %v711_v62, %v710_v19  ;;  %v7322_v62 = vld [vmem:[#allocation44_spill] sm:$0xff]  ;;  %v5516_v49 = vpop.eup %4539  ;;  %v3888_v21 = vpack.i.bf16 %v425_v23, %v424_v27  ;;  %v893_v27 = vmul.f32 %v5254_v14, %v5405_v60  ;;  %v7331_v60 = vld [vmem:[#allocation45_spill] sm:$0xff] }
 0x388   :  { %v5508_v54 = vmul.f32 %v7322_v62, %v510_v36  ;;  %v7330_v36 = vld [vmem:[#allocation41_spill] sm:$0xff] }
 0x389   :  { %v5466_v28 = vpop.permute.xlu1 %941  ;;  %3974 = vrot.lane.b32.xlu0 %v3973_v29, %s4671_s1 }
 0x38a   :  { %3842 = vrot.lane.b32.xlu1 %v3841_v37, %s4685_s17  ;;  %v7325_v37 = vmov 40  }
 0x38d   :  { %3984 = vrot.lane.b32.xlu0 %v3983_v55, %s4686_s18  ;;  %v5523_v55 = vpop.eup %4541 }
 0x38e   :  { %v714_v0 = vpop.permute.xlu1 %713  ;;  %3852 = vrot.lane.b32.xlu1 %v3851_v39, %s4687_s19  ;;  %7326 = vst [vmem:[#allocation40_spill] sm:$0xff] %v5523_v55  ;;  %v962_v39 = vpop.permute.xlu0 %961 }
 0x38f   :  { %v720_v6 = vmul.f32 %v5446_v58, %v714_v0  ;;  %v965_v22 = vmul.f32 %v5516_v49, %v962_v39  ;;  %v7327_v0 = vld [vmem:[#allocation32_spill] sm:$0xff] }
 0x390   :  { %v435_v13 = vmul.f32 %v5268_v11, %v7327_v0 }
 0x391   :  { %v3993_v18 = vpack.i.bf16 %v721_v5, %v720_v6  ;;  %v3898_v6 = vpack.i.bf16 %v873_v47, %v872_v34  ;;  %v934_v47 = vmul.f32 %v5523_v55, %v5430_v51 }
 0x392   :  { %3862 = vrot.lane.b32.xlu1 %v3861_v7, %s4686_s18  ;;  %v7328_v7 = vld [vmem:[#allocation53_spill] sm:$0xff]  ;;  %v5536_v26 = vpop.permute.xlu0 %733 }
 0x393   :  { %v5493_v45 = vpop.permute.xlu1 %947  ;;  %3994 = vrot.lane.b32.xlu0 %v3993_v18, %s4687_s19  ;;  %v434_v20 = vmul.f32 %v5262_v40, %v7328_v7  ;;  %v882_v18 = vmul.f32 %v5250_v25, %v5371_v16  ;;  %v945_v7 = vmul.f32 %v5516_v49, %v5466_v28 }
 0x395   :  { %v3908_v1 = vpack.i.bf16 %v435_v13, %v434_v20  ;;  %v3918_v2 = vpack.i.bf16 %v883_v43, %v882_v18  ;;  %v7335_v43 = vld [vmem:[#allocation48_spill] sm:$0xff] }
 0x396   :  { %3872 = vrot.lane.b32.xlu1 %v3871_v59, %s4689_s21  ;;  %v7329_v59 = vld [vmem:[#allocation42_spill] sm:$0xff]  ;;  %v972_v56 = vpop.permute.xlu0 %971 }
 0x397   :  { %v5497_v4 = vpop.permute.xlu1 %951  ;;  %4004 = vrot.lane.b32.xlu0 %v4003_v15, %s4680_s13  ;;  %v444_v15 = vmul.f32 %v5262_v40, %v7329_v59  ;;  %v975_v39 = vmul.f32 %v5516_v49, %v972_v56 }
 0x398   :  { %v955_v28 = vmul.f32 %v5516_v49, %v5497_v4  ;;  %v7340_v4 = vld [vmem:[#allocation33_spill] sm:$0xff] }
 0x39a   :  { %987 = vperm.xlu1 %3881, %v5013_v17   ;;  %v5556_v44 = vpop.permute.xlu0 %743 }
 0x39c   :  { %v514_v19 = vpop.permute.xlu1 %513 }
 0x39d   :  { %v5511_v29 = vmul.f32 %v7323_v57, %v514_v19  ;;  %v892_v19 = vmul.f32 %v5250_v25, %v5394_v3  ;;  %v935_v25 = vmul.f32 %v5516_v49, %v5441_v63  ;;  %v944_v63 = vmul.f32 %v5523_v55, %v5460_v38 }
 0x39e   :  { %3884 = vrot.lane.b32.xlu1 %v3883_v48, %s4670_s0  ;;  %v445_v48 = vmul.f32 %v5268_v11, %v7330_v36  ;;  %v982_v3 = vpop.permute.xlu0 %981  ;;  %v7338_v36 = vld [vmem:[#allocation50_spill] sm:$0xff] }
 0x39f   :  { %v4008_v17 = vpack.i.bf16 %v5511_v29, %v5508_v54  ;;  %4103 = vset.pattern.permute.xlu1 %v7325_v37  ;;  %v3938_v23 = vpack.i.bf16 %v893_v27, %v892_v19  ;;  %v3958_v0 = vpack.i.bf16 %v935_v25, %v934_v47  ;;  %v985_v38 = vmul.f32 %v5516_v49, %v982_v3  ;;  %v7342_v47 = vld [vmem:[#allocation35_spill] sm:$0xff] }
 0x3a0   :  { %v3928_v16 = vpack.i.bf16 %v445_v48, %v444_v15  ;;  %v954_v15 = vmul.f32 %v5523_v55, %v5493_v45  ;;  %v292_v19 = vmul.f32 %v5421_v24, %v7340_v4  ;;  %v740_v54 = vmul.f32 %v5446_v58, %v5536_v26  ;;  %v4426_v26 = vld [vmem:[%s7073_s2 + $0x8] sm:$0xff]  }
 0x3a1   :  { %v958_v52 = vpop.permute.xlu1 %957  ;;  %v4433_v4 = vld [vmem:[%s7073_s2 + $0x88] sm:$0xff]  }
 0x3a2   :  { %v964_v12 = vmul.f32 %v5523_v55, %v958_v52  ;;  %3889 = vrot.lane.b32.xlu1 %v3888_v21, %s4688_s20  ;;  %v5573_v51 = vpop.permute.xlu0 %753 }
 0x3a4   :  { %v4013_v5 = vpack.i.bf16 %v965_v22, %v964_v12  ;;  %v7332_v12 = vld [vmem:[#allocation46_spill] sm:$0xff] }
 0x3a5   :  { %v7333_v22 = vpack.i.bf16 %v7331_v60, %v7332_v12  ;;  %v7343_v12 = vld [vmem:[#allocation37_spill] sm:$0xff] }
 0x3a6   :  { %v520_v8 = vpop.permute.xlu1 %519  ;;  %3899 = vrot.lane.b32.xlu1 %v3898_v6, %s4674_s9  ;;  %4014 = vrot.lane.b32.xlu0 %v4013_v5, %s4684_s16 }
 0x3a7   :  { %v526_v9 = vmul.f32 %v7322_v62, %v520_v8 }
 0x3aa   :  { %v524_v33 = vpop.permute.xlu1 %523  ;;  %3909 = vrot.lane.b32.xlu1 %v3908_v1, %s4675_s10  ;;  %v7334_v1 = vld [vmem:[#allocation47_spill] sm:$0xff] }
 0x3ab   :  { %v527_v41 = vmul.f32 %v7323_v57, %v524_v33  ;;  %v7336_v18 = vpack.i.bf16 %v7334_v1, %v7335_v43  ;;  %v3978_v33 = vpack.i.bf16 %v945_v7, %v944_v63  ;;  %v7345_v63 = vld [vmem:[#allocation28_spill] sm:$0xff] }
 0x3ac   :  { %v303_v1 = vmul.f32 %v5425_v31, %v7345_v63 }
 0x3ad   :  { %v4023_v53 = vpack.i.bf16 %v527_v41, %v526_v9  ;;  %v554_v9 = vpop.permute.xlu0 %553 }
 0x3ae   :  { %3919 = vrot.lane.b32.xlu1 %v3918_v2, %s4677_s11 }
 0x3af   :  { %v738_v61 = vpop.permute.xlu1 %737  ;;  %4024 = vrot.lane.b32.xlu0 %v4023_v53, %s4685_s17  ;;  %v7337_v53 = vld [vmem:[#allocation49_spill] sm:$0xff] }
 0x3b0   :  { %v7339_v48 = vpack.i.bf16 %v7337_v53, %v7338_v36  ;;  %v741_v60 = vmul.f32 %v5449_v32, %v738_v61  ;;  %v7346_v53 = vld [vmem:[#allocation29_spill] sm:$0xff] }
 0x3b1   :  { %v5595_v56 = vpop.permute.xlu0 %997  ;;  %v313_v36 = vmul.f32 %v5425_v31, %v7346_v53 }
 0x3b2   :  { %3929 = vrot.lane.b32.xlu1 %v3928_v16, %s4678_s12  ;;  %v3998_v16 = vpack.i.bf16 %v955_v28, %v954_v15  ;;  %v4028_v7 = vpack.i.bf16 %v741_v60, %v740_v54  ;;  %v4428_v15 = vld [vmem:[%s7073_s2 + $0x50] sm:$0xff]  }
 0x3b3   :  { %v4437_v60 = vld [vmem:[%s7073_s2 + $0x90] sm:$0xff]  }
 0x3b4   :  { %v968_v21 = vpop.permute.xlu1 %967 }
 0x3b5   :  { %v974_v34 = vmul.f32 %v5523_v55, %v968_v21 }
 0x3b6   :  { %3939 = vrot.lane.b32.xlu1 %v3938_v23, %s4689_s21 }
 0x3b7   :  { %v4033_v52 = vpack.i.bf16 %v975_v39, %v974_v34  ;;  %v7341_v34 = vld [vmem:[#allocation27_spill] sm:$0xff] }
 0x3b8   :  { %v293_v39 = vmul.f32 %v5425_v31, %v7341_v34 }
 0x3b9   :  { %v530_v14 = vpop.permute.xlu1 %529  ;;  %4034 = vrot.lane.b32.xlu0 %v4033_v52, %s4671_s1  ;;  %v5605_v52 = vpop.permute.xlu0 %777 }
 0x3ba   :  { %3949 = vrot.lane.b32.xlu1 %v7333_v22, %s4675_s10  ;;  %v536_v6 = vmul.f32 %v7322_v62, %v530_v14  ;;  %v322_v14 = vmul.f32 %v5421_v24, %v7342_v47  ;;  %v4018_v25 = vpack.i.bf16 %v293_v39, %v292_v19  ;;  %v323_v22 = vmul.f32 %v5425_v31, %v7343_v12  ;;  %v4434_v19 = vld [vmem:[%s7073_s2 + $0x18] sm:$0xff]   ;;  %v4438_v12 = vld [vmem:[%s7073_s2 + $0x20] sm:$0xff]  }
 0x3bc   :  { %v4073_v61 = vpack.i.bf16 %v323_v22, %v322_v14  ;;  %v7348_v22 = vld [vmem:[#allocation36_spill] sm:$0xff] }
 0x3bd   :  { %v534_v13 = vpop.permute.xlu1 %533  ;;  %v5622_v29 = vpop.permute.xlu0 %3810 }
 0x3be   :  { %v537_v5 = vmul.f32 %v7323_v57, %v534_v13  ;;  %3959 = vrot.lane.b32.xlu1 %v3958_v0, %s4677_s11  ;;  %v4423_v13 = vld [vmem:[%s7073_s2 + $0x40] sm:$0xff]  }
 0x3bf   :  { %3493 = vmatprep.subr.bf16.mxu1 %v4423_v13  ;;  %v760_v13 = vmul.f32 %v5446_v58, %v5573_v51  ;;  %v4440_v51 = vld [vmem:[%s7073_s2 + $0x68] sm:$0xff]  }
 0x3c0   :  { %v4043_v20 = vpack.i.bf16 %v537_v5, %v536_v6  ;;  %v7344_v6 = vld [vmem:[#allocation34_spill] sm:$0xff] }
 0x3c1   :  { %v302_v5 = vmul.f32 %v5421_v24, %v7344_v6  ;;  %v5639_v43 = vpop.permute.xlu0 %723 }
 0x3c2   :  { %v748_v8 = vpop.permute.xlu1 %747  ;;  %3969 = vrot.lane.b32.xlu1 %v7336_v18, %s4678_s12  ;;  %4044 = vrot.lane.b32.xlu0 %v4043_v20, %s4686_s18  ;;  %v4425_v20 = vld [vmem:[%s7073_s2 + $0x48] sm:$0xff]  }
 0x3c3   :  { %v4038_v28 = vpack.i.bf16 %v303_v1, %v302_v5 }
 0x3c6   :  { %3979 = vrot.lane.b32.xlu1 %v3978_v33, %s4689_s21  ;;  %v5643_v33 = vmul.f32 %v7323_v57, %v554_v9  ;;  %v750_v9 = vmul.f32 %v5446_v58, %v5556_v44  ;;  %v4432_v44 = vld [vmem:[%s7073_s2 + $0x58] sm:$0xff]  }
 0x3c7   :  { %v978_v41 = vpop.permute.xlu1 %977 }
 0x3c8   :  { %v984_v59 = vmul.f32 %v5523_v55, %v978_v41 }
 0x3ca   :  { %v4053_v2 = vpack.i.bf16 %v985_v38, %v984_v59  ;;  %3989 = vrot.lane.b32.xlu1 %v7339_v48, %s4670_s0  ;;  %v751_v59 = vmul.f32 %v5449_v32, %v748_v8  ;;  %v4427_v38 = vld [vmem:[%s7073_s2 + $0xc0] sm:$0xff]   ;;  %v4430_v8 = vld [vmem:[%s7073_s2 + $0x10] sm:$0xff]   ;;  %v5668_v48 = vpop.permute.xlu0 %3827 }
 0x3cb   :  { %3515 = vmatprep.subr.bf16.mxu0 %v4427_v38 }
 0x3cc   :  { %v540_v27 = vpop.permute.xlu1 %539  ;;  %4054 = vrot.lane.b32.xlu0 %v4053_v2, %s4687_s19 }
 0x3cd   :  { %v546_v45 = vmul.f32 %v7322_v62, %v540_v27  ;;  %v4431_v27 = vld [vmem:[%s7073_s2 + $0xc8] sm:$0xff]  }
 0x3ce   :  { %3999 = vrot.lane.b32.xlu1 %v3998_v16, %s4681_s14  ;;  %v4048_v16 = vpack.i.bf16 %v751_v59, %v750_v9  ;;  %v5704_v54 = vpop.permute.xlu0 %3837  ;;  %v4445_v59 = vld [vmem:[%s7073_s2 + $0xa0] sm:$0xff]   ;;  %v4448_v9 = vld [vmem:[%s7073_s2 + $0x78] sm:$0xff]  }
 0x3d0   :  { %v544_v23 = vpop.permute.xlu1 %543 }
 0x3d1   :  { %v547_v21 = vmul.f32 %v7323_v57, %v544_v23  ;;  %v4429_v57 = vld [vmem:[%s7073_s2 + $0x80] sm:$0xff]   ;;  %v7347_v23 = vld [vmem:[#allocation52_spill] sm:$0xff] }
 0x3d2   :  { %4009 = vrot.lane.b32.xlu1 %v4008_v17, %s4682_s15  ;;  %v4424_v17 = vld [vmem:[%s7073_s2] sm:$0xff]   ;;  %3516 = vmatpush3.bf16.msra.mxu0 %v4429_v57  ;;  %v5723_v63 = vpop.permute.xlu0 %3847  ;;  %v1004_v57 = vmul.f32 %v5523_v55, %v5595_v56  ;;  %v4449_v56 = vld [vmem:[%s7073_s2 + $0xa8] sm:$0xff]  }
 0x3d3   :  { %v4063_v3 = vpack.i.bf16 %v547_v21, %v546_v45  ;;  %3494 = vmatpush3.bf16.msra.mxu1 %v4424_v17  ;;  %v312_v45 = vmul.f32 %v5421_v24, %v7347_v23  ;;  %3517 = vmatprep.subr.bf16.mxu0 %v4431_v27  ;;  %v4454_v23 = vld [vmem:[%s7073_s2 + $0xb8] sm:$0xff]  }
 0x3d4   :  { %3495 = vmatprep.subr.bf16.mxu1 %v4425_v20  ;;  %v4441_v20 = vld [vmem:[%s7073_s2 + $0x98] sm:$0xff]  }
 0x3d5   :  { %v758_v0 = vpop.permute.xlu1 %757  ;;  %4064 = vrot.lane.b32.xlu0 %v4063_v3, %s4680_s13  ;;  %v4058_v34 = vpack.i.bf16 %v313_v36, %v312_v45  ;;  %v4435_v3 = vld [vmem:[%s7073_s2 + $0xd0] sm:$0xff]   ;;  %v781_v36 = vmul.f32 %v5449_v32, %v5605_v52  ;;  %v4453_v52 = vld [vmem:[%s7073_s2 + $0xf8] sm:$0xff]  }
 0x3d6   :  { %4019 = vrot.lane.b32.xlu1 %v4018_v25, %s4674_s9  ;;  %3518 = vmatpush3.bf16.msra.mxu0 %v4433_v4  ;;  %v761_v39 = vmul.f32 %v5449_v32, %v758_v0  ;;  %v4436_v25 = vld [vmem:[%s7073_s2 + $0x60] sm:$0xff]   ;;  %v332_v0 = vmul.f32 %v5421_v24, %v7348_v22  ;;  %v4439_v24 = vld [vmem:[%s7073_s2 + $0xd8] sm:$0xff]  }
 0x3d7   :  { %3496 = vmatpush3.bf16.msra.mxu1 %v4426_v26  ;;  %3519 = vmatprep.subr.bf16.mxu0 %v4435_v3 }
 0x3d8   :  { %3497 = vmatprep.subr.bf16.mxu1 %v4428_v15  ;;  %v4068_v5 = vpack.i.bf16 %v761_v39, %v760_v13  ;;  %v4446_v15 = vld [vmem:[%s7073_s2 + $0x30] sm:$0xff]  }
 0x3d9   :  { %4074 = vrot.lane.b32.xlu0 %v4073_v61, %s4681_s14  ;;  %v7349_v61 = vld [vmem:[#allocation30_spill] sm:$0xff] }
 0x3da   :  { %v550_v18 = vpop.permute.xlu1 %549  ;;  %4029 = vrot.lane.b32.xlu1 %v4028_v7, %s4688_s20  ;;  %3520 = vmatpush3.bf16.msra.mxu0 %v4437_v60  ;;  %v333_v6 = vmul.f32 %v5425_v31, %v7349_v61  ;;  %v4442_v31 = vld [vmem:[%s7073_s2 + $0x28] sm:$0xff]  }
 0x3db   :  { %v5646_v41 = vmul.f32 %v7322_v62, %v550_v18  ;;  %3498 = vmatpush3.bf16.msra.mxu1 %v4430_v8  ;;  %3521 = vmatprep.subr.bf16.mxu0 %v4439_v24  ;;  %v4443_v18 = vld [vmem:[%s7073_s2 + $0xe0] sm:$0xff]   ;;  %v4447_v8 = vld [vmem:[%s7073_s2 + $0xe8] sm:$0xff]  }
 0x3dc   :  { %3499 = vmatprep.subr.bf16.mxu1 %v4432_v44  ;;  %v4093_v26 = vpack.i.bf16 %v333_v6, %v332_v0  ;;  %v4452_v44 = vld [vmem:[%s7073_s2 + $0xb0] sm:$0xff]  }
 0x3dd   :  { %v4078_v62 = vpack.i.bf16 %v5643_v33, %v5646_v41  ;;  %v4450_v41 = vld [vmem:[%s7073_s2 + $0x38] sm:$0xff]  }
 0x3de   :  { %4039 = vrot.lane.b32.xlu1 %v4038_v28, %s4677_s11  ;;  %3522 = vmatpush3.bf16.msra.mxu0 %v4441_v20  ;;  %v4444_v28 = vld [vmem:[%s7073_s2 + $0x70] sm:$0xff]  }
 0x3df   :  { %v764_v2 = vpop.permute.xlu1 %763  ;;  %3500 = vmatpush3.bf16.msra.mxu1 %v4434_v19  ;;  %3523 = vmatprep.subr.bf16.mxu0 %v4443_v18 }
 0x3e0   :  { %v770_v47 = vmul.f32 %v5446_v58, %v764_v2  ;;  %3501 = vmatprep.subr.bf16.mxu1 %v4436_v25  ;;  %v5754_v2 = vpop.permute.xlu0 %3857 }
 0x3e2   :  { %4049 = vrot.lane.b32.xlu1 %v4048_v16, %s4675_s10  ;;  %3524 = vmatpush3.bf16.msra.mxu0 %v4445_v59  ;;  %v4451_v16 = vld [vmem:[%s7073_s2 + $0xf0] sm:$0xff]  }
 0x3e3   :  { %v768_v21 = vpop.permute.xlu1 %767  ;;  %3502 = vmatpush3.bf16.msra.mxu1 %v4438_v12  ;;  %3525 = vmatprep.subr.bf16.mxu0 %v4447_v8 }
 0x3e4   :  { %v771_v14 = vmul.f32 %v5449_v32, %v768_v21  ;;  %3503 = vmatprep.subr.bf16.mxu1 %v4440_v51  ;;  %v5773_v19 = vpop.permute.xlu0 %3867 }
 0x3e6   :  { %v4083_v17 = vpack.i.bf16 %v771_v14, %v770_v47  ;;  %4059 = vrot.lane.b32.xlu1 %v4058_v34, %s4689_s21  ;;  %3526 = vmatpush3.bf16.msra.mxu0 %v4449_v56  ;;  %v7353_v56 = vld [vmem:[#allocation51_spill] sm:$0xff] }
 0x3e7   :  { %3504 = vmatpush3.bf16.msra.mxu1 %v4442_v31  ;;  %3527 = vmatprep.subr.bf16.mxu0 %v4451_v16 }
 0x3e8   :  { %v1002_v7 = vpop.permute.xlu1 %1001  ;;  %4084 = vrot.lane.b32.xlu0 %v4083_v17, %s4670_s0  ;;  %3505 = vmatprep.subr.bf16.mxu1 %v4444_v28  ;;  %v5784_v21 = vpop.permute.xlu0 %3877 }
 0x3e9   :  { %v1005_v1 = vmul.f32 %v5516_v49, %v1002_v7 }
 0x3ea   :  { %4069 = vrot.lane.b32.xlu1 %v4068_v5, %s4678_s12  ;;  %3528 = vmatpush3.bf16.msra.mxu0 %v4452_v44 }
 0x3eb   :  { %v4088_v53 = vpack.i.bf16 %v1005_v1, %v1004_v57  ;;  %3506 = vmatpush3.bf16.msra.mxu1 %v4446_v15  ;;  %3529 = vmatprep.subr.bf16.mxu0 %v4453_v52  ;;  %v7352_v57 = vld [vmem:[#allocation39_spill] sm:$0xff]  ;;  %v3850_v52 = vunpack.i.h.bf16 %v5723_v63 }
 0x3ec   :  { %4094 = vrot.lane.b32.xlu0 %v4093_v26, %s4684_s16  ;;  %3507 = vmatprep.subr.bf16.mxu1 %v4448_v9  ;;  %v992_v39 = vpop.permute.xlu0 %991  ;;  %v5838_v8 = vmul.f32 %v5268_v11, %v7352_v57  ;;  %v3860_v57 = vunpack.i.h.bf16 %v5754_v2  ;;  %v3869_v11 = vunpack.i.l.bf16 %v5773_v19 }
 0x3ed   :  { %v774_v38 = vpop.permute.xlu1 %773 }
 0x3ee   :  { %4079 = vrot.lane.b32.xlu1 %v4078_v62, %s4674_s9  ;;  %v780_v33 = vmul.f32 %v5446_v58, %v774_v38  ;;  %3530 = vmatpush3.bf16.msra.mxu0 %v4454_v23  ;;  %v7351_v38 = vld [vmem:[#allocation23_spill] sm:$0xff]  ;;  %v3849_v23 = vunpack.i.l.bf16 %v5723_v63 }
 0x3ef   :  { %3508 = vmatpush3.bf16.msra.mxu1 %v4450_v41  ;;  %v151_v15 = vmul.f32 %v5305_v30, %v7351_v38  ;;  %v5854_v30 = vmul.f32 %v5446_v58, %v5639_v43  ;;  %v3870_v58 = vunpack.i.h.bf16 %v5773_v19 }
 0x3f0   :  { %v4098_v27 = vpack.i.bf16 %v781_v36, %v780_v33  ;;  %v5790_v14 = vpop.permute.xlu0 %3894  ;;  %v7354_v33 = vld [vmem:[#allocation38_spill] sm:$0xff] }
 0x3f1   :  { %v5760_v62 = vpop.permute.xlu1 %3800  ;;  %v5846_v41 = vmul.f32 %v5262_v40, %v7354_v33  ;;  %7355 = vst [vmem:[#allocation43_spill] sm:$0xff] %v5854_v30  ;;  %v3839_v40 = vunpack.i.l.bf16 %v5704_v54  ;;  %v3897_v37 = vunpack.i.h.bf16 %v5790_v14  ;;  %v3896_v42 = vunpack.i.l.bf16 %v5790_v14 }
 0x3f2   :  { %4089 = vrot.lane.b32.xlu1 %v4088_v53, %s4688_s20  ;;  %v150_v53 = vmul.f32 %v5301_v35, %v7353_v56  ;;  %v3840_v35 = vunpack.i.h.bf16 %v5704_v54  ;;  %v3859_v56 = vunpack.i.l.bf16 %v5754_v2  ;;  %v5877_v2 = vmul.f32 %v5516_v49, %v992_v39 }
 0x3f4   :  { %v5796_v60 = vpop.permute.xlu0 %3904  ;;  %7356 = vst [vmem:[#allocation31_spill] sm:$0xff] %v5877_v2 }
 0x3f5   :  { %v5771_v4 = vpop.permute.xlu1 %3805  ;;  %v3906_v19 = vunpack.i.l.bf16 %v5796_v60 }
 0x3f6   :  { %4099 = vrot.lane.b32.xlu1 %v4098_v27, %s4682_s15  ;;  %v3807_v10 = vunpack.i.l.bf16 %v5771_v4 }
 0x3f8   :  { %v5800_v22 = vpop.permute.xlu0 %3914 }
 0x3f9   :  { %v5782_v45 = vpop.permute.xlu1 %3815  ;;  %v3916_v44 = vunpack.i.l.bf16 %v5800_v22 }
 0x3fc   :  { %v5806_v17 = vpop.permute.xlu0 %3924 }
 0x3fd   :  { %v5786_v34 = vpop.permute.xlu1 %727 }
 0x400   :  { %v5810_v6 = vpop.permute.xlu0 %3934 }
 0x401   :  { %v5788_v47 = vpop.permute.xlu1 %3822  ;;  %v3937_v2 = vunpack.i.h.bf16 %v5810_v6 }
 0x402   :  { %v3824_v43 = vunpack.i.l.bf16 %v5788_v47  ;;  %v3825_v36 = vunpack.i.h.bf16 %v5788_v47 }
 0x404   :  { %v5816_v24 = vpop.permute.xlu0 %3944  ;;  %v1128_v39 = vsel %vm112_vm12, %v150_v53, %v3824_v43  ;;  %v1129_v14 = vsel %vm112_vm12, %v151_v15, %v3825_v36  ;;  %v3808_v43 = vunpack.i.h.bf16 %v5771_v4 }
 0x405   :  { %v5792_v3 = vpop.permute.xlu1 %3832  ;;  %v1131_v15 = vsel %vm1130_vm7, %v1128_v39, %v3849_v23  ;;  %v3947_v30 = vunpack.i.h.bf16 %v5816_v24 }
 0x406   :  { %v3834_v38 = vunpack.i.l.bf16 %v5792_v3  ;;  %v3835_v63 = vunpack.i.h.bf16 %v5792_v3  ;;  %v3917_v3 = vunpack.i.h.bf16 %v5800_v22  ;;  %v3802_v22 = vunpack.i.l.bf16 %v5760_v62 }
 0x408   :  { %v5820_v20 = vpop.permute.xlu0 %3954  ;;  %v1441_v54 = vsel %vm112_vm12, %v3834_v38, %v3839_v40  ;;  %v1442_v46 = vsel %vm112_vm12, %v3835_v63, %v3840_v35  ;;  %v3926_v38 = vunpack.i.l.bf16 %v5806_v17  ;;  %v3936_v35 = vunpack.i.l.bf16 %v5810_v6 }
 0x409   :  { %v5794_v25 = vpop.permute.xlu1 %3842  ;;  %v1443_v53 = vsel %vm1130_vm7, %v1441_v54, %v3859_v56  ;;  %v1132_v63 = vsel %vm1130_vm7, %v1129_v14, %v3850_v52  ;;  %v1444_v49 = vsel %vm1130_vm7, %v1442_v46, %v3860_v57  ;;  %v3803_v56 = vunpack.i.h.bf16 %v5760_v62 }
 0x40a   :  { %v1291_v4 = vsel %vm112_vm12, %v3802_v22, %v3807_v10  ;;  %v3817_v6 = vunpack.i.l.bf16 %v5782_v45  ;;  %v3946_v57 = vunpack.i.l.bf16 %v5816_v24  ;;  %v1135_v10 = vsel %vm1133_vm4, %v1132_v63, %v3870_v58 }
 0x40b   :  { %v1292_v62 = vsel %vm112_vm12, %v3803_v56, %v3808_v43  ;;  %v3956_v39 = vunpack.i.l.bf16 %v5820_v20  ;;  %v7357_v24 = vunpack.i.l.bf16 %v5668_v48  ;;  %v7358_v43 = vunpack.i.l.bf16 %v5622_v29 }
 0x40c   :  { %v5826_v1 = vpop.permute.xlu0 %3964  ;;  %v3844_v63 = vunpack.i.l.bf16 %v5794_v25 }
 0x40d   :  { %v5798_v12 = vpop.permute.xlu1 %3852  ;;  %v3967_v14 = vunpack.i.h.bf16 %v5826_v1  ;;  %v1293_v22 = vsel %vm1130_vm7, %v1291_v4, %v7357_v24  ;;  %v7361_v4 = vunpack.i.h.bf16 %v5796_v60  ;;  %v5967_v60 = vmul.f32 %v5449_v32, %v5786_v34 }
 0x410   :  { %v5830_v28 = vpop.permute.xlu0 %3974 }
 0x411   :  { %v5802_v0 = vpop.permute.xlu1 %3862 }
 0x414   :  { %v5840_v9 = vpop.permute.xlu0 %3984 }
 0x415   :  { %v5804_v13 = vpop.permute.xlu1 %3872 }
 0x416   :  { %v3874_v47 = vunpack.i.l.bf16 %v5804_v13  ;;  %v3875_v50 = vunpack.i.h.bf16 %v5804_v13 }
 0x418   :  { %v5867_v33 = vpop.permute.xlu0 %3994  ;;  %v1445_v36 = vsel %vm1133_vm4, %v1443_v53, %v3874_v47  ;;  %v1446_v23 = vsel %vm1133_vm4, %v1444_v49, %v3875_v50  ;;  %v3818_v47 = vunpack.i.h.bf16 %v5782_v45  ;;  %v3957_v49 = vunpack.i.h.bf16 %v5820_v20 }
 0x419   :  { %v5808_v61 = vpop.permute.xlu1 %987  ;;  %v1447_v52 = vsel %vm30_vm0, %v1445_v36, %v3896_v42  ;;  %v1448_v45 = vsel %vm30_vm0, %v1446_v23, %v3897_v37  ;;  %v1591_v20 = vsel %vm112_vm12, %v7358_v43, %v3817_v6  ;;  %v7359_v37 = vunpack.i.h.bf16 %v5622_v29 }
 0x41a   :  { %7350 = vst [vmem:[#allocation44_spill] sm:$0xff] %v5808_v61  ;;  %v1449_v58 = vsel %vm1138_vm11, %v1447_v52, %v3916_v44  ;;  %v3845_v44 = vunpack.i.h.bf16 %v5794_v25  ;;  %v1450_v56 = vsel %vm1138_vm11, %v1448_v45, %v3917_v3  ;;  %v3855_v23 = vunpack.i.h.bf16 %v5798_v12 }
 0x41b   :  { %v3977_v6 = vunpack.i.h.bf16 %v5830_v28  ;;  %v3976_v52 = vunpack.i.l.bf16 %v5830_v28  ;;  %v3865_v25 = vunpack.i.h.bf16 %v5802_v0  ;;  %v1593_v28 = vsel %vm1130_vm7, %v1591_v20, %v3844_v63 }
 0x41c   :  { %v5898_v55 = vpop.permute.xlu0 %4004 }
 0x41d   :  { %v5812_v5 = vpop.permute.xlu1 %3884  ;;  %v4006_v20 = vunpack.i.l.bf16 %v5898_v55 }
 0x41e   :  { %v3886_v13 = vunpack.i.l.bf16 %v5812_v5  ;;  %v3887_v61 = vunpack.i.h.bf16 %v5812_v5  ;;  %v1134_v5 = vsel %vm1133_vm4, %v1131_v15, %v3869_v11  ;;  %v3966_v11 = vunpack.i.l.bf16 %v5826_v1 }
 0x41f   :  { %v7360_v15 = vunpack.i.h.bf16 %v5668_v48  ;;  %v3854_v48 = vunpack.i.l.bf16 %v5798_v12  ;;  %v3987_v12 = vunpack.i.h.bf16 %v5840_v9 }
 0x420   :  { %v5918_v46 = vpop.permute.xlu0 %4014  ;;  %v1136_v50 = vsel %vm30_vm0, %v1134_v5, %v3886_v13  ;;  %v1137_v42 = vsel %vm30_vm0, %v1135_v10, %v3887_v61  ;;  %v1592_v61 = vsel %vm112_vm12, %v7359_v37, %v3818_v47  ;;  %v3864_v47 = vunpack.i.l.bf16 %v5802_v0 }
 0x421   :  { %v5814_v7 = vpop.permute.xlu1 %3889  ;;  %v1294_v1 = vsel %vm1130_vm7, %v1292_v62, %v7360_v15  ;;  %v1139_v36 = vsel %vm1138_vm11, %v1136_v50, %v3906_v19  ;;  %v1140_v29 = vsel %vm1138_vm11, %v1137_v42, %v7361_v4  ;;  %v1451_v19 = vsel %vm1141_vm2, %v1449_v58, %v3936_v35 }
 0x422   :  { %v1142_v3 = vsel %vm1141_vm2, %v1139_v36, %v3926_v38  ;;  %v1452_v62 = vsel %vm1141_vm2, %v1450_v56, %v3937_v2  ;;  %v7362_v35 = vunpack.i.h.bf16 %v5806_v17  ;;  %v3986_v0 = vunpack.i.l.bf16 %v5840_v9 }
 0x423   :  { %v1594_v38 = vsel %vm1130_vm7, %v1592_v61, %v3845_v44  ;;  %v1453_v45 = vsel %vm1144_vm3, %v1451_v19, %v3956_v39  ;;  %v1295_v32 = vsel %vm1133_vm4, %v1293_v22, %v3854_v48  ;;  %v1296_v34 = vsel %vm1133_vm4, %v1294_v1, %v3855_v23 }
 0x424   :  { %v5947_v13 = vpop.permute.xlu0 %4024  ;;  %v1143_v10 = vsel %vm1141_vm2, %v1140_v29, %v7362_v35  ;;  %v1595_v2 = vsel %vm1133_vm4, %v1593_v28, %v3864_v47  ;;  %v1145_v17 = vsel %vm1144_vm3, %v1142_v3, %v3946_v57  ;;  %v3997_v42 = vunpack.i.h.bf16 %v5867_v33 }
 0x425   :  { %v5818_v51 = vpop.permute.xlu1 %3899  ;;  %v1596_v24 = vsel %vm1133_vm4, %v1594_v38, %v3865_v25  ;;  %v1146_v9 = vsel %vm1144_vm3, %v1143_v10, %v3947_v30  ;;  %v1454_v43 = vsel %vm1144_vm3, %v1452_v62, %v3957_v49  ;;  %v3996_v39 = vunpack.i.l.bf16 %v5867_v33 }
 0x426   :  { %v4007_v22 = vunpack.i.h.bf16 %v5898_v55  ;;  %v1455_v57 = vsel %vm7217_vm10, %v1453_v45, %v3976_v52  ;;  %v1297_v61 = vsel %vm30_vm0, %v1295_v32, %v5846_v41  ;;  %v1298_v30 = vsel %vm30_vm0, %v1296_v34, %v5838_v8 }
 0x427   :  { %v7363_v15 = vunpack.i.l.bf16 %v5784_v21  ;;  %v1148_v33 = vsel %vm7217_vm10, %v1145_v17, %v3966_v11  ;;  %v4017_v1 = vunpack.i.h.bf16 %v5918_v46  ;;  %v7364_v55 = vunpack.i.h.bf16 %v5784_v21 }
 0x428   :  { %v1149_v44 = vsel %vm7217_vm10, %v1146_v9, %v3967_v14  ;;  %v1456_v63 = vsel %vm7217_vm10, %v1454_v43, %v3977_v6  ;;  %v4016_v41 = vunpack.i.l.bf16 %v5918_v46  ;;  %v3892_v8 = vunpack.i.h.bf16 %v5814_v7 }
 0x429   :  { %v5822_v31 = vpop.permute.xlu1 %3909  ;;  %v1597_v49 = vsel %vm30_vm0, %v1595_v2, %v7363_v15  ;;  %v1598_v36 = vsel %vm30_vm0, %v1596_v24, %v7364_v55  ;;  %v3891_v56 = vunpack.i.l.bf16 %v5814_v7  ;;  %v6016_v11 = vsel %vm7218_vm6, %v1455_v57, %v3996_v39 }
 0x42a   :  { %v3902_v29 = vunpack.i.h.bf16 %v5818_v51  ;;  %v3901_v21 = vunpack.i.l.bf16 %v5818_v51  ;;  %v3911_v23 = vunpack.i.l.bf16 %v5822_v31  ;;  %v1151_v48 = vsel %vm7218_vm6, %v1148_v33, %v3986_v0 }
 0x42b   :  { %v5974_v50 = vpop.permute.xlu0 %4034  ;;  %v3912_v47 = vunpack.i.h.bf16 %v5822_v31  ;;  %v1152_v7 = vsel %vm7218_vm6, %v1149_v44, %v3987_v12  ;;  %v6028_v6 = vsel %vm7218_vm6, %v1456_v63, %v3997_v42  ;;  %v4027_v52 = vunpack.i.h.bf16 %v5947_v13 }
 0x42c   :  { %v4026_v25 = vunpack.i.l.bf16 %v5947_v13  ;;  %v1299_v62 = vsel %vm1138_vm11, %v1297_v61, %v3891_v56  ;;  %v1300_v35 = vsel %vm1138_vm11, %v1298_v30, %v3892_v8  ;;  %v6038_v10 = vsel %vm1153_vm9, %v1151_v48, %v4006_v20 }
 0x42d   :  { %v5824_v26 = vpop.permute.xlu1 %3919  ;;  %v1599_v0 = vsel %vm1138_vm11, %v1597_v49, %v3901_v21  ;;  %v1600_v28 = vsel %vm1138_vm11, %v1598_v36, %v3902_v29  ;;  %v1301_v38 = vsel %vm1141_vm2, %v1299_v62, %v3911_v23  ;;  %v1155_v45 = vsel %vm1153_vm9, %v1152_v7, %v4007_v22 }
 0x42e   :  { %v3921_v19 = vunpack.i.l.bf16 %v5824_v26  ;;  %v3922_v51 = vunpack.i.h.bf16 %v5824_v26  ;;  %v1302_v32 = vsel %vm1141_vm2, %v1300_v35, %v3912_v47 }
 0x430   :  { %v1601_v34 = vsel %vm1141_vm2, %v1599_v0, %v3921_v19  ;;  %v1602_v17 = vsel %vm1141_vm2, %v1600_v28, %v3922_v51  ;;  %v4037_v0 = vunpack.i.h.bf16 %v5974_v50  ;;  %v4036_v28 = vunpack.i.l.bf16 %v5974_v50 }
 0x431   :  { %v5828_v18 = vpop.permute.xlu1 %3929 }
 0x432   :  { %v3931_v3 = vunpack.i.l.bf16 %v5828_v18  ;;  %v3932_v31 = vunpack.i.h.bf16 %v5828_v18 }
 0x434   :  { %v5993_v37 = vpop.permute.xlu0 %4044  ;;  %v1303_v42 = vsel %vm1144_vm3, %v1301_v38, %v3931_v3  ;;  %v1304_v43 = vsel %vm1144_vm3, %v1302_v32, %v3932_v31 }
 0x435   :  { %v5832_v59 = vpop.permute.xlu1 %3939  ;;  %v4047_v38 = vunpack.i.h.bf16 %v5993_v37 }
 0x436   :  { %v3942_v18 = vunpack.i.h.bf16 %v5832_v59  ;;  %v3941_v2 = vunpack.i.l.bf16 %v5832_v59 }
 0x438   :  { %v1604_v49 = vsel %vm1144_vm3, %v1602_v17, %v3942_v18 }
 0x439   :  { %v5850_v27 = vpop.permute.xlu1 %3949 }
 0x43a   :  { %v3952_v24 = vunpack.i.h.bf16 %v5850_v27  ;;  %v3951_v9 = vunpack.i.l.bf16 %v5850_v27  ;;  %v1603_v27 = vsel %vm1144_vm3, %v1601_v34, %v3941_v2 }
 0x43c   :  { %v1305_v55 = vsel %vm7217_vm10, %v1303_v42, %v3951_v9  ;;  %v1306_v36 = vsel %vm7217_vm10, %v1304_v43, %v3952_v24  ;;  %v4046_v42 = vunpack.i.l.bf16 %v5993_v37 }
 0x43d   :  { %v5873_v16 = vpop.permute.xlu1 %3959 }
 0x43e   :  { %v6021_v14 = vpop.permute.xlu0 %4054  ;;  %v3962_v39 = vunpack.i.h.bf16 %v5873_v16  ;;  %v3961_v22 = vunpack.i.l.bf16 %v5873_v16 }
 0x43f   :  { %v4057_v43 = vunpack.i.h.bf16 %v6021_v14 }
 0x440   :  { %v1605_v63 = vsel %vm7217_vm10, %v1603_v27, %v3961_v22  ;;  %v1606_v8 = vsel %vm7217_vm10, %v1604_v49, %v3962_v39  ;;  %vm7220_vm10 = vcmask 916480  }
 0x441   :  { %v5893_v40 = vpop.permute.xlu1 %3969 }
 0x442   :  { %v3971_v20 = vunpack.i.l.bf16 %v5893_v40  ;;  %v3972_v59 = vunpack.i.h.bf16 %v5893_v40 }
 0x444   :  { %v1307_v56 = vsel %vm7218_vm6, %v1305_v55, %v3971_v20 }
 0x445   :  { %v5913_v54 = vpop.permute.xlu1 %3979 }
 0x446   :  { %v3982_v61 = vunpack.i.h.bf16 %v5913_v54  ;;  %v3981_v30 = vunpack.i.l.bf16 %v5913_v54 }
 0x447   :  { %v6045_v26 = vpop.permute.xlu0 %4064 }
 0x448   :  { %v1607_v23 = vsel %vm7218_vm6, %v1605_v63, %v3981_v30  ;;  %v4067_v13 = vunpack.i.h.bf16 %v6045_v26  ;;  %v7365_v30 = vld [vmem:[#allocation43_spill] sm:$0xff] }
 0x449   :  { %v5935_v53 = vpop.permute.xlu1 %3989 }
 0x44a   :  { %v3991_v15 = vunpack.i.l.bf16 %v5935_v53  ;;  %v3992_v40 = vunpack.i.h.bf16 %v5935_v53  ;;  %v1608_v53 = vsel %vm7218_vm6, %v1606_v8, %v3982_v61 }
 0x44b   :  { %v4075_v44 = vpop.permute.xlu0 %4074 }
 0x44c   :  { %v1309_v48 = vsel %vm1153_vm9, %v1307_v56, %v3991_v15  ;;  %v4077_v20 = vunpack.i.h.bf16 %v4075_v44  ;;  %v1459_v15 = vsel %vm1153_vm9, %v6016_v11, %v7365_v30  ;;  %v7370_v30 = vld [vmem:[#allocation18_spill] sm:$0xff] }
 0x44d   :  { %v5963_v5 = vpop.permute.xlu1 %3999 }
 0x44e   :  { %v4002_v33 = vunpack.i.h.bf16 %v5963_v5  ;;  %v4001_v16 = vunpack.i.l.bf16 %v5963_v5  ;;  %v1308_v5 = vsel %vm7218_vm6, %v1306_v36, %v3972_v59  ;;  %vm7219_vm6 = vcmask 982016  }
 0x450   :  { %v1609_v47 = vsel %vm1153_vm9, %v1607_v23, %v4001_v16  ;;  %v1610_v19 = vsel %vm1153_vm9, %v1608_v53, %v4002_v33 }
 0x451   :  { %v5987_v58 = vpop.permute.xlu1 %4009  ;;  %v1612_v18 = vsel %vm1156_vm1, %v1610_v19, %v4017_v1 }
 0x452   :  { %v4011_v54 = vunpack.i.l.bf16 %v5987_v58  ;;  %v4012_v29 = vunpack.i.h.bf16 %v5987_v58  ;;  %v1310_v58 = vsel %vm1153_vm9, %v1308_v5, %v3992_v40  ;;  %v1614_v22 = vsel %vm1159_vm14, %v1612_v18, %v4037_v0  ;;  %v7368_v18 = vld [vmem:[#allocation31_spill] sm:$0xff] }
 0x453   :  { %v1616_v16 = vsel %vm7222_vm15, %v1614_v22, %v4057_v43 }
 0x454   :  { %v1311_v3 = vsel %vm1156_vm1, %v1309_v48, %v4011_v54  ;;  %v1312_v32 = vsel %vm1156_vm1, %v1310_v58, %v4012_v29  ;;  %v1460_v58 = vsel %vm1153_vm9, %v6028_v6, %v5967_v60 }
 0x455   :  { %v6013_v4 = vpop.permute.xlu1 %4019  ;;  %v1313_v9 = vsel %vm1159_vm14, %v1311_v3, %v4026_v25  ;;  %v1314_v1 = vsel %vm1159_vm14, %v1312_v32, %v4027_v52  ;;  %v4056_v25 = vunpack.i.l.bf16 %v6021_v14  ;;  %v4066_v52 = vunpack.i.l.bf16 %v6045_v26 }
 0x456   :  { %v4022_v7 = vunpack.i.h.bf16 %v6013_v4  ;;  %v4021_v51 = vunpack.i.l.bf16 %v6013_v4  ;;  %v1611_v4 = vsel %vm1156_vm1, %v1609_v47, %v4016_v41  ;;  %v1315_v61 = vsel %vm7222_vm15, %v1313_v9, %v4046_v42 }
 0x457   :  { %v1316_v27 = vsel %vm7222_vm15, %v1314_v1, %v4047_v38  ;;  %v1317_v26 = vsel %vm7220_vm10, %v1315_v61, %v4066_v52  ;;  %v7369_v52 = vld [vmem:[#allocation16_spill] sm:$0xff] }
 0x458   :  { %v1157_v50 = vsel %vm1156_vm1, %v6038_v10, %v4021_v51  ;;  %v1158_v24 = vsel %vm1156_vm1, %v1155_v45, %v4022_v7  ;;  %v1613_v45 = vsel %vm1159_vm14, %v1611_v4, %v4036_v28  ;;  %v1318_v8 = vsel %vm7220_vm10, %v1316_v27, %v4067_v13  ;;  %v7366_v7 = vld [vmem:[#allocation44_spill] sm:$0xff] }
 0x459   :  { %v6040_v12 = vpop.permute.xlu1 %4029  ;;  %v1615_v14 = vsel %vm7222_vm15, %v1613_v45, %v4056_v25 }
 0x45a   :  { %v6088_v62 = vpop.permute.xlu0 %4084  ;;  %v4031_v55 = vunpack.i.l.bf16 %v6040_v12  ;;  %v4032_v54 = vunpack.i.h.bf16 %v6040_v12  ;;  %v7367_v12 = vld [vmem:[#allocation40_spill] sm:$0xff] }
 0x45b   :  { %v994_v51 = vmul.f32 %v7367_v12, %v7366_v7 }
 0x45c   :  { %v1461_v3 = vsel %vm1156_vm1, %v1459_v15, %v4031_v55  ;;  %v334_v15 = vadd.f32 %v7370_v30, %v7369_v52  ;;  %v7397_v30 = vld [vmem:[#allocation54_spill] sm:$0xff] }
 0x45d   :  { %v4040_v57 = vpop.permute.xlu1 %4039  ;;  %v1617_v4 = vsel %vm7220_vm10, %v1615_v14, %v994_v51  ;;  %v7371_v14 = vld [vmem:[#allocation15_spill] sm:$0xff]  ;;  %v7379_v51 = vld [vmem:[#allocation5_spill] sm:$0xff] }
 0x45e   :  { %v4042_v35 = vunpack.i.h.bf16 %v4040_v57  ;;  %v4041_v31 = vunpack.i.l.bf16 %v4040_v57  ;;  %v4076_v57 = vunpack.i.l.bf16 %v4075_v44  ;;  %v4095_v59 = vpop.permute.xlu0 %4094 }
 0x45f   :  { %v4097_v36 = vunpack.i.h.bf16 %v4095_v59  ;;  %v4096_v40 = vunpack.i.l.bf16 %v4095_v59 }
 0x460   :  { %v1160_v41 = vsel %vm1159_vm14, %v1157_v50, %v4041_v31  ;;  %v1161_v46 = vsel %vm1159_vm14, %v1158_v24, %v4042_v35  ;;  %v1462_v31 = vsel %vm1156_vm1, %v1460_v58, %v4032_v54  ;;  %v4087_v50 = vunpack.i.h.bf16 %v6088_v62  ;;  %v7374_v54 = vld [vmem:[#allocation24_spill] sm:$0xff]  ;;  %v7380_v58 = vld [vmem:[#allocation7_spill] sm:$0xff] }
 0x461   :  { %v6076_v21 = vpop.permute.xlu1 %4049  ;;  %v4086_v24 = vunpack.i.l.bf16 %v6088_v62 }
 0x462   :  { %v4052_v56 = vunpack.i.h.bf16 %v6076_v21  ;;  %v4051_v29 = vunpack.i.l.bf16 %v6076_v21 }
 0x464   :  { %v1463_v32 = vsel %vm1159_vm14, %v1461_v3, %v4051_v29  ;;  %v7376_v29 = vld [vmem:[#allocation19_spill] sm:$0xff]  ;;  %v335_v3 = vadd.f32 %v7380_v58, %v7379_v51 }
 0x465   :  { %v4060_v34 = vpop.permute.xlu1 %4059 }
 0x466   :  { %v4062_v2 = vunpack.i.h.bf16 %v4060_v34  ;;  %v4061_v17 = vunpack.i.l.bf16 %v4060_v34  ;;  %v1464_v34 = vsel %vm1159_vm14, %v1462_v31, %v4052_v56  ;;  %v7375_v56 = vld [vmem:[#allocation17_spill] sm:$0xff] }
 0x468   :  { %v1163_v37 = vsel %vm7222_vm15, %v1160_v41, %v4061_v17  ;;  %v1164_v10 = vsel %vm7222_vm15, %v1161_v46, %v4062_v2  ;;  %v1618_v2 = vsel %vm7220_vm10, %v1616_v16, %v7368_v18  ;;  %v7372_v16 = vld [vmem:[#allocation14_spill] sm:$0xff]  ;;  %v7387_v18 = vld [vmem:[#allocation13_spill] sm:$0xff] }
 0x469   :  { %v4070_v39 = vpop.permute.xlu1 %4069  ;;  %v1166_v49 = vsel %vm7220_vm10, %v1163_v37, %v4076_v57  ;;  %v1167_v33 = vsel %vm7220_vm10, %v1164_v10, %v4077_v20  ;;  %v222_v55 = vadd.f32 %v7372_v16, %v7371_v14 }
 0x46a   :  { %v1169_v5 = vsel %vm7219_vm6, %v1166_v49, %v4096_v40  ;;  %v1170_v23 = vsel %vm7219_vm6, %v1167_v33, %v4097_v36  ;;  %v4072_v53 = vunpack.i.h.bf16 %v4070_v39  ;;  %v4071_v48 = vunpack.i.l.bf16 %v4070_v39 }
 0x46b   :  { %v1621_v38 = vpack.c.bf16 %v1170_v23, %v1169_v5  ;;  %v446_v5 = vadd.f32 %v7376_v29, %v7375_v56  ;;  %v7377_v23 = vld [vmem:[#allocation56_spill] sm:$0xff] }
 0x46c   :  { %v1465_v60 = vsel %vm7222_vm15, %v1463_v32, %v4071_v48  ;;  %v1466_v6 = vsel %vm7222_vm15, %v1464_v34, %v4072_v53  ;;  %v7378_v53 = vld [vmem:[#allocation21_spill] sm:$0xff]  ;;  %v7385_v32 = vld [vmem:[#allocation3_spill] sm:$0xff]  ;;  %v7386_v34 = vld [vmem:[#allocation2_spill] sm:$0xff]  ;;  %vm7410_vm15 = vcmask 390464  }
 0x46d   :  { %v4080_v44 = vpop.permute.xlu1 %4079  ;;  %v1467_v1 = vsel %vm7220_vm10, %v1465_v60, %v4086_v24  ;;  %v1468_v37 = vsel %vm7220_vm10, %v1466_v6, %v4087_v50  ;;  %v670_v48 = vadd.f32 %v7378_v53, %v7377_v23  ;;  %v7391_v24 = vld [vmem:[#allocation57_spill] sm:$0xff]  ;;  %vm7404_vm10 = vcmask 521664  }
 0x46e   :  { %v4082_v11 = vunpack.i.h.bf16 %v4080_v44  ;;  %v4081_v63 = vunpack.i.l.bf16 %v4080_v44  ;;  %v1963_v44 = vsel %vm112_vm12, %v222_v55, %v334_v15  ;;  %v7398_v15 = vld [vmem:[#allocation6_spill] sm:$0xff] }
 0x470   :  { %v1319_v47 = vsel %vm7219_vm6, %v1317_v26, %v4081_v63  ;;  %v1320_v19 = vsel %vm7219_vm6, %v1318_v8, %v4082_v11  ;;  %v7373_v26 = vld [vmem:[#allocation22_spill] sm:$0xff] }
 0x471   :  { %v4090_v21 = vpop.permute.xlu1 %4089  ;;  %v1622_v35 = vpack.c.bf16 %v1320_v19, %v1319_v47  ;;  %v558_v11 = vadd.f32 %v7374_v54, %v7373_v26  ;;  %v1965_v19 = vsel %vm1130_vm7, %v1963_v44, %v446_v5 }
 0x472   :  { %v4092_v0 = vunpack.i.h.bf16 %v4090_v21  ;;  %v4091_v28 = vunpack.i.l.bf16 %v4090_v21  ;;  %v7381_v21 = vld [vmem:[#allocation60_spill] sm:$0xff] }
 0x473   :  { %1913 = vmatprep.mubr.bf16.mxu1 %v1622_v35  ;;  %v1967_v7 = vsel %vm1133_vm4, %v1965_v19, %v558_v11  ;;  %v7382_v35 = vld [vmem:[#allocation26_spill] sm:$0xff] }
 0x474   :  { %1914 = vmatmul.mubr.bf16.vlgmr.msra.gmra.mrb[0].mxu1 %v1621_v38  ;;  %v1619_v17 = vsel %vm7219_vm6, %v1617_v4, %v4091_v28  ;;  %v1620_v42 = vsel %vm7219_vm6, %v1618_v2, %v4092_v0  ;;  %v1969_v12 = vsel %vm30_vm0, %v1967_v7, %v670_v48  ;;  %v782_v31 = vadd.f32 %v7382_v35, %v7381_v21  ;;  %v7383_v0 = vld [vmem:[#allocation4_spill] sm:$0xff]  ;;  %v7384_v28 = vld [vmem:[#allocation9_spill] sm:$0xff]  ;;  %v7388_v2 = vld [vmem:[#allocation10_spill] sm:$0xff] }
 0x475   :  { %v4100_v9 = vpop.permute.xlu1 %4099  ;;  %v1624_v43 = vpack.c.bf16 %v1620_v42, %v1619_v17  ;;  %v447_v38 = vadd.f32 %v7384_v28, %v7383_v0  ;;  %v223_v4 = vadd.f32 %v7386_v34, %v7385_v32  ;;  %v559_v60 = vadd.f32 %v7388_v2, %v7387_v18  ;;  %v7389_v17 = vld [vmem:[#allocation55_spill] sm:$0xff]  ;;  %v7390_v42 = vld [vmem:[#allocation20_spill] sm:$0xff] }
 0x476   :  { %v4102_v41 = vunpack.i.h.bf16 %v4100_v9  ;;  %v4101_v46 = vunpack.i.l.bf16 %v4100_v9  ;;  %v1971_v6 = vsel %vm1138_vm11, %v1969_v12, %v782_v31  ;;  %v894_v50 = vadd.f32 %v7390_v42, %v7389_v17  ;;  %v7392_v9 = vld [vmem:[#allocation8_spill] sm:$0xff] }
 0x477   :  { %1954 = vmatprep.mubr.bf16.mxu0 %v1624_v43  ;;  %v671_v43 = vadd.f32 %v7392_v9, %v7391_v24  ;;  %v7415_v24 = vmov 14   ;;  %v7416_v9 = vmov 9  }
 0x478   :  { %v1469_v10 = vsel %vm7219_vm6, %v1467_v1, %v4101_v46  ;;  %v1470_v39 = vsel %vm7219_vm6, %v1468_v37, %v4102_v41  ;;  %v1964_v41 = vsel %vm112_vm12, %v223_v4, %v335_v3  ;;  %v7393_v46 = vld [vmem:[#allocation61_spill] sm:$0xff]  ;;  %v7394_v1 = vld [vmem:[#allocation12_spill] sm:$0xff]  ;;  %vm7401_vm6 = vcmask 130112  }
 0x479   :  { %v1623_v45 = vpack.c.bf16 %v1470_v39, %v1469_v10  ;;  %v783_v37 = vadd.f32 %v7394_v1, %v7393_v46  ;;  %v1966_v10 = vsel %vm1130_vm7, %v1964_v41, %v447_v38  ;;  %v1973_v39 = vsel %vm1141_vm2, %v1971_v6, %v894_v50 }
 0x47a   :  { %v7414_v6 = vmov 41   ;;  %v7417_v46 = vmov 56   ;;  %v7418_v1 = vmov 42  }
 0x47b   :  { %1955 = vmatmul.mubr.bf16.vlgmr.msra.gmra.mrb[4].mxu0 %v1623_v45 }
 0x547   :  { %v3509_v22 = vpop.f32.mrb[0].mxu1 }
 0x548   :  { %v3510_v25 = vpop.f32.mrb[1].mxu1 }
 0x549   :  { %v3511_v20 = vadd.f32 %v3510_v25, %v3509_v22  ;;  %v3512_v57 = vpop.f32.mrb[2].mxu1  ;;  %v1968_v22 = vsel %vm1133_vm4, %v1966_v10, %v559_v60  ;;  %v7395_v25 = vld [vmem:[#allocation58_spill] sm:$0xff]  ;;  %v7413_v60 = vmov 45  }
 0x54a   :  { %v3513_v62 = vpop.f32.mrb[3].mxu1 }
 0x54b   :  { %v3514_v59 = vadd.f32 %v3513_v62, %v3512_v57  ;;  %v1970_v62 = vsel %vm30_vm0, %v1968_v22, %v671_v43 }
 0x54c   :  { %v1972_v52 = vsel %vm1138_vm11, %v1970_v62, %v783_v37 }
 0x54e   :  { %v3531_v61 = vpop.f32.mrb[4].mxu0 }
 0x54f   :  { %v3532_v13 = vpop.f32.mrb[5].mxu0 }
 0x550   :  { %v3533_v27 = vadd.f32 %v3532_v13, %v3531_v61  ;;  %v3534_v49 = vpop.f32.mrb[6].mxu0 }
 0x551   :  { %v3535_v33 = vpop.f32.mrb[7].mxu0 }
 0x552   :  { %v1957_v36 = vadd.f32 %v3533_v27, %v3511_v20  ;;  %v3536_v40 = vadd.f32 %v3535_v33, %v3534_v49  ;;  %v7396_v20 = vld [vmem:[#allocation25_spill] sm:$0xff]  ;;  %v895_v27 = vadd.f32 %v7398_v15, %v7397_v30  ;;  %v7425_v30 = vmov 62  }
 0x553   :  { %v1006_v57 = vadd.f32 %v7396_v20, %v7395_v25  ;;  %v7421_v25 = vmov 59   ;;  %v7422_v20 = vmov 11   ;;  %v7426_v15 = vmov 13  }
 0x554   :  { %v1977_v63 = vmax.f32 %v1957_v36, 1e-38  ;;  %v1960_v8 = vadd.f32 %v3536_v40, %v3514_v59  ;;  %v1974_v33 = vsel %vm1141_vm2, %v1972_v52, %v895_v27  ;;  %v7399_v36 = vld [vmem:[#allocation59_spill] sm:$0xff] }
 0x555   :  { %v1975_v13 = vsel %vm1144_vm3, %v1973_v39, %v1006_v57  ;;  %v7400_v40 = vld [vmem:[#allocation11_spill] sm:$0xff]  ;;  %v7419_v39 = vmov 25  }
 0x556   :  { %4543 = vlog2.f32 %v1977_v63  ;;  %v1978_v47 = vmax.f32 %v1960_v8, 1e-38  ;;  %v1007_v44 = vadd.f32 %v7400_v40, %v7399_v36  ;;  %v7429_v40 = vmov 40  }
 0x558   :  { %4545 = vlog2.f32 %v1978_v47  ;;  %v1976_v26 = vsel %vm1144_vm3, %v1974_v33, %v1007_v44  ;;  %v7430_v44 = vmov 47  }
 0x560   :  { %v4544_v45 = vpop.eup %4543 }
 0x561   :  { %v1980_v59 = vmul.f32 0.6931472, %v4544_v45  ;;  %v7420_v45 = vmov 10  }
 0x562   :  { %v4546_v61 = vpop.eup %4545 }
 0x563   :  { %v6203_v49 = vadd.f32 %v1980_v59, %v1975_v13  ;;  %v1982_v14 = vmul.f32 0.6931472, %v4546_v61  ;;  %v7423_v59 = vmov 28   ;;  %v7424_v61 = vmov 12  }
 0x565   :  { %v2315_v16 = vsel %vm456_vm8, %v6203_v49, -inf  ;;  %v2207_v55 = vsel %vm344_vm5, %v6203_v49, -inf  ;;  %v6213_v54 = vadd.f32 %v1982_v14, %v1976_v26  ;;  %v2099_v11 = vsel %vm7221_vm13, %v6203_v49, -inf }
 0x566   :  { %2316 = vmax.xlane.f32.xlu1 %v2315_v16  ;;  %2208 = vmax.xlane.f32.xlu0 %v2207_v55  ;;  %v1991_v63 = vsel %vm7401_vm6, %v6203_v49, -inf  ;;  %vm7402_vm8 = vcmask 326912   ;;  %vm7403_vm5 = vcmask 128064   ;;  %v1985_v5 = vsel %vm112_vm12, %v6203_v49, -inf }
 0x567   :  { %v2201_v8 = vsel %vm7402_vm8, %v6203_v49, -inf  ;;  %v1994_v56 = vsel %vm7403_vm5, %v6213_v54, -inf  ;;  %v2318_v29 = vsel %vm7404_vm10, %v6213_v54, -inf  ;;  %vm7405_vm6 = vcmask 259264  }
 0x568   :  { %v2102_v23 = vsel %vm7405_vm6, %v6213_v54, -inf  ;;  %vm7406_vm13 = vcmask 458112   ;;  %vm7407_vm8 = vcmask 324864   ;;  %vm7408_vm5 = vcmask 195712  }
 0x569   :  { %v2309_v53 = vsel %vm7406_vm13, %v6203_v49, -inf  ;;  %v2204_v48 = vsel %vm7407_vm8, %v6213_v54, -inf  ;;  %v2093_v47 = vsel %vm7408_vm5, %v6203_v49, -inf  ;;  %vm7409_vm10 = vcmask 62464  }
 0x56a   :  { %2100 = vmax.xlane.f32.xlu1 %v2099_v11  ;;  %1992 = vmax.xlane.f32.xlu0 %v1991_v63  ;;  %v1988_v19 = vsel %vm7409_vm10, %v6213_v54, -inf  ;;  %v2210_v7 = vsel %vm7410_vm15, %v6213_v54, -inf  ;;  %vm7411_vm13 = vcmask 456064   ;;  %vm7412_vm6 = vcmask 193664  }
 0x56b   :  { %v2312_v12 = vsel %vm7411_vm13, %v6213_v54, -inf  ;;  %v2096_v51 = vsel %vm7412_vm6, %v6213_v54, -inf  ;;  %v7427_v14 = vmov 31   ;;  %v7428_v16 = vmov 46  }
 0x56c   :  { %v7431_v63 = vmov 15   ;;  %vm7445_vm15 = vcmask 523264   ;;  %vm7449_vm13 = vcmask 588800  }
 0x56d   :  { %vm7446_vm8 = vmmov %vm7445_vm15 }
 0x56e   :  { %2202 = vmax.xlane.f32.xlu1 %v2201_v8  ;;  %1995 = vmax.xlane.f32.xlu0 %v1994_v56  ;;  %vm7447_vm5 = vmmov %vm7446_vm8 }
 0x56f   :  { %vm7448_vm10 = vmmov %vm7447_vm5 }
 0x570   :  { %vm7450_vm6 = vmmov %vm7449_vm13 }
 0x572   :  { %2319 = vmax.xlane.f32.xlu0 %v2318_v29  ;;  %1986 = vmax.xlane.f32.xlu1 %v1985_v5  ;;  %v7432_v29 = vmov 24  }
 0x576   :  { %2103 = vmax.xlane.f32.xlu0 %v2102_v23  ;;  %2310 = vmax.xlane.f32.xlu1 %v2309_v53  ;;  %v7433_v23 = vmov 57  }
 0x57a   :  { %2205 = vmax.xlane.f32.xlu0 %v2204_v48  ;;  %2094 = vmax.xlane.f32.xlu1 %v2093_v47  ;;  %v7434_v48 = vmov 58  }
 0x57e   :  { %1989 = vmax.xlane.f32.xlu0 %v1988_v19  ;;  %2211 = vmax.xlane.f32.xlu1 %v2210_v7  ;;  %v7435_v19 = vmov 26   ;;  %v7436_v7 = vmov 27  }
 0x582   :  { %2313 = vmax.xlane.f32.xlu0 %v2312_v12  ;;  %v7437_v12 = vmov 60  }
 0x586   :  { %2097 = vmax.xlane.f32.xlu0 %v2096_v51  ;;  %v7438_v51 = vmov 61  }
 0x5f3   :  { %v6243_v58 = vpop.xlane.xlu0 %2208  ;;  %v6247_v35 = vpop.xlane.xlu1 %2316 }
 0x5f4   :  { %v2219_v3 = vsub.f32 %v6203_v49, %v6243_v58  ;;  %v2327_v32 = vsub.f32 %v6203_v49, %v6247_v35 }
 0x5f6   :  { %v2221_v21 = vmul.f32 1.442695, %v2219_v3  ;;  %v2329_v18 = vmul.f32 1.442695, %v2327_v32  ;;  %v7439_v3 = vmov 30  }
 0x5f7   :  { %v6249_v31 = vpop.xlane.xlu0 %1992  ;;  %v6253_v28 = vpop.xlane.xlu1 %2100 }
 0x5f8   :  { %4547 = vpow2.f32 %v2221_v21  ;;  %v2003_v0 = vsub.f32 %v6203_v49, %v6249_v31  ;;  %v2111_v2 = vsub.f32 %v6203_v49, %v6253_v28  ;;  %v7440_v21 = vmov 29  }
 0x5fa   :  { %v2005_v38 = vmul.f32 1.442695, %v2003_v0  ;;  %v2113_v17 = vmul.f32 1.442695, %v2111_v2  ;;  %v7441_v0 = vmov 8  }
 0x5fb   :  { %v6259_v4 = vpop.xlane.xlu1 %2202  ;;  %v6301_v62 = vpop.xlane.xlu0 %1995 }
 0x5fc   :  { %4549 = vpow2.f32 %v2005_v38  ;;  %v2004_v52 = vsub.f32 %v6213_v54, %v6301_v62  ;;  %v7442_v38 = vmov 63  }
 0x5fd   :  { %4551 = vpow2.f32 %v2329_v18 }
 0x5fe   :  { %4553 = vpow2.f32 %v2113_v17  ;;  %v2007_v27 = vmul.f32 1.442695, %v2004_v52 }
 0x5ff   :  { %v6267_v42 = vpop.xlane.xlu1 %1986  ;;  %v6313_v33 = vpop.xlane.xlu0 %2319 }
 0x600   :  { %v2328_v56 = vsub.f32 %v6213_v54, %v6313_v33 }
 0x602   :  { %v6257_v34 = vpop.eup %4547  ;;  %v2331_v5 = vmul.f32 1.442695, %v2328_v56 }
 0x603   :  { %2258 = vperm.xlu0 %4108, %v6257_v34   ;;  %2227 = vperm.xlu1 %4103, %v6257_v34   ;;  %v6277_v43 = vpop.xlane.xlu1 %2310  ;;  %v6319_v55 = vpop.xlane.xlu0 %2103 }
 0x604   :  { %v2112_v26 = vsub.f32 %v6213_v54, %v6319_v55 }
 0x606   :  { %v6271_v50 = vpop.eup %4549  ;;  %v2115_v8 = vmul.f32 1.442695, %v2112_v26 }
 0x607   :  { %4111 = vset.pattern.permute.xlu0 %v7413_v60  ;;  %4104 = vset.pattern.permute.xlu1 %v7414_v6  ;;  %v6279_v41 = vpop.eup %4551  ;;  %v6285_v37 = vpop.xlane.xlu1 %2094 }
 0x608   :  { %2278 = vperm.xlu0 %4111, %v6257_v34   ;;  %2238 = vperm.xlu1 %4104, %v6257_v34   ;;  %v6287_v10 = vpop.eup %4553  ;;  %v6379_v32 = vpop.xlane.xlu0 %2205 }
 0x60b   :  { %v6293_v22 = vpop.xlane.xlu1 %2211 }
 0x60c   :  { %4114 = vset.pattern.permute.xlu0 %v7415_v24  ;;  %4105 = vset.pattern.permute.xlu1 %v7416_v9  ;;  %v2220_v57 = vsub.f32 %v6213_v54, %v6293_v22  ;;  %v6384_v18 = vpop.xlane.xlu0 %1989 }
 0x60d   :  { %2072 = vperm.xlu0 %4114, %v6271_v50   ;;  %2022 = vperm.xlu1 %4105, %v6271_v50  }
 0x60e   :  { %v2223_v13 = vmul.f32 1.442695, %v2220_v57 }
 0x610   :  { %4555 = vpow2.f32 %v2223_v13  ;;  %v6388_v2 = vpop.xlane.xlu0 %2313 }
 0x611   :  { %4117 = vset.pattern.permute.xlu0 %v7417_v46  ;;  %4106 = vset.pattern.permute.xlu1 %v7418_v1  ;;  %4557 = vpow2.f32 %v2007_v27 }
 0x612   :  { %2335 = vperm.xlu0 %4117, %v6279_v41   ;;  %2248 = vperm.xlu1 %4106, %v6257_v34   ;;  %4559 = vpow2.f32 %v2115_v8  ;;  %v2213_v8 = vsub.f32 %v6203_v49, %v6259_v4 }
 0x613   :  { %4561 = vpow2.f32 %v2331_v5 }
 0x614   :  { %v6392_v17 = vpop.xlane.xlu0 %2097  ;;  %v2215_v56 = vmul.f32 1.442695, %v2213_v8 }
 0x616   :  { %4120 = vset.pattern.permute.xlu0 %v7419_v39  ;;  %4107 = vset.pattern.permute.xlu1 %v7420_v45  ;;  %4563 = vpow2.f32 %v2215_v56 }
 0x617   :  { %2130 = vperm.xlu0 %4120, %v6287_v10   ;;  %2032 = vperm.xlu1 %4107, %v6271_v50  }
 0x61a   :  { %v6321_v36 = vpop.eup %4555 }
 0x61b   :  { %4123 = vset.pattern.permute.xlu0 %v7421_v25  ;;  %4109 = vset.pattern.permute.xlu1 %v7422_v20  ;;  %v6329_v11 = vpop.eup %4557 }
 0x61c   :  { %2366 = vperm.xlu0 %4123, %v6279_v41   ;;  %2042 = vperm.xlu1 %4109, %v6271_v50   ;;  %v6345_v53 = vpop.eup %4559 }
 0x61d   :  { %v6351_v47 = vpop.eup %4561 }
 0x620   :  { %4126 = vset.pattern.permute.xlu0 %v7423_v59  ;;  %4110 = vset.pattern.permute.xlu1 %v7424_v61 }
 0x621   :  { %2160 = vperm.xlu0 %4126, %v6287_v10   ;;  %2052 = vperm.xlu1 %4110, %v6271_v50  }
 0x625   :  { %4129 = vset.pattern.permute.xlu0 %v7425_v30  ;;  %4112 = vset.pattern.permute.xlu1 %v7426_v15 }
 0x626   :  { %2396 = vperm.xlu0 %4129, %v6279_v41   ;;  %2062 = vperm.xlu1 %4112, %v6271_v50  }
 0x62a   :  { %4132 = vset.pattern.permute.xlu0 %v7427_v14  ;;  %4113 = vset.pattern.permute.xlu1 %v7428_v16 }
 0x62b   :  { %2190 = vperm.xlu0 %4132, %v6287_v10   ;;  %2288 = vperm.xlu1 %4113, %v6257_v34  }
 0x62f   :  { %4134 = vset.pattern.permute.xlu0 %v7429_v40  ;;  %4115 = vset.pattern.permute.xlu1 %v7430_v44 }
 0x630   :  { %2298 = vperm.xlu1 %4115, %v6257_v34   ;;  %2232 = vperm.xlu0 %4134, %v6321_v36  }
 0x634   :  { %4116 = vset.pattern.permute.xlu1 %v7431_v63  ;;  %4140 = vset.pattern.permute.xlu0 %v7422_v20 }
 0x635   :  { %2082 = vperm.xlu1 %4116, %v6271_v50   ;;  %2046 = vperm.xlu0 %4140, %v6329_v11  }
 0x639   :  { %4118 = vset.pattern.permute.xlu1 %v7432_v29  ;;  %4143 = vset.pattern.permute.xlu0 %v7426_v15 }
 0x63a   :  { %2119 = vperm.xlu1 %4118, %v6287_v10   ;;  %2066 = vperm.xlu0 %4143, %v6329_v11  }
 0x63e   :  { %4119 = vset.pattern.permute.xlu1 %v7433_v23  ;;  %4146 = vset.pattern.permute.xlu0 %v7430_v44 }
 0x63f   :  { %2346 = vperm.xlu1 %4119, %v6279_v41   ;;  %2302 = vperm.xlu0 %4146, %v6321_v36  }
 0x643   :  { %4121 = vset.pattern.permute.xlu1 %v7434_v48  ;;  %4149 = vset.pattern.permute.xlu0 %v7432_v29 }
 0x644   :  { %2356 = vperm.xlu1 %4121, %v6279_v41   ;;  %2124 = vperm.xlu0 %4149, %v6345_v53  }
 0x648   :  { %4122 = vset.pattern.permute.xlu1 %v7435_v19  ;;  %4152 = vset.pattern.permute.xlu0 %v7434_v48 }
 0x649   :  { %2140 = vperm.xlu1 %4122, %v6287_v10   ;;  %2360 = vperm.xlu0 %4152, %v6351_v47  }
 0x64d   :  { %4124 = vset.pattern.permute.xlu1 %v7436_v7  ;;  %4155 = vset.pattern.permute.xlu0 %v7436_v7 }
 0x64e   :  { %2150 = vperm.xlu1 %4124, %v6287_v10   ;;  %2154 = vperm.xlu0 %4155, %v6345_v53  }
 0x652   :  { %4125 = vset.pattern.permute.xlu1 %v7437_v12  ;;  %4158 = vset.pattern.permute.xlu0 %v7438_v51 }
 0x653   :  { %2376 = vperm.xlu1 %4125, %v6279_v41   ;;  %2390 = vperm.xlu0 %4158, %v6351_v47  }
 0x657   :  { %4127 = vset.pattern.permute.xlu1 %v7438_v51  ;;  %4161 = vset.pattern.permute.xlu0 %v7439_v3 }
 0x658   :  { %2386 = vperm.xlu1 %4127, %v6279_v41   ;;  %2184 = vperm.xlu0 %4161, %v6345_v53  }
 0x65c   :  { %4128 = vset.pattern.permute.xlu1 %v7440_v21  ;;  %4165 = vset.pattern.permute.xlu0 %v7441_v0 }
 0x65d   :  { %2170 = vperm.xlu1 %4128, %v6287_v10   ;;  %2016 = vperm.xlu0 %4165, %v6329_v11  }
 0x661   :  { %4130 = vset.pattern.permute.xlu1 %v7439_v3  ;;  %4316 = vset.pattern.permute.xlu0 %v7416_v9 }
 0x662   :  { %2180 = vperm.xlu1 %4130, %v6287_v10  }
 0x666   :  { %4131 = vset.pattern.permute.xlu1 %v7442_v38 }
 0x667   :  { %2406 = vperm.xlu1 %4131, %v6279_v41   ;;  %v7443_v41 = vmov 43  }
 0x66b   :  { %4133 = vset.pattern.permute.xlu1 %v7441_v0 }
 0x66c   :  { %2011 = vperm.xlu1 %4133, %v6271_v50  }
 0x670   :  { %4135 = vset.pattern.permute.xlu1 %v7414_v6 }
 0x671   :  { %2242 = vperm.xlu1 %4135, %v6321_v36  }
 0x675   :  { %4136 = vset.pattern.permute.xlu1 %v7416_v9 }
 0x676   :  { %2026 = vperm.xlu1 %4136, %v6329_v11  }
 0x67a   :  { %4137 = vset.pattern.permute.xlu1 %v7418_v1 }
 0x67b   :  { %2252 = vperm.xlu1 %4137, %v6321_v36  }
 0x67f   :  { %4138 = vset.pattern.permute.xlu1 %v7420_v45 }
 0x680   :  { %2036 = vperm.xlu1 %4138, %v6329_v11  }
 0x682   :  { %v6396_v6 = vpop.permute.xlu0 %2258  ;;  %v2228_v50 = vpop.permute.xlu1 %2227 }
 0x684   :  { %4139 = vset.pattern.permute.xlu1 %v7443_v41 }
 0x685   :  { %2262 = vperm.xlu1 %4139, %v6321_v36  }
 0x687   :  { %v6400_v10 = vpop.permute.xlu0 %2278  ;;  %v6402_v57 = vpop.permute.xlu1 %2238 }
 0x689   :  { %4141 = vset.pattern.permute.xlu1 %v7424_v61 }
 0x68a   :  { %2056 = vperm.xlu1 %4141, %v6329_v11  }
 0x68c   :  { %v6406_v1 = vpop.permute.xlu0 %2072  ;;  %v6408_v13 = vpop.permute.xlu1 %2022 }
 0x68e   :  { %4142 = vset.pattern.permute.xlu1 %v7413_v60 }
 0x68f   :  { %2282 = vperm.xlu1 %4142, %v6321_v36  }
 0x691   :  { %v6412_v52 = vpop.permute.xlu0 %2335  ;;  %v6414_v27 = vpop.permute.xlu1 %2248 }
 0x693   :  { %4144 = vset.pattern.permute.xlu1 %v7428_v16  ;;  %v2214_v16 = vsub.f32 %v6213_v54, %v6379_v32 }
 0x694   :  { %2292 = vperm.xlu1 %4144, %v6321_v36  }
 0x695   :  { %v2217_v51 = vmul.f32 1.442695, %v2214_v16 }
 0x696   :  { %v6418_v40 = vpop.permute.xlu0 %2130  ;;  %v6420_v44 = vpop.permute.xlu1 %2032 }
 0x697   :  { %4565 = vpow2.f32 %v2217_v51 }
 0x698   :  { %4145 = vset.pattern.permute.xlu1 %v7415_v24 }
 0x699   :  { %2076 = vperm.xlu1 %4145, %v6329_v11  }
 0x69b   :  { %v6424_v26 = vpop.permute.xlu0 %2366  ;;  %v6426_v60 = vpop.permute.xlu1 %2042 }
 0x69d   :  { %4147 = vset.pattern.permute.xlu1 %v7431_v63 }
 0x69e   :  { %2086 = vperm.xlu1 %4147, %v6329_v11  }
 0x6a0   :  { %v6434_v5 = vpop.permute.xlu0 %2160  ;;  %v6436_v48 = vpop.permute.xlu1 %2052 }
 0x6a2   :  { %4148 = vset.pattern.permute.xlu1 %v7417_v46  ;;  %v6452_v46 = vpop.eup %4563 }
 0x6a3   :  { %2340 = vperm.xlu1 %4148, %v6351_v47   ;;  %v6454_v16 = vpop.eup %4565  ;;  %v2235_v0 = vmul.f32 %v6452_v46, %v2228_v50 }
 0x6a5   :  { %v6440_v41 = vpop.permute.xlu0 %2396  ;;  %v6442_v9 = vpop.permute.xlu1 %2062 }
 0x6a7   :  { %4150 = vset.pattern.permute.xlu1 %v7433_v23 }
 0x6a8   :  { %2350 = vperm.xlu1 %4150, %v6351_v47  }
 0x6aa   :  { %v6446_v11 = vpop.permute.xlu0 %2190  ;;  %v6448_v8 = vpop.permute.xlu1 %2288 }
 0x6ac   :  { %4151 = vset.pattern.permute.xlu1 %v7419_v39 }
 0x6ad   :  { %2134 = vperm.xlu1 %4151, %v6345_v53  }
 0x6af   :  { %v2233_v56 = vpop.permute.xlu0 %2232  ;;  %v6456_v51 = vpop.permute.xlu1 %2298 }
 0x6b0   :  { %v2236_v23 = vmul.f32 %v6454_v16, %v2233_v56 }
 0x6b1   :  { %4153 = vset.pattern.permute.xlu1 %v7435_v19 }
 0x6b2   :  { %v4166_v3 = vpack.i.bf16 %v2236_v23, %v2235_v0  ;;  %2144 = vperm.xlu1 %4153, %v6345_v53   ;;  %v7444_v23 = vmov 44  }
 0x6b4   :  { %4167 = vrot.lane.b32.xlu0 %v4166_v3, %s4681_s14  ;;  %v6463_v7 = vpop.permute.xlu1 %2082 }
 0x6b6   :  { %4154 = vset.pattern.permute.xlu1 %v7421_v25 }
 0x6b7   :  { %2370 = vperm.xlu1 %4154, %v6351_v47  }
 0x6b9   :  { %v6467_v39 = vpop.permute.xlu1 %2119 }
 0x6bb   :  { %4156 = vset.pattern.permute.xlu1 %v7437_v12 }
 0x6bc   :  { %2380 = vperm.xlu1 %4156, %v6351_v47  }
 0x6be   :  { %v6471_v50 = vpop.permute.xlu1 %2346 }
 0x6c0   :  { %4157 = vset.pattern.permute.xlu1 %v7423_v59 }
 0x6c1   :  { %2164 = vperm.xlu1 %4157, %v6345_v53  }
 0x6c3   :  { %v6475_v0 = vpop.permute.xlu1 %2356 }
 0x6c5   :  { %4159 = vset.pattern.permute.xlu1 %v7440_v21 }
 0x6c6   :  { %2174 = vperm.xlu1 %4159, %v6345_v53  }
 0x6c8   :  { %v6479_v25 = vpop.permute.xlu1 %2140 }
 0x6ca   :  { %4160 = vset.pattern.permute.xlu1 %v7425_v30 }
 0x6cb   :  { %2400 = vperm.xlu1 %4160, %v6351_v47  }
 0x6cd   :  { %v6483_v12 = vpop.permute.xlu1 %2150 }
 0x6cf   :  { %4162 = vset.pattern.permute.xlu1 %v7442_v38 }
 0x6d0   :  { %2410 = vperm.xlu1 %4162, %v6351_v47   ;;  %v1997_v47 = vsub.f32 %v6203_v49, %v6267_v42 }
 0x6d2   :  { %v6487_v3 = vpop.permute.xlu1 %2376  ;;  %v1999_v38 = vmul.f32 1.442695, %v1997_v47 }
 0x6d4   :  { %4163 = vset.pattern.permute.xlu1 %v7427_v14  ;;  %4567 = vpow2.f32 %v1999_v38 }
 0x6d5   :  { %2194 = vperm.xlu1 %4163, %v6345_v53   ;;  %v1998_v53 = vsub.f32 %v6213_v54, %v6384_v18 }
 0x6d7   :  { %v6491_v56 = vpop.permute.xlu1 %2386 }
 0x6d9   :  { %4164 = vset.pattern.permute.xlu1 %v7444_v23  ;;  %v2001_v23 = vmul.f32 1.442695, %v1998_v53 }
 0x6da   :  { %2268 = vperm.xlu1 %4164, %v6257_v34  }
 0x6db   :  { %4569 = vpow2.f32 %v2001_v23 }
 0x6dc   :  { %v6495_v30 = vpop.permute.xlu1 %2170 }
 0x6de   :  { %2272 = vperm.xlu1 %4164, %v6321_v36   ;;  %v2245_v36 = vmul.f32 %v6452_v46, %v6402_v57  ;;  %v6512_v15 = vpop.eup %4567 }
 0x6df   :  { %v2029_v53 = vmul.f32 %v6512_v15, %v6408_v13  ;;  %v2039_v61 = vmul.f32 %v6512_v15, %v6420_v44 }
 0x6e1   :  { %v6498_v59 = vpop.permute.xlu1 %2180 }
 0x6e2   :  { %4317 = vset.pattern.permute.xlu1 %v7420_v45 }
 0x6e5   :  { %v6514_v45 = vpop.eup %4569 }
 0x6e6   :  { %v6505_v14 = vpop.permute.xlu1 %2406 }
 0x6eb   :  { %v6507_v34 = vpop.permute.xlu1 %2011 }
 0x6f0   :  { %v2243_v29 = vpop.permute.xlu1 %2242 }
 0x6f1   :  { %v2246_v24 = vmul.f32 %v6454_v16, %v2243_v29  ;;  %v2255_v29 = vmul.f32 %v6452_v46, %v6414_v27 }
 0x6f3   :  { %v4171_v21 = vpack.i.bf16 %v2246_v24, %v2245_v36  ;;  %v2047_v36 = vpop.permute.xlu0 %2046 }
 0x6f5   :  { %4172 = vrot.lane.b32.xlu1 %v4171_v21, %s4684_s16  ;;  %v2027_v47 = vpop.permute.xlu1 %2026 }
 0x6f6   :  { %v2030_v38 = vmul.f32 %v6514_v45, %v2027_v47  ;;  %v2050_v47 = vmul.f32 %v6514_v45, %v2047_v36 }
 0x6f7   :  { %v2067_v44 = vpop.permute.xlu0 %2066 }
 0x6f8   :  { %v4176_v23 = vpack.i.bf16 %v2030_v38, %v2029_v53  ;;  %v2049_v38 = vmul.f32 %v6512_v15, %v6426_v60  ;;  %v2070_v36 = vmul.f32 %v6514_v45, %v2067_v44 }
 0x6fa   :  { %4177 = vrot.lane.b32.xlu0 %v4176_v23, %s4688_s20  ;;  %v2253_v19 = vpop.permute.xlu1 %2252 }
 0x6fb   :  { %v2256_v24 = vmul.f32 %v6454_v16, %v2253_v19  ;;  %v2265_v19 = vmul.f32 %v6452_v46, %v6396_v6  ;;  %v2106_v6 = vsub.f32 %v6213_v54, %v6392_v17 }
 0x6fd   :  { %v4181_v57 = vpack.i.bf16 %v2256_v24, %v2255_v29  ;;  %v4196_v29 = vpack.i.bf16 %v2050_v47, %v2049_v38  ;;  %v2069_v47 = vmul.f32 %v6512_v15, %v6442_v9  ;;  %v2285_v38 = vmul.f32 %v6452_v46, %v6400_v10 }
 0x6fe   :  { %v2295_v10 = vmul.f32 %v6452_v46, %v6448_v8 }
 0x6ff   :  { %4182 = vrot.lane.b32.xlu1 %v4181_v57, %s4671_s1  ;;  %v2037_v21 = vpop.permute.xlu1 %2036 }
 0x700   :  { %v2040_v13 = vmul.f32 %v6514_v45, %v2037_v21 }
 0x702   :  { %v4186_v53 = vpack.i.bf16 %v2040_v13, %v2039_v61  ;;  %v2059_v61 = vmul.f32 %v6512_v15, %v6436_v48  ;;  %v2321_v13 = vsub.f32 %v6203_v49, %v6277_v43  ;;  %v2105_v48 = vsub.f32 %v6203_v49, %v6285_v37 }
 0x704   :  { %4187 = vrot.lane.b32.xlu0 %v4186_v53, %s4675_s10  ;;  %v2263_v27 = vpop.permute.xlu1 %2262  ;;  %v2323_v44 = vmul.f32 1.442695, %v2321_v13  ;;  %v2107_v9 = vmul.f32 1.442695, %v2105_v48  ;;  %v2079_v13 = vmul.f32 %v6512_v15, %v6406_v1 }
 0x705   :  { %v2266_v23 = vmul.f32 %v6454_v16, %v2263_v27 }
 0x707   :  { %v4191_v24 = vpack.i.bf16 %v2266_v23, %v2265_v19  ;;  %v2322_v19 = vsub.f32 %v6213_v54, %v6388_v2  ;;  %v4211_v23 = vpack.i.bf16 %v2070_v36, %v2069_v47 }
 0x708   :  { %4197 = vrot.lane.b32.xlu0 %v4196_v29, %s4678_s12  ;;  %v2109_v29 = vmul.f32 1.442695, %v2106_v6 }
 0x709   :  { %4192 = vrot.lane.b32.xlu1 %v4191_v24, %s4687_s19  ;;  %v2057_v57 = vpop.permute.xlu1 %2056  ;;  %v2325_v49 = vmul.f32 1.442695, %v2322_v19 }
 0x70a   :  { %v2060_v60 = vmul.f32 %v6514_v45, %v2057_v57  ;;  %v2303_v57 = vpop.permute.xlu0 %2302  ;;  %4571 = vpow2.f32 %v2109_v29 }
 0x70b   :  { %4573 = vpow2.f32 %v2323_v44  ;;  %v2306_v54 = vmul.f32 %v6454_v16, %v2303_v57 }
 0x70c   :  { %v4201_v21 = vpack.i.bf16 %v2060_v60, %v2059_v61  ;;  %4575 = vpow2.f32 %v2107_v9 }
 0x70d   :  { %4577 = vpow2.f32 %v2325_v49 }
 0x70e   :  { %4202 = vrot.lane.b32.xlu1 %v4201_v21, %s4670_s0  ;;  %v2283_v53 = vpop.permute.xlu1 %2282  ;;  %v2305_v21 = vmul.f32 %v6452_v46, %v6456_v51  ;;  %v2125_v48 = vpop.permute.xlu0 %2124 }
 0x70f   :  { %v2286_v27 = vmul.f32 %v6454_v16, %v2283_v53 }
 0x710   :  { %v4226_v47 = vpack.i.bf16 %v2306_v54, %v2305_v21 }
 0x711   :  { %v4206_v24 = vpack.i.bf16 %v2286_v27, %v2285_v38  ;;  %v2089_v27 = vmul.f32 %v6512_v15, %v6463_v7 }
 0x712   :  { %4212 = vrot.lane.b32.xlu1 %v4211_v23, %s4682_s15 }
 0x713   :  { %4207 = vrot.lane.b32.xlu0 %v4206_v24, %s4688_s20  ;;  %v2293_v61 = vpop.permute.xlu1 %2292 }
 0x714   :  { %v2296_v60 = vmul.f32 %v6454_v16, %v2293_v61  ;;  %v6572_v19 = vpop.eup %4571 }
 0x715   :  { %v6574_v23 = vpop.eup %4573  ;;  %v2128_v1 = vmul.f32 %v6572_v19, %v2125_v48 }
 0x716   :  { %v4216_v36 = vpack.i.bf16 %v2296_v60, %v2295_v10  ;;  %v6577_v24 = vpop.eup %4575  ;;  %v2343_v7 = vmul.f32 %v6574_v23, %v6412_v52  ;;  %v2361_v60 = vpop.permute.xlu0 %2360  ;;  %v2363_v52 = vmul.f32 %v6574_v23, %v6475_v0  ;;  %v4455_v0 = vld [vmem:[%s7074_s3 + $0x40] sm:$0xff]  }
 0x717   :  { %v6579_v44 = vpop.eup %4577  ;;  %v2127_v9 = vmul.f32 %v6577_v24, %v6467_v39  ;;  %3537 = vmatprep.subr.bf16.mxu1 %v4455_v0  ;;  %v4464_v0 = vld [vmem:[%s7074_s3 + $0x20] sm:$0xff]  }
 0x718   :  { %4217 = vrot.lane.b32.xlu0 %v4216_v36, %s4675_s10  ;;  %v2077_v6 = vpop.permute.xlu1 %2076  ;;  %v2353_v36 = vmul.f32 %v6574_v23, %v6471_v50  ;;  %v2364_v21 = vmul.f32 %v6579_v44, %v2361_v60  ;;  %v4459_v60 = vld [vmem:[%s7074_s3 + $0x50] sm:$0xff]  }
 0x719   :  { %v2080_v8 = vmul.f32 %v6514_v45, %v2077_v6  ;;  %v4241_v49 = vpack.i.bf16 %v2128_v1, %v2127_v9 }
 0x71a   :  { %v2155_v50 = vpop.permute.xlu0 %2154 }
 0x71b   :  { %v4221_v53 = vpack.i.bf16 %v2080_v8, %v2079_v13  ;;  %v2137_v8 = vmul.f32 %v6577_v24, %v6418_v40  ;;  %v4456_v40 = vld [vmem:[%s7074_s3] sm:$0xff]   ;;  %v2158_v1 = vmul.f32 %v6572_v19, %v2155_v50 }
 0x71c   :  { %4227 = vrot.lane.b32.xlu0 %v4226_v47, %s4678_s12  ;;  %3538 = vmatpush3.bf16.msra.mxu1 %v4456_v40 }
 0x71d   :  { %4222 = vrot.lane.b32.xlu1 %v4221_v53, %s4685_s17  ;;  %v2087_v38 = vpop.permute.xlu1 %2086  ;;  %v4256_v53 = vpack.i.bf16 %v2364_v21, %v2363_v52 }
 0x71e   :  { %v2090_v51 = vmul.f32 %v6514_v45, %v2087_v38  ;;  %v2391_v21 = vpop.permute.xlu0 %2390 }
 0x720   :  { %v4231_v29 = vpack.i.bf16 %v2090_v51, %v2089_v27  ;;  %v2147_v27 = vmul.f32 %v6577_v24, %v6479_v25  ;;  %v4458_v25 = vld [vmem:[%s7074_s3 + $0x8] sm:$0xff]  }
 0x722   :  { %4232 = vrot.lane.b32.xlu1 %v4231_v29, %s4686_s18  ;;  %v2341_v57 = vpop.permute.xlu1 %2340  ;;  %v2157_v29 = vmul.f32 %v6577_v24, %v6483_v12 }
 0x723   :  { %v2344_v61 = vmul.f32 %v6579_v44, %v2341_v57  ;;  %v4457_v57 = vld [vmem:[%s7074_s3 + $0x48] sm:$0xff]  }
 0x724   :  { %3539 = vmatprep.subr.bf16.mxu1 %v4457_v57  ;;  %v4271_v12 = vpack.i.bf16 %v2158_v1, %v2157_v29  ;;  %v4466_v1 = vld [vmem:[%s7074_s3 + $0x28] sm:$0xff]   ;;  %v2185_v29 = vpop.permute.xlu0 %2184  ;;  %v2187_v57 = vmul.f32 %v6577_v24, %v6498_v59 }
 0x725   :  { %v4236_v10 = vpack.i.bf16 %v2344_v61, %v2343_v7  ;;  %v2373_v61 = vmul.f32 %v6574_v23, %v6424_v26  ;;  %3540 = vmatpush3.bf16.msra.mxu1 %v4458_v25  ;;  %v2383_v26 = vmul.f32 %v6574_v23, %v6487_v3 }
 0x726   :  { %4242 = vrot.lane.b32.xlu1 %v4241_v49, %s4685_s17  ;;  %3541 = vmatprep.subr.bf16.mxu1 %v4459_v60 }
 0x727   :  { %4237 = vrot.lane.b32.xlu0 %v4236_v10, %s4675_s10  ;;  %v2351_v54 = vpop.permute.xlu1 %2350 }
 0x728   :  { %v2354_v39 = vmul.f32 %v6579_v44, %v2351_v54  ;;  %v4460_v54 = vld [vmem:[%s7074_s3 + $0x10] sm:$0xff]  }
 0x729   :  { %3542 = vmatpush3.bf16.msra.mxu1 %v4460_v54  ;;  %v4469_v54 = vld [vmem:[%s7074_s3 + $0x78] sm:$0xff]  }
 0x72a   :  { %v4246_v6 = vpack.i.bf16 %v2354_v39, %v2353_v36 }
 0x72c   :  { %4247 = vrot.lane.b32.xlu0 %v4246_v6, %s4678_s12  ;;  %v2135_v13 = vpop.permute.xlu1 %2134  ;;  %v2393_v6 = vmul.f32 %v6574_v23, %v6491_v56 }
 0x72d   :  { %v2138_v47 = vmul.f32 %v6572_v19, %v2135_v13  ;;  %v4461_v13 = vld [vmem:[%s7074_s3 + $0x58] sm:$0xff]  }
 0x72e   :  { %3543 = vmatprep.subr.bf16.mxu1 %v4461_v13 }
 0x72f   :  { %v4251_v48 = vpack.i.bf16 %v2138_v47, %v2137_v8  ;;  %v4462_v8 = vld [vmem:[%s7074_s3 + $0x18] sm:$0xff]   ;;  %v2394_v47 = vmul.f32 %v6579_v44, %v2391_v21 }
 0x730   :  { %4257 = vrot.lane.b32.xlu0 %v4256_v53, %s4670_s0  ;;  %v2167_v53 = vmul.f32 %v6577_v24, %v6434_v5  ;;  %3544 = vmatpush3.bf16.msra.mxu1 %v4462_v8  ;;  %v4465_v5 = vld [vmem:[%s7074_s3 + $0x68] sm:$0xff]  }
 0x731   :  { %4252 = vrot.lane.b32.xlu1 %v4251_v48, %s4686_s18  ;;  %v2145_v38 = vpop.permute.xlu1 %2144  ;;  %v4286_v56 = vpack.i.bf16 %v2394_v47, %v2393_v6  ;;  %v2197_v6 = vmul.f32 %v6577_v24, %v6446_v11  ;;  %v2017_v47 = vpop.permute.xlu0 %2016 }
 0x732   :  { %v2148_v51 = vmul.f32 %v6572_v19, %v2145_v38  ;;  %v4463_v38 = vld [vmem:[%s7074_s3 + $0x60] sm:$0xff]  }
 0x733   :  { %3545 = vmatprep.subr.bf16.mxu1 %v4463_v38 }
 0x734   :  { %v4261_v9 = vpack.i.bf16 %v2148_v51, %v2147_v27  ;;  %v2177_v51 = vmul.f32 %v6577_v24, %v6495_v30  ;;  %3546 = vmatpush3.bf16.msra.mxu1 %v4464_v0 }
 0x735   :  { %3547 = vmatprep.subr.bf16.mxu1 %v4465_v5 }
 0x736   :  { %4262 = vrot.lane.b32.xlu1 %v4261_v9, %s4680_s13  ;;  %v2371_v7 = vpop.permute.xlu1 %2370  ;;  %v4467_v9 = vld [vmem:[%s7074_s3 + $0x70] sm:$0xff]  }
 0x737   :  { %v2374_v49 = vmul.f32 %v6579_v44, %v2371_v7  ;;  %v2188_v7 = vmul.f32 %v6572_v19, %v2185_v29 }
 0x738   :  { %3548 = vmatpush3.bf16.msra.mxu1 %v4466_v1 }
 0x739   :  { %v4266_v10 = vpack.i.bf16 %v2374_v49, %v2373_v61  ;;  %v4468_v61 = vld [vmem:[%s7074_s3 + $0x30] sm:$0xff]   ;;  %v2403_v49 = vmul.f32 %v6574_v23, %v6440_v41  ;;  %3549 = vmatprep.subr.bf16.mxu1 %v4467_v9  ;;  %v2413_v41 = vmul.f32 %v6574_v23, %v6505_v14  ;;  %v4168_v14 = vpop.permute.xlu0 %4167 }
 0x73a   :  { %4272 = vrot.lane.b32.xlu1 %v4271_v12, %s4674_s9 }
 0x73b   :  { %4267 = vrot.lane.b32.xlu0 %v4266_v10, %s4682_s15  ;;  %v2381_v36 = vpop.permute.xlu1 %2380  ;;  %v4301_v10 = vpack.i.bf16 %v2188_v7, %v2187_v57  ;;  %v2020_v57 = vmul.f32 %v6514_v45, %v2017_v47 }
 0x73c   :  { %v2384_v39 = vmul.f32 %v6579_v44, %v2381_v36  ;;  %3550 = vmatpush3.bf16.msra.mxu1 %v4468_v61  ;;  %v4470_v36 = vld [vmem:[%s7074_s3 + $0x38] sm:$0xff]  }
 0x73d   :  { %3551 = vmatprep.subr.bf16.mxu1 %v4469_v54 }
 0x73e   :  { %v4276_v52 = vpack.i.bf16 %v2384_v39, %v2383_v26 }
 0x740   :  { %4277 = vrot.lane.b32.xlu0 %v4276_v52, %s4685_s17  ;;  %v2165_v3 = vpop.permute.xlu1 %2164  ;;  %3552 = vmatpush3.bf16.msra.mxu1 %v4470_v36 }
 0x741   :  { %v2168_v48 = vmul.f32 %v6572_v19, %v2165_v3 }
 0x743   :  { %v4281_v50 = vpack.i.bf16 %v2168_v48, %v2167_v53 }
 0x744   :  { %4287 = vrot.lane.b32.xlu0 %v4286_v56, %s4686_s18 }
 0x745   :  { %4282 = vrot.lane.b32.xlu1 %v4281_v50, %s4677_s11  ;;  %v2175_v27 = vpop.permute.xlu1 %2174 }
 0x746   :  { %v2178_v40 = vmul.f32 %v6572_v19, %v2175_v27 }
 0x748   :  { %v4291_v25 = vpack.i.bf16 %v2178_v40, %v2177_v51 }
 0x74a   :  { %4292 = vrot.lane.b32.xlu1 %v4291_v25, %s4689_s21  ;;  %v2401_v30 = vpop.permute.xlu1 %2400  ;;  %v2019_v25 = vmul.f32 %v6512_v15, %v6507_v34 }
 0x74b   :  { %v2404_v12 = vmul.f32 %v6579_v44, %v2401_v30 }
 0x74d   :  { %v4296_v60 = vpack.i.bf16 %v2404_v12, %v2403_v49 }
 0x74e   :  { %4302 = vrot.lane.b32.xlu1 %v4301_v10, %s4681_s14 }
 0x74f   :  { %4297 = vrot.lane.b32.xlu0 %v4296_v60, %s4680_s13  ;;  %v2411_v59 = vpop.permute.xlu1 %2410  ;;  %v4170_v60 = vunpack.i.h.bf16 %v4168_v14 }
 0x750   :  { %v2414_v26 = vmul.f32 %v6579_v44, %v2411_v59  ;;  %v4169_v59 = vunpack.i.l.bf16 %v4168_v14 }
 0x752   :  { %v4306_v39 = vpack.i.bf16 %v2414_v26, %v2413_v41 }
 0x754   :  { %4307 = vrot.lane.b32.xlu0 %v4306_v39, %s4674_s9  ;;  %v2195_v21 = vpop.permute.xlu1 %2194 }
 0x755   :  { %v2198_v52 = vmul.f32 %v6572_v19, %v2195_v21 }
 0x757   :  { %v4311_v13 = vpack.i.bf16 %v2198_v52, %v2197_v6 }
 0x759   :  { %4312 = vrot.lane.b32.xlu1 %v4311_v13, %s4684_s16  ;;  %v2269_v8 = vpop.permute.xlu1 %2268 }
 0x75a   :  { %v2275_v26 = vmul.f32 %v6452_v46, %v2269_v8 }
 0x75d   :  { %v2273_v3 = vpop.permute.xlu1 %2272 }
 0x75e   :  { %v2276_v39 = vmul.f32 %v6454_v16, %v2273_v3 }
 0x767   :  { %v4173_v23 = vpop.permute.xlu1 %4172 }
 0x768   :  { %v4175_v7 = vunpack.i.h.bf16 %v4173_v23  ;;  %v4174_v30 = vunpack.i.l.bf16 %v4173_v23 }
 0x76a   :  { %v2688_v15 = vsel %vm112_vm12, %v4170_v60, %v4175_v7  ;;  %v2687_v34 = vsel %vm112_vm12, %v4169_v59, %v4174_v30 }
 0x76c   :  { %v4178_v44 = vpop.permute.xlu0 %4177 }
 0x76d   :  { %v4180_v61 = vunpack.i.h.bf16 %v4178_v44  ;;  %v4179_v49 = vunpack.i.l.bf16 %v4178_v44 }
 0x76f   :  { %v2538_v47 = vsel %vm112_vm12, %v2020_v57, %v4180_v61  ;;  %v2537_v14 = vsel %vm112_vm12, %v2019_v25, %v4179_v49 }
 0x771   :  { %v4183_v53 = vpop.permute.xlu1 %4182 }
 0x772   :  { %v4185_v12 = vunpack.i.h.bf16 %v4183_v53  ;;  %v4184_v10 = vunpack.i.l.bf16 %v4183_v53 }
 0x774   :  { %v2689_v23 = vsel %vm1130_vm7, %v2687_v34, %v4184_v10  ;;  %v2690_v46 = vsel %vm1130_vm7, %v2688_v15, %v4185_v12 }
 0x776   :  { %v4188_v48 = vpop.permute.xlu0 %4187 }
 0x777   :  { %v4190_v45 = vunpack.i.h.bf16 %v4188_v48  ;;  %v4189_v21 = vunpack.i.l.bf16 %v4188_v48 }
 0x779   :  { %v2540_v53 = vsel %vm1130_vm7, %v2538_v47, %v4190_v45  ;;  %v2539_v48 = vsel %vm1130_vm7, %v2537_v14, %v4189_v21 }
 0x77a   :  { %v4198_v50 = vpop.permute.xlu0 %4197 }
 0x77b   :  { %v4193_v56 = vpop.permute.xlu1 %4192  ;;  %v4200_v52 = vunpack.i.h.bf16 %v4198_v50  ;;  %v4199_v13 = vunpack.i.l.bf16 %v4198_v50 }
 0x77c   :  { %v4195_v54 = vunpack.i.h.bf16 %v4193_v56  ;;  %v4194_v36 = vunpack.i.l.bf16 %v4193_v56 }
 0x77d   :  { %v2541_v57 = vsel %vm1133_vm4, %v2539_v48, %v4199_v13  ;;  %v2542_v25 = vsel %vm1133_vm4, %v2540_v53, %v4200_v52 }
 0x77e   :  { %v2691_v16 = vsel %vm1133_vm4, %v2689_v23, %v4194_v36  ;;  %v2692_v8 = vsel %vm1133_vm4, %v2690_v46, %v4195_v54 }
 0x77f   :  { %v2693_v49 = vsel %vm30_vm0, %v2691_v16, %v2275_v26 }
 0x780   :  { %v4203_v38 = vpop.permute.xlu1 %4202 }
 0x781   :  { %v4205_v3 = vunpack.i.h.bf16 %v4203_v38  ;;  %v4204_v44 = vunpack.i.l.bf16 %v4203_v38  ;;  %v2694_v38 = vsel %vm30_vm0, %v2692_v8, %v2276_v39 }
 0x783   :  { %v2543_v59 = vsel %vm30_vm0, %v2541_v57, %v4204_v44 }
 0x784   :  { %v4213_v5 = vpop.permute.xlu1 %4212 }
 0x785   :  { %v6693_v0 = vpop.permute.xlu0 %4207  ;;  %v4215_v56 = vunpack.i.h.bf16 %v4213_v5  ;;  %v4214_v50 = vunpack.i.l.bf16 %v4213_v5  ;;  %v2544_v5 = vsel %vm30_vm0, %v2542_v25, %v4205_v3 }
 0x786   :  { %v4210_v7 = vunpack.i.h.bf16 %v6693_v0  ;;  %v4209_v30 = vunpack.i.l.bf16 %v6693_v0 }
 0x787   :  { %v2545_v36 = vsel %vm1138_vm11, %v2543_v59, %v4214_v50  ;;  %v2546_v26 = vsel %vm1138_vm11, %v2544_v5, %v4215_v56 }
 0x788   :  { %v2696_v21 = vsel %vm1138_vm11, %v2694_v38, %v4210_v7 }
 0x78a   :  { %v6695_v11 = vpop.permute.xlu0 %4217 }
 0x78b   :  { %v4220_v12 = vunpack.i.h.bf16 %v6695_v11  ;;  %v4219_v10 = vunpack.i.l.bf16 %v6695_v11  ;;  %v2695_v11 = vsel %vm1138_vm11, %v2693_v49, %v4209_v30 }
 0x78d   :  { %v2698_v13 = vsel %vm1141_vm2, %v2696_v21, %v4220_v12 }
 0x78e   :  { %v6699_v24 = vpop.permute.xlu0 %4227 }
 0x78f   :  { %v6697_v19 = vpop.permute.xlu1 %4222  ;;  %v4230_v54 = vunpack.i.h.bf16 %v6699_v24  ;;  %v4229_v0 = vunpack.i.l.bf16 %v6699_v24  ;;  %v2697_v24 = vsel %vm1141_vm2, %v2695_v11, %v4219_v10 }
 0x790   :  { %v4225_v39 = vunpack.i.h.bf16 %v6697_v19  ;;  %v4224_v45 = vunpack.i.l.bf16 %v6697_v19 }
 0x791   :  { %v2699_v19 = vsel %vm1144_vm3, %v2697_v24, %v4229_v0  ;;  %v2700_v23 = vsel %vm1144_vm3, %v2698_v13, %v4230_v54 }
 0x792   :  { %v2548_v8 = vsel %vm1141_vm2, %v2546_v26, %v4225_v39 }
 0x794   :  { %v6701_v27 = vpop.permute.xlu1 %4232 }
 0x795   :  { %v4235_v15 = vunpack.i.h.bf16 %v6701_v27  ;;  %v4234_v34 = vunpack.i.l.bf16 %v6701_v27  ;;  %v2547_v27 = vsel %vm1141_vm2, %v2545_v36, %v4224_v45 }
 0x797   :  { %v2549_v48 = vsel %vm1144_vm3, %v2547_v27, %v4234_v34 }
 0x798   :  { %v6705_v40 = vpop.permute.xlu1 %4242 }
 0x799   :  { %v6703_v51 = vpop.permute.xlu0 %4237  ;;  %v4245_v47 = vunpack.i.h.bf16 %v6705_v40  ;;  %v4244_v14 = vunpack.i.l.bf16 %v6705_v40  ;;  %v2550_v40 = vsel %vm1144_vm3, %v2548_v8, %v4235_v15 }
 0x79a   :  { %v4240_v46 = vunpack.i.h.bf16 %v6703_v51  ;;  %v4239_v16 = vunpack.i.l.bf16 %v6703_v51 }
 0x79b   :  { %v2551_v57 = vsel %vm7445_vm15, %v2549_v48, %v4244_v14  ;;  %v2552_v51 = vsel %vm7446_vm8, %v2550_v40, %v4245_v47  ;;  %vm7451_vm15 = vmmov %vm7450_vm6 }
 0x79c   :  { %v2701_v30 = vsel %vm7447_vm5, %v2699_v19, %v4239_v16  ;;  %vm7452_vm8 = vmmov %vm7450_vm6  ;;  %vm7453_vm5 = vcmask 850944  }
 0x79e   :  { %v6707_v1 = vpop.permute.xlu0 %4247 }
 0x79f   :  { %v4250_v3 = vunpack.i.h.bf16 %v6707_v1  ;;  %v4249_v44 = vunpack.i.l.bf16 %v6707_v1  ;;  %v2702_v1 = vsel %vm7448_vm10, %v2700_v23, %v4240_v46  ;;  %vm7454_vm10 = vmmov %vm7453_vm5 }
 0x7a1   :  { %v2703_v10 = vsel %vm7449_vm13, %v2701_v30, %v4249_v44  ;;  %vm7455_vm13 = vcmask 916480  }
 0x7a2   :  { %v6711_v9 = vpop.permute.xlu0 %4257 }
 0x7a3   :  { %v6709_v29 = vpop.permute.xlu1 %4252  ;;  %v4260_v56 = vunpack.i.h.bf16 %v6711_v9  ;;  %v4259_v50 = vunpack.i.l.bf16 %v6711_v9  ;;  %v2704_v9 = vsel %vm7450_vm6, %v2702_v1, %v4250_v3  ;;  %vm7456_vm6 = vmmov %vm7455_vm13 }
 0x7a4   :  { %v4255_v25 = vunpack.i.h.bf16 %v6709_v29  ;;  %v4254_v7 = vunpack.i.l.bf16 %v6709_v29 }
 0x7a5   :  { %v2705_v29 = vsel %vm1153_vm9, %v2703_v10, %v4259_v50  ;;  %v2706_v0 = vsel %vm1153_vm9, %v2704_v9, %v4260_v56 }
 0x7a6   :  { %v2554_v39 = vsel %vm7452_vm8, %v2552_v51, %v4255_v25 }
 0x7a8   :  { %v6716_v41 = vpop.permute.xlu1 %4262 }
 0x7a9   :  { %v4265_v49 = vunpack.i.h.bf16 %v6716_v41  ;;  %v4264_v38 = vunpack.i.l.bf16 %v6716_v41  ;;  %v2553_v41 = vsel %vm7451_vm15, %v2551_v57, %v4254_v7  ;;  %vm7457_vm15 = vcmask 982016  }
 0x7aa   :  { %vm7458_vm8 = vmmov %vm7457_vm15 }
 0x7ab   :  { %v2555_v21 = vsel %vm1153_vm9, %v2553_v41, %v4264_v38  ;;  %v2556_v15 = vsel %vm1153_vm9, %v2554_v39, %v4265_v49 }
 0x7ac   :  { %v6736_v61 = vpop.permute.xlu1 %4272 }
 0x7ad   :  { %v6720_v6 = vpop.permute.xlu0 %4267  ;;  %v4275_v24 = vunpack.i.h.bf16 %v6736_v61  ;;  %v4274_v13 = vunpack.i.l.bf16 %v6736_v61 }
 0x7ae   :  { %v4270_v5 = vunpack.i.h.bf16 %v6720_v6  ;;  %v4269_v59 = vunpack.i.l.bf16 %v6720_v6 }
 0x7af   :  { %v2557_v25 = vsel %vm1156_vm1, %v2555_v21, %v4274_v13  ;;  %v2558_v7 = vsel %vm1156_vm1, %v2556_v15, %v4275_v24  ;;  %v2091_v24 = vadd.f32 %v6249_v31, %v6267_v42  ;;  %v2200_v13 = vadd.f32 %v6319_v55, %v6392_v17 }
 0x7b0   :  { %v2707_v47 = vsel %vm1156_vm1, %v2705_v29, %v4269_v59  ;;  %v2415_v31 = vadd.f32 %v6247_v35, %v6277_v43 }
 0x7b2   :  { %v6742_v60 = vpop.permute.xlu0 %4277 }
 0x7b3   :  { %v4280_v36 = vunpack.i.h.bf16 %v6742_v60  ;;  %v4279_v26 = vunpack.i.l.bf16 %v6742_v60  ;;  %v2708_v60 = vsel %vm1156_vm1, %v2706_v0, %v4270_v5 }
 0x7b5   :  { %v2709_v14 = vsel %vm1159_vm14, %v2707_v47, %v4279_v26  ;;  %v2710_v19 = vsel %vm1159_vm14, %v2708_v60, %v4280_v36  ;;  %v2092_v60 = vadd.f32 %v6301_v62, %v6384_v18  ;;  %v2416_v62 = vadd.f32 %v6313_v33, %v6388_v2 }
 0x7b6   :  { %v4288_v53 = vpop.permute.xlu0 %4287 }
 0x7b7   :  { %v6756_v52 = vpop.permute.xlu1 %4282  ;;  %v4290_v45 = vunpack.i.h.bf16 %v4288_v53  ;;  %v4289_v11 = vunpack.i.l.bf16 %v4288_v53 }
 0x7b8   :  { %v4285_v23 = vunpack.i.h.bf16 %v6756_v52  ;;  %v4284_v46 = vunpack.i.l.bf16 %v6756_v52 }
 0x7b9   :  { %v2711_v8 = vsel %vm7453_vm5, %v2709_v14, %v4289_v11  ;;  %v2712_v3 = vsel %vm7454_vm10, %v2710_v19, %v4290_v45  ;;  %vm7459_vm10 = vmmov %vm7453_vm5  ;;  %v2307_v14 = vadd.f32 %v6243_v58, %v6259_v4  ;;  %v2889_v19 = vsel %vm112_vm12, %v2092_v60, %v2200_v13 }
 0x7ba   :  { %v2559_v1 = vsel %vm1159_vm14, %v2557_v25, %v4284_v46  ;;  %v2560_v49 = vsel %vm1159_vm14, %v2558_v7, %v4285_v23  ;;  %v7479_v13 = vmov 8   ;;  %v7481_v60 = vmov 9  }
 0x7bc   :  { %v4293_v12 = vpop.permute.xlu1 %4292 }
 0x7bd   :  { %v4295_v53 = vunpack.i.h.bf16 %v4293_v12  ;;  %v4294_v48 = vunpack.i.l.bf16 %v4293_v12 }
 0x7bf   :  { %v2561_v12 = vsel %vm7453_vm5, %v2559_v1, %v4294_v48  ;;  %v2562_v10 = vsel %vm7459_vm10, %v2560_v49, %v4295_v53  ;;  %vm7462_vm5 = vcmask 130112   ;;  %vm7463_vm10 = vcmask 128064  }
 0x7c0   :  { %v4303_v16 = vpop.permute.xlu1 %4302 }
 0x7c1   :  { %v4298_v54 = vpop.permute.xlu0 %4297  ;;  %v4305_v50 = vunpack.i.h.bf16 %v4303_v16  ;;  %v4304_v57 = vunpack.i.l.bf16 %v4303_v16 }
 0x7c2   :  { %v4300_v6 = vunpack.i.h.bf16 %v4298_v54  ;;  %v4299_v34 = vunpack.i.l.bf16 %v4298_v54 }
 0x7c3   :  { %v2564_v54 = vsel %vm7456_vm6, %v2562_v10, %v4305_v50 }
 0x7c4   :  { %v2713_v40 = vsel %vm7455_vm13, %v2711_v8, %v4299_v34  ;;  %v2714_v56 = vsel %vm7456_vm6, %v2712_v3, %v4300_v6  ;;  %vm7460_vm13 = vmmov %vm7456_vm6  ;;  %v2199_v34 = vadd.f32 %v6253_v28, %v6285_v37  ;;  %v2308_v28 = vadd.f32 %v6293_v22, %v6379_v32 }
 0x7c5   :  { %v2563_v59 = vsel %vm7460_vm13, %v2561_v12, %v4304_v57  ;;  %vm7464_vm13 = vcmask 261312   ;;  %vm7465_vm6 = vcmask 62464  }
 0x7c6   :  { %v4308_v27 = vpop.permute.xlu0 %4307  ;;  %v2888_v47 = vsel %vm112_vm12, %v2091_v24, %v2199_v34  ;;  %v2891_v55 = vsel %vm1130_vm7, %v2889_v19, %v2308_v28  ;;  %v7477_v34 = vmov 30   ;;  %v7478_v24 = vmov 28  }
 0x7c7   :  { %v4310_v44 = vunpack.i.h.bf16 %v4308_v27  ;;  %v4309_v61 = vunpack.i.l.bf16 %v4308_v27  ;;  %v2890_v37 = vsel %vm1130_vm7, %v2888_v47, %v2307_v14  ;;  %v2893_v22 = vsel %vm1133_vm4, %v2891_v55, %v2416_v62 }
 0x7c8   :  { %v2892_v58 = vsel %vm1133_vm4, %v2890_v37, %v2415_v31  ;;  %v7480_v47 = vmov 31   ;;  %v7482_v14 = vmov 10  }
 0x7c9   :  { %v2715_v51 = vsel %vm7457_vm15, %v2713_v40, %v4309_v61  ;;  %v2716_v52 = vsel %vm7458_vm8, %v2714_v56, %v4310_v44  ;;  %vm7461_vm15 = vmmov %vm7458_vm8 }
 0x7ca   :  { %v2718_v30 = vpack.c.bf16 %v2716_v52, %v2715_v51 }
 0x7cb   :  { %v4313_v38 = vpop.permute.xlu1 %4312 }
 0x7cc   :  { %v4315_v9 = vunpack.i.h.bf16 %v4313_v38  ;;  %v4314_v5 = vunpack.i.l.bf16 %v4313_v38  ;;  %2879 = vmatprep.mubr.bf16.mxu1 %v2718_v30 }
 0x7ce   :  { %v2565_v29 = vsel %vm7461_vm15, %v2563_v59, %v4314_v5  ;;  %v2566_v0 = vsel %vm7458_vm8, %v2564_v54, %v4315_v9  ;;  %vm7466_vm15 = vcmask 259264   ;;  %vm7467_vm8 = vcmask 193664  }
 0x7cf   :  { %v2717_v36 = vpack.c.bf16 %v2566_v0, %v2565_v29  ;;  %v7469_v29 = vmov 12   ;;  %v7470_v0 = vmov 26  }
 0x7d1   :  { %2880 = vmatmul.mubr.bf16.vlgmr.msra.gmra.mrb[4].mxu1 %v2717_v36 }
 0x8a4   :  { %v3553_v26 = vpop.f32.mrb[4].mxu1 }
 0x8a5   :  { %v3554_v41 = vpop.f32.mrb[5].mxu1 }
 0x8a6   :  { %v3555_v39 = vadd.f32 %v3554_v41, %v3553_v26  ;;  %v3556_v45 = vpop.f32.mrb[6].mxu1  ;;  %v7471_v26 = vmov 13   ;;  %v7472_v41 = vmov 29  }
 0x8a7   :  { %v3557_v11 = vpop.f32.mrb[7].mxu1 }
 0x8a8   :  { %v2894_v21 = vmax.f32 %v3555_v39, 1e-38  ;;  %v3558_v15 = vadd.f32 %v3557_v11, %v3556_v45  ;;  %v7473_v45 = vmov 14  }
 0x8aa   :  { %4579 = vlog2.f32 %v2894_v21  ;;  %v2895_v6 = vmax.f32 %v3558_v15, 1e-38  ;;  %v7474_v21 = vmov 24   ;;  %v7475_v15 = vmov 25  }
 0x8ac   :  { %4581 = vlog2.f32 %v2895_v6  ;;  %v7476_v6 = vmov 27  }
 0x8b4   :  { %v4580_v23 = vpop.eup %4579 }
 0x8b5   :  { %v2897_v42 = vmul.f32 0.6931472, %v4580_v23 }
 0x8b6   :  { %v4582_v17 = vpop.eup %4581 }
 0x8b7   :  { %v6839_v4 = vadd.f32 %v2897_v42, %v2892_v58  ;;  %v2899_v18 = vmul.f32 0.6931472, %v4582_v17 }
 0x8b9   :  { %v6842_v32 = vadd.f32 %v2899_v18, %v2893_v22  ;;  %v2908_v46 = vsel %vm7462_vm5, %v6839_v4, -inf  ;;  %v3016_v43 = vsel %vm7464_vm13, %v6839_v4, -inf  ;;  %v2902_v27 = vsel %vm112_vm12, %v6839_v4, -inf }
 0x8ba   :  { %2909 = vmax.xlane.f32.xlu0 %v2908_v46  ;;  %vm7468_vm5 = vcmask 195712  }
 0x8bb   :  { %v2911_v35 = vsel %vm7463_vm10, %v6842_v32, -inf  ;;  %v2905_v33 = vsel %vm7465_vm6, %v6842_v32, -inf  ;;  %v3019_v2 = vsel %vm7466_vm15, %v6842_v32, -inf  ;;  %v3013_v16 = vsel %vm7467_vm8, %v6842_v32, -inf }
 0x8bc   :  { %2912 = vmax.xlane.f32.xlu1 %v2911_v35  ;;  %v3010_v8 = vsel %vm7468_vm5, %v6839_v4, -inf  ;;  %vm4691_vm10 = vmmov 0   ;;  %vm7491_vm6 = vcmask 982016   ;;  %vm3420_vm15 = vcmask 7168  }
 0x8be   :  { %3017 = vmax.xlane.f32.xlu0 %v3016_v43 }
 0x8c0   :  { %2906 = vmax.xlane.f32.xlu1 %v2905_v33 }
 0x8c2   :  { %3020 = vmax.xlane.f32.xlu0 %v3019_v2 }
 0x8c4   :  { %3014 = vmax.xlane.f32.xlu1 %v3013_v16 }
 0x8c6   :  { %2903 = vmax.xlane.f32.xlu0 %v2902_v27 }
 0x8ca   :  { %3011 = vmax.xlane.f32.xlu0 %v3010_v8 }
 0x947   :  { %v2910_v3 = vpop.xlane.xlu0 %2909 }
 0x948   :  { %v2920_v44 = vsub.f32 %v6839_v4, %v2910_v3 }
 0x949   :  { %v2913_v61 = vpop.xlane.xlu1 %2912 }
 0x94a   :  { %v2922_v53 = vmul.f32 1.442695, %v2920_v44  ;;  %v2921_v12 = vsub.f32 %v6842_v32, %v2913_v61 }
 0x94b   :  { %v3018_v48 = vpop.xlane.xlu0 %3017 }
 0x94c   :  { %4583 = vpow2.f32 %v2922_v53  ;;  %v3028_v56 = vsub.f32 %v6839_v4, %v3018_v48  ;;  %v2924_v5 = vmul.f32 1.442695, %v2921_v12 }
 0x94d   :  { %v6861_v40 = vpop.xlane.xlu1 %2906 }
 0x94e   :  { %v3009_v50 = vadd.f32 %v2913_v61, %v6861_v40  ;;  %v3030_v52 = vmul.f32 1.442695, %v3028_v56  ;;  %v2915_v42 = vsub.f32 %v6842_v32, %v6861_v40 }
 0x94f   :  { %v3021_v57 = vpop.xlane.xlu0 %3020 }
 0x950   :  { %4585 = vpow2.f32 %v3030_v52  ;;  %v3029_v59 = vsub.f32 %v6842_v32, %v3021_v57  ;;  %v2918_v17 = vmul.f32 1.442695, %v2915_v42  ;;  %v4474_v42 = vld [vmem:[%s7075_s4 + $0x18] sm:$0xff]  }
 0x951   :  { %v6865_v51 = vpop.xlane.xlu1 %3014  ;;  %4587 = vpow2.f32 %v2924_v5 }
 0x952   :  { %v3117_v25 = vadd.f32 %v3021_v57, %v6865_v51  ;;  %v3032_v36 = vmul.f32 1.442695, %v3029_v59 }
 0x953   :  { %v6868_v7 = vpop.xlane.xlu0 %2903 }
 0x954   :  { %v3008_v30 = vadd.f32 %v2910_v3, %v6868_v7  ;;  %v6872_v1 = vsel %vm112_vm12, %v3009_v50, %v3117_v25  ;;  %4589 = vpow2.f32 %v3032_v36  ;;  %v2914_v55 = vsub.f32 %v6839_v4, %v6868_v7  ;;  %v4471_v36 = vld [vmem:[%s7075_s4] sm:$0xff]  }
 0x955   :  { %4591 = vpow2.f32 %v2918_v17  ;;  %v3023_v3 = vsub.f32 %v6842_v32, %v6865_v51 }
 0x956   :  { %v4584_v49 = vpop.eup %4583  ;;  %v2916_v58 = vmul.f32 1.442695, %v2914_v55 }
 0x957   :  { %2949 = vperm.xlu1 %4317, %v4584_v49   ;;  %2939 = vperm.xlu0 %4316, %v4584_v49   ;;  %v6874_v38 = vpop.xlane.xlu0 %3011  ;;  %v3026_v50 = vmul.f32 1.442695, %v3023_v3 }
 0x958   :  { %v3116_v10 = vadd.f32 %v3018_v48, %v6874_v38  ;;  %4593 = vpow2.f32 %v2916_v58  ;;  %v3022_v61 = vsub.f32 %v6839_v4, %v6874_v38 }
 0x959   :  { %4595 = vpow2.f32 %v3026_v50 }
 0x95a   :  { %v6879_v9 = vsel %vm112_vm12, %v3008_v30, %v3116_v10  ;;  %v4586_v54 = vpop.eup %4585  ;;  %v3024_v57 = vmul.f32 1.442695, %v3022_v61 }
 0x95b   :  { %4318 = vset.pattern.permute.xlu1 %v7422_v20  ;;  %4322 = vset.pattern.permute.xlu0 %v7431_v63  ;;  %v4588_v39 = vpop.eup %4587 }
 0x95c   :  { %2959 = vperm.xlu1 %4318, %v4584_v49   ;;  %2999 = vperm.xlu0 %4322, %v4584_v49   ;;  %4597 = vpow2.f32 %v3024_v57 }
 0x95e   :  { %v4590_v11 = vpop.eup %4589 }
 0x95f   :  { %v6926_v33 = vpop.eup %4591 }
 0x960   :  { %4319 = vset.pattern.permute.xlu1 %v7469_v29  ;;  %4325 = vset.pattern.permute.xlu0 %v7470_v0 }
 0x961   :  { %2969 = vperm.xlu1 %4319, %v4584_v49   ;;  %3057 = vperm.xlu0 %4325, %v4586_v54  }
 0x962   :  { %v6928_v2 = vpop.eup %4593 }
 0x965   :  { %4320 = vset.pattern.permute.xlu1 %v7471_v26  ;;  %4328 = vset.pattern.permute.xlu0 %v7472_v41 }
 0x966   :  { %2979 = vperm.xlu1 %4320, %v4584_v49   ;;  %3087 = vperm.xlu0 %4328, %v4586_v54  }
 0x96a   :  { %4321 = vset.pattern.permute.xlu1 %v7473_v45  ;;  %4334 = vset.pattern.permute.xlu0 %v7471_v26  ;;  %v6955_v26 = vpop.eup %4595 }
 0x96b   :  { %2989 = vperm.xlu1 %4321, %v4584_v49   ;;  %2983 = vperm.xlu0 %4334, %v4588_v39  }
 0x96f   :  { %4323 = vset.pattern.permute.xlu1 %v7474_v21  ;;  %4337 = vset.pattern.permute.xlu0 %v7474_v21 }
 0x970   :  { %3036 = vperm.xlu1 %4323, %v4586_v54   ;;  %3041 = vperm.xlu0 %4337, %v4590_v11  }
 0x974   :  { %4324 = vset.pattern.permute.xlu1 %v7475_v15  ;;  %4340 = vset.pattern.permute.xlu0 %v7476_v6 }
 0x975   :  { %3047 = vperm.xlu1 %4324, %v4586_v54   ;;  %3071 = vperm.xlu0 %4340, %v4590_v11  }
 0x979   :  { %4326 = vset.pattern.permute.xlu1 %v7476_v6  ;;  %4343 = vset.pattern.permute.xlu0 %v7477_v34  ;;  %v4472_v6 = vld [vmem:[%s7075_s4 + $0x8] sm:$0xff]  }
 0x97a   :  { %3067 = vperm.xlu1 %4326, %v4586_v54   ;;  %3101 = vperm.xlu0 %4343, %v4590_v11  }
 0x97e   :  { %4327 = vset.pattern.permute.xlu1 %v7478_v24  ;;  %4345 = vset.pattern.permute.xlu0 %v7479_v13 }
 0x97f   :  { %3077 = vperm.xlu1 %4327, %v4586_v54   ;;  %2928 = vperm.xlu0 %4345, %v4584_v49  }
 0x983   :  { %4329 = vset.pattern.permute.xlu1 %v7477_v34  ;;  %4422 = vset.pattern.permute.xlu0 %v7480_v47 }
 0x984   :  { %3097 = vperm.xlu1 %4329, %v4586_v54  }
 0x988   :  { %4330 = vset.pattern.permute.xlu1 %v7481_v60 }
 0x989   :  { %2943 = vperm.xlu1 %4330, %v4588_v39  }
 0x98d   :  { %4331 = vset.pattern.permute.xlu1 %v7482_v14  ;;  %v4473_v14 = vld [vmem:[%s7075_s4 + $0x10] sm:$0xff]  }
 0x98e   :  { %2953 = vperm.xlu1 %4331, %v4588_v39  }
 0x992   :  { %4332 = vset.pattern.permute.xlu1 %v7422_v20 }
 0x993   :  { %2963 = vperm.xlu1 %4332, %v4588_v39  }
 0x997   :  { %4333 = vset.pattern.permute.xlu1 %v7469_v29 }
 0x998   :  { %2973 = vperm.xlu1 %4333, %v4588_v39  }
 0x99c   :  { %4335 = vset.pattern.permute.xlu1 %v7473_v45  ;;  %v6959_v45 = vpop.eup %4597 }
 0x99d   :  { %2993 = vperm.xlu1 %4335, %v4588_v39  }
 0x9a1   :  { %4336 = vset.pattern.permute.xlu1 %v7431_v63 }
 0x9a2   :  { %3003 = vperm.xlu1 %4336, %v4588_v39  }
 0x9a6   :  { %4338 = vset.pattern.permute.xlu1 %v7475_v15 }
 0x9a7   :  { %3051 = vperm.xlu1 %4338, %v4590_v11  }
 0x9ab   :  { %4339 = vset.pattern.permute.xlu1 %v7470_v0  ;;  %v4690_v0 = vmov 0.0  }
 0x9ac   :  { %3061 = vperm.xlu1 %4339, %v4590_v11   ;;  %3579 = vmatprep.subr.bf16.mxu0 %v4690_v0 }
 0x9ad   :  { %3580 = vmatpush3.bf16.msra.mxu0 %v4471_v36  ;;  %3595 = vmatprep.mubr.msk.bf16.mxu0 %vm4691_vm10, %v4690_v0 }
 0x9ae   :  { %3581 = vmatprep.subr.bf16.mxu0 %v4690_v0 }
 0x9b0   :  { %4341 = vset.pattern.permute.xlu1 %v7478_v24 }
 0x9b1   :  { %3081 = vperm.xlu1 %4341, %v4590_v11   ;;  %3582 = vmatpush3.bf16.msra.mxu0 %v4472_v6 }
 0x9b2   :  { %3583 = vmatprep.subr.bf16.mxu0 %v4690_v0 }
 0x9b5   :  { %4342 = vset.pattern.permute.xlu1 %v7472_v41  ;;  %3584 = vmatpush3.bf16.msra.mxu0 %v4473_v14 }
 0x9b6   :  { %3091 = vperm.xlu1 %4342, %v4590_v11   ;;  %3585 = vmatprep.subr.bf16.mxu0 %v4690_v0 }
 0x9b9   :  { %3586 = vmatpush3.bf16.msra.mxu0 %v4474_v42 }
 0x9ba   :  { %4344 = vset.pattern.permute.xlu1 %v7480_v47  ;;  %3587 = vmatprep.subr.bf16.mxu0 %v4690_v0 }
 0x9bb   :  { %3107 = vperm.xlu1 %4344, %v4586_v54  }
 0x9bf   :  { %3111 = vperm.xlu1 %4344, %v4590_v11  }
 0x9c3   :  { %4346 = vset.pattern.permute.xlu1 %v7479_v13 }
 0x9c4   :  { %2933 = vperm.xlu1 %4346, %v4588_v39  }
 0x9d6   :  { %v2950_v20 = vpop.permute.xlu1 %2949  ;;  %v2940_v18 = vpop.permute.xlu0 %2939 }
 0x9d7   :  { %v2946_v27 = vmul.f32 %v6928_v2, %v2940_v18  ;;  %v2956_v40 = vmul.f32 %v6928_v2, %v2950_v20 }
 0x9db   :  { %v2960_v63 = vpop.permute.xlu1 %2959  ;;  %v3000_v46 = vpop.permute.xlu0 %2999 }
 0x9dc   :  { %v2966_v32 = vmul.f32 %v6928_v2, %v2960_v63  ;;  %v3006_v24 = vmul.f32 %v6928_v2, %v3000_v46 }
 0x9e0   :  { %v2970_v19 = vpop.permute.xlu1 %2969  ;;  %v6924_v43 = vpop.permute.xlu0 %3057 }
 0x9e1   :  { %v2976_v12 = vmul.f32 %v6928_v2, %v2970_v19 }
 0x9e5   :  { %v2980_v28 = vpop.permute.xlu1 %2979  ;;  %v6936_v53 = vpop.permute.xlu0 %3087 }
 0x9e6   :  { %v2986_v49 = vmul.f32 %v6928_v2, %v2980_v28 }
 0x9ea   :  { %v2990_v37 = vpop.permute.xlu1 %2989  ;;  %v2984_v25 = vpop.permute.xlu0 %2983 }
 0x9eb   :  { %v2987_v51 = vmul.f32 %v6926_v33, %v2984_v25  ;;  %v2996_v41 = vmul.f32 %v6928_v2, %v2990_v37 }
 0x9ed   :  { %v4367_v5 = vpack.i.bf16 %v2987_v51, %v2986_v49 }
 0x9ef   :  { %v3037_v23 = vpop.permute.xlu1 %3036  ;;  %v3042_v54 = vpop.permute.xlu0 %3041 }
 0x9f0   :  { %v3044_v11 = vmul.f32 %v6959_v45, %v3037_v23  ;;  %v3045_v21 = vmul.f32 %v6955_v26, %v3042_v54 }
 0x9f2   :  { %v4382_v47 = vpack.i.bf16 %v3045_v21, %v3044_v11 }
 0x9f4   :  { %v6912_v31 = vpop.permute.xlu1 %3047  ;;  %v3072_v28 = vpop.permute.xlu0 %3071 }
 0x9f5   :  { %v3054_v63 = vmul.f32 %v6959_v45, %v6912_v31  ;;  %v3075_v55 = vmul.f32 %v6955_v26, %v3072_v28  ;;  %v3064_v31 = vmul.f32 %v6959_v45, %v6924_v43  ;;  %v4476_v43 = vld [vmem:[%s7075_s4 + $0x28] sm:$0xff]  }
 0x9f9   :  { %v6918_v62 = vpop.permute.xlu1 %3067  ;;  %v3102_v3 = vpop.permute.xlu0 %3101 }
 0x9fa   :  { %v3074_v37 = vmul.f32 %v6959_v45, %v6918_v62  ;;  %v4475_v62 = vld [vmem:[%s7075_s4 + $0x20] sm:$0xff]  }
 0x9fb   :  { %3588 = vmatpush3.bf16.msra.mxu0 %v4475_v62 }
 0x9fc   :  { %v4397_v18 = vpack.i.bf16 %v3075_v55, %v3074_v37  ;;  %3589 = vmatprep.subr.bf16.mxu0 %v4690_v0 }
 0x9fe   :  { %v6920_v22 = vpop.permute.xlu1 %3077 }
 0x9ff   :  { %3590 = vmatpush3.bf16.msra.mxu0 %v4476_v43 }
 0xa00   :  { %3591 = vmatprep.subr.bf16.mxu0 %v4690_v0 }
 0xa03   :  { %v6922_v35 = vpop.permute.xlu1 %3097 }
 0xa08   :  { %v2944_v16 = vpop.permute.xlu1 %2943 }
 0xa09   :  { %v2947_v8 = vmul.f32 %v6926_v33, %v2944_v16 }
 0xa0b   :  { %v4347_v44 = vpack.i.bf16 %v2947_v8, %v2946_v27  ;;  %v3084_v27 = vmul.f32 %v6959_v45, %v6920_v22  ;;  %v3094_v22 = vmul.f32 %v6959_v45, %v6936_v53 }
 0xa0d   :  { %v2954_v48 = vpop.permute.xlu1 %2953  ;;  %4348 = vrot.lane.b32.xlu1 %v4347_v44, %s4688_s20  ;;  %v3104_v44 = vmul.f32 %v6959_v45, %v6922_v35 }
 0xa0e   :  { %v2957_v56 = vmul.f32 %v6926_v33, %v2954_v48  ;;  %v4477_v48 = vld [vmem:[%s7075_s4 + $0x30] sm:$0xff]  }
 0xa0f   :  { %3592 = vmatpush3.bf16.msra.mxu0 %v4477_v48 }
 0xa10   :  { %v4352_v52 = vpack.i.bf16 %v2957_v56, %v2956_v40  ;;  %v3105_v40 = vmul.f32 %v6955_v26, %v3102_v3  ;;  %3593 = vmatprep.subr.bf16.mxu0 %v4690_v0 }
 0xa12   :  { %v2964_v7 = vpop.permute.xlu1 %2963  ;;  %4353 = vrot.lane.b32.xlu0 %v4352_v52, %s4675_s10  ;;  %v4412_v57 = vpack.i.bf16 %v3105_v40, %v3104_v44  ;;  %v4478_v52 = vld [vmem:[%s7075_s4 + $0x38] sm:$0xff]  }
 0xa13   :  { %v2967_v4 = vmul.f32 %v6926_v33, %v2964_v7  ;;  %3594 = vmatpush3.bf16.msra.mxu0 %v4478_v52 }
 0xa15   :  { %v4357_v30 = vpack.i.bf16 %v2967_v4, %v2966_v32 }
 0xa17   :  { %v2974_v38 = vpop.permute.xlu1 %2973  ;;  %4358 = vrot.lane.b32.xlu1 %v4357_v30, %s4678_s12  ;;  %v2929_v30 = vpop.permute.xlu0 %2928 }
 0xa18   :  { %v2977_v10 = vmul.f32 %v6926_v33, %v2974_v38 }
 0xa1a   :  { %v4362_v59 = vpack.i.bf16 %v2977_v10, %v2976_v12 }
 0xa1b   :  { %4368 = vrot.lane.b32.xlu1 %v4367_v5, %s4682_s15 }
 0xa1c   :  { %v2994_v29 = vpop.permute.xlu1 %2993  ;;  %4363 = vrot.lane.b32.xlu0 %v4362_v59, %s4670_s0 }
 0xa1d   :  { %v2997_v39 = vmul.f32 %v6926_v33, %v2994_v29 }
 0xa1f   :  { %v4372_v15 = vpack.i.bf16 %v2997_v39, %v2996_v41  ;;  %v2936_v39 = vmul.f32 %v6928_v2, %v2929_v30 }
 0xa21   :  { %v3004_v34 = vpop.permute.xlu1 %3003  ;;  %4373 = vrot.lane.b32.xlu0 %v4372_v15, %s4685_s17 }
 0xa22   :  { %v3007_v13 = vmul.f32 %v6926_v33, %v3004_v34 }
 0xa24   :  { %v4377_v60 = vpack.i.bf16 %v3007_v13, %v3006_v24 }
 0xa25   :  { %4383 = vrot.lane.b32.xlu0 %v4382_v47, %s4685_s17 }
 0xa26   :  { %v3052_v20 = vpop.permute.xlu1 %3051  ;;  %4378 = vrot.lane.b32.xlu1 %v4377_v60, %s4686_s18 }
 0xa27   :  { %v3055_v19 = vmul.f32 %v6955_v26, %v3052_v20 }
 0xa29   :  { %v4387_v23 = vpack.i.bf16 %v3055_v19, %v3054_v63 }
 0xa2b   :  { %v3062_v17 = vpop.permute.xlu1 %3061  ;;  %4388 = vrot.lane.b32.xlu1 %v4387_v23, %s4686_s18 }
 0xa2c   :  { %v3065_v58 = vmul.f32 %v6955_v26, %v3062_v17 }
 0xa2e   :  { %v4392_v46 = vpack.i.bf16 %v3065_v58, %v3064_v31 }
 0xa2f   :  { %4398 = vrot.lane.b32.xlu1 %v4397_v18, %s4674_s9 }
 0xa30   :  { %v3082_v16 = vpop.permute.xlu1 %3081  ;;  %4393 = vrot.lane.b32.xlu0 %v4392_v46, %s4680_s13 }
 0xa31   :  { %v3085_v8 = vmul.f32 %v6955_v26, %v3082_v16 }
 0xa33   :  { %v4402_v61 = vpack.i.bf16 %v3085_v8, %v3084_v27 }
 0xa35   :  { %v3092_v56 = vpop.permute.xlu1 %3091  ;;  %4403 = vrot.lane.b32.xlu0 %v4402_v61, %s4677_s11 }
 0xa36   :  { %v3095_v50 = vmul.f32 %v6955_v26, %v3092_v56 }
 0xa38   :  { %v4407_v35 = vpack.i.bf16 %v3095_v50, %v3094_v22 }
 0xa39   :  { %4413 = vrot.lane.b32.xlu0 %v4412_v57, %s4681_s14 }
 0xa3a   :  { %v3108_v25 = vpop.permute.xlu1 %3107  ;;  %4408 = vrot.lane.b32.xlu1 %v4407_v35, %s4689_s21 }
 0xa3b   :  { %v3114_v7 = vmul.f32 %v6959_v45, %v3108_v25 }
 0xa3e   :  { %v3112_v53 = vpop.permute.xlu1 %3111 }
 0xa3f   :  { %v3115_v32 = vmul.f32 %v6955_v26, %v3112_v53 }
 0xa41   :  { %v4417_v4 = vpack.i.bf16 %v3115_v32, %v3114_v7 }
 0xa43   :  { %4418 = vrot.lane.b32.xlu1 %v4417_v4, %s4684_s16  ;;  %v2934_v51 = vpop.permute.xlu1 %2933 }
 0xa44   :  { %v2937_v26 = vmul.f32 %v6926_v33, %v2934_v51 }
 0xa7f   :  { %v4349_v49 = vpop.permute.xlu1 %4348 }
 0xa80   :  { %v4351_v29 = vunpack.i.h.bf16 %v4349_v49  ;;  %v4350_v0 = vunpack.i.l.bf16 %v4349_v49 }
 0xa82   :  { %v3239_v6 = vsel %vm112_vm12, %v2937_v26, %v4351_v29  ;;  %v3238_v34 = vsel %vm112_vm12, %v2936_v39, %v4350_v0 }
 0xa84   :  { %v4354_v38 = vpop.permute.xlu0 %4353 }
 0xa85   :  { %v4356_v36 = vunpack.i.h.bf16 %v4354_v38  ;;  %v4355_v41 = vunpack.i.l.bf16 %v4354_v38 }
 0xa87   :  { %v3241_v13 = vsel %vm1130_vm7, %v3239_v6, %v4356_v36  ;;  %v3240_v47 = vsel %vm1130_vm7, %v3238_v34, %v4355_v41 }
 0xa89   :  { %v4359_v12 = vpop.permute.xlu1 %4358 }
 0xa8a   :  { %v4361_v45 = vunpack.i.h.bf16 %v4359_v12  ;;  %v4360_v11 = vunpack.i.l.bf16 %v4359_v12 }
 0xa8c   :  { %v3242_v14 = vsel %vm1133_vm4, %v3240_v47, %v4360_v11  ;;  %v3243_v2 = vsel %vm1133_vm4, %v3241_v13, %v4361_v45  ;;  %vm7485_vm4 = vcmask 588800  }
 0xa8d   :  { %v4369_v5 = vpop.permute.xlu1 %4368 }
 0xa8e   :  { %v4364_v10 = vpop.permute.xlu0 %4363  ;;  %v4371_v28 = vunpack.i.h.bf16 %v4369_v5  ;;  %v4370_v37 = vunpack.i.l.bf16 %v4369_v5 }
 0xa8f   :  { %v4366_v21 = vunpack.i.h.bf16 %v4364_v10  ;;  %v4365_v15 = vunpack.i.l.bf16 %v4364_v10 }
 0xa91   :  { %v3244_v33 = vsel %vm30_vm0, %v3242_v14, %v4365_v15  ;;  %v3245_v20 = vsel %vm30_vm0, %v3243_v2, %v4366_v21  ;;  %vm7483_vm0 = vcmask 523264  }
 0xa92   :  { %v3246_v17 = vsel %vm1138_vm11, %v3244_v33, %v4370_v37  ;;  %v3247_v31 = vsel %vm1138_vm11, %v3245_v20, %v4371_v28  ;;  %vm7484_vm12 = vmmov %vm7483_vm0 }
 0xa93   :  { %v4374_v59 = vpop.permute.xlu0 %4373  ;;  %vm7486_vm11 = vmmov %vm7485_vm4 }
 0xa94   :  { %v4376_v63 = vunpack.i.h.bf16 %v4374_v59  ;;  %v4375_v19 = vunpack.i.l.bf16 %v4374_v59 }
 0xa96   :  { %v3248_v58 = vsel %vm1141_vm2, %v3246_v17, %v4375_v19  ;;  %v3249_v62 = vsel %vm1141_vm2, %v3247_v31, %v4376_v63 }
 0xa97   :  { %v4384_v24 = vpop.permute.xlu0 %4383 }
 0xa98   :  { %v4379_v54 = vpop.permute.xlu1 %4378  ;;  %v4386_v8 = vunpack.i.h.bf16 %v4384_v24  ;;  %v4385_v3 = vunpack.i.l.bf16 %v4384_v24 }
 0xa99   :  { %v4381_v23 = vunpack.i.h.bf16 %v4379_v54  ;;  %v4380_v42 = vunpack.i.l.bf16 %v4379_v54 }
 0xa9b   :  { %v3250_v46 = vsel %vm1144_vm3, %v3248_v58, %v4380_v42  ;;  %v3251_v16 = vsel %vm1144_vm3, %v3249_v62, %v4381_v23  ;;  %vm7487_vm3 = vcmask 850944  }
 0xa9c   :  { %v3252_v40 = vsel %vm7483_vm0, %v3250_v46, %v4385_v3  ;;  %v3253_v56 = vsel %vm7484_vm12, %v3251_v16, %v4386_v8  ;;  %vm7488_vm2 = vmmov %vm7487_vm3 }
 0xa9d   :  { %v4389_v60 = vpop.permute.xlu1 %4388 }
 0xa9e   :  { %v4391_v43 = vunpack.i.h.bf16 %v4389_v60  ;;  %v4390_v27 = vunpack.i.l.bf16 %v4389_v60 }
 0xaa0   :  { %v3254_v50 = vsel %vm7485_vm4, %v3252_v40, %v4390_v27  ;;  %v3255_v57 = vsel %vm7486_vm11, %v3253_v56, %v4391_v43 }
 0xaa1   :  { %v4399_v18 = vpop.permute.xlu1 %4398 }
 0xaa2   :  { %v4394_v55 = vpop.permute.xlu0 %4393  ;;  %v4401_v7 = vunpack.i.h.bf16 %v4399_v18  ;;  %v4400_v32 = vunpack.i.l.bf16 %v4399_v18 }
 0xaa3   :  { %v4396_v44 = vunpack.i.h.bf16 %v4394_v55  ;;  %v4395_v61 = vunpack.i.l.bf16 %v4394_v55 }
 0xaa5   :  { %v3256_v35 = vsel %vm1153_vm9, %v3254_v50, %v4395_v61  ;;  %v3257_v52 = vsel %vm1153_vm9, %v3255_v57, %v4396_v44  ;;  %vm7489_vm9 = vcmask 916480  }
 0xaa6   :  { %v3258_v30 = vsel %vm1156_vm1, %v3256_v35, %v4400_v32  ;;  %v3259_v49 = vsel %vm1156_vm1, %v3257_v52, %v4401_v7  ;;  %vm7490_vm13 = vmmov %vm7489_vm9 }
 0xaa7   :  { %v4404_v48 = vpop.permute.xlu0 %4403  ;;  %vm7492_vm1 = vmmov %vm7491_vm6 }
 0xaa8   :  { %v4406_v25 = vunpack.i.h.bf16 %v4404_v48  ;;  %v4405_v53 = vunpack.i.l.bf16 %v4404_v48 }
 0xaaa   :  { %v3260_v12 = vsel %vm1159_vm14, %v3258_v30, %v4405_v53  ;;  %v3261_v10 = vsel %vm1159_vm14, %v3259_v49, %v4406_v25  ;;  %vm3387_vm14 = vcmask 128000  }
 0xaab   :  { %v4414_v38 = vpop.permute.xlu0 %4413 }
 0xaac   :  { %v4409_v22 = vpop.permute.xlu1 %4408  ;;  %v4416_v54 = vunpack.i.h.bf16 %v4414_v38  ;;  %v4415_v29 = vunpack.i.l.bf16 %v4414_v38 }
 0xaad   :  { %v4411_v4 = vunpack.i.h.bf16 %v4409_v22  ;;  %v4410_v51 = vunpack.i.l.bf16 %v4409_v22 }
 0xaaf   :  { %v3262_v5 = vsel %vm7487_vm3, %v3260_v12, %v4410_v51  ;;  %v3263_v59 = vsel %vm7488_vm2, %v3261_v10, %v4411_v4 }
 0xab0   :  { %v3264_v39 = vsel %vm7489_vm9, %v3262_v5, %v4415_v29  ;;  %v3265_v26 = vsel %vm7490_vm13, %v3263_v59, %v4416_v54 }
 0xab5   :  { %v4419_v0 = vpop.permute.xlu1 %4418 }
 0xab6   :  { %v4421_v36 = vunpack.i.h.bf16 %v4419_v0  ;;  %v4420_v41 = vunpack.i.l.bf16 %v4419_v0 }
 0xab8   :  { %v3266_v45 = vsel %vm7491_vm6, %v3264_v39, %v4420_v41  ;;  %v3267_v11 = vsel %vm7492_vm1, %v3265_v26, %v4421_v36 }
 0xab9   :  { %v3268_v21 = vpack.c.bf16 %v3267_v11, %v3266_v45 }
 0xabb   :  { %3596 = vmatmul.mubr.bf16.vlgmr.msra.gmra.mrb[8].mxu0 %v3268_v21 }
 0xb8e   :  { %v3367_v15 = vpop.f32.mrb[8].mxu0 }
 0xb8f   :  { %v3376_v6 = vmax.f32 %v3367_v15, 1e-38  ;;  %v3597_v34 = vpop.f32.mrb[9].mxu0 }
 0xb90   :  { %v3370_v24 = vpop.f32.mrb[10].mxu0 }
 0xb91   :  { %4599 = vlog2.f32 %v3376_v6  ;;  %v3377_v13 = vmax.f32 %v3370_v24, 1e-38  ;;  %v3598_v47 = vpop.f32.mrb[11].mxu0 }
 0xb93   :  { %4601 = vlog2.f32 %v3377_v13 }
 0xb9b   :  { %v4600_v60 = vpop.eup %4599 }
 0xb9c   :  { %v3379_v14 = vmul.f32 0.6931472, %v4600_v60 }
 0xb9d   :  { %v4602_v2 = vpop.eup %4601 }
 0xb9e   :  { %v3381_v33 = vmul.f32 0.6931472, %v4602_v2  ;;  %v3382_v20 = vadd.f32 %v3379_v14, %v6879_v9  ;;  %v3486_v9 = vld [vmem:[%s7076_s5] ss:$0 sm:$0xff] }
 0xba0   :  { %v3384_v63 = vsel %vm1130_vm7, %v3382_v20, -inf  ;;  %v3383_v19 = vadd.f32 %v3381_v33, %v6872_v1 }
 0xba1   :  { %3385 = vmax.xlane.f32.xlu0 %v3384_v63 }
 0xba2   :  { %v3388_v28 = vsel %vm3387_vm14, %v3383_v19, -inf }
 0xba3   :  { %3389 = vmax.xlane.f32.xlu1 %v3388_v28 }
 0xc2e   :  { %v3386_v37 = vpop.xlane.xlu0 %3385 }
 0xc2f   :  { %v3391_v23 = vsub.f32 %v3382_v20, %v3386_v37 }
 0xc30   :  { %v3390_v42 = vpop.xlane.xlu1 %3389 }
 0xc31   :  { %v3393_v55 = vmul.f32 1.442695, %v3391_v23  ;;  %v3392_v17 = vsub.f32 %v3383_v19, %v3390_v42 }
 0xc33   :  { %4603 = vpow2.f32 %v3393_v55  ;;  %v3395_v31 = vmul.f32 1.442695, %v3392_v17 }
 0xc35   :  { %4605 = vpow2.f32 %v3395_v31 }
 0xc3d   :  { %v4604_v58 = vpop.eup %4603 }
 0xc3e   :  { %v3404_v62 = vmul.f32 %v4604_v58, %v3486_v9 }
 0xc3f   :  { %v4606_v18 = vpop.eup %4605 }
 0xc40   :  { %v3406_v1 = vsel %vm1130_vm7, %v3404_v62, 0.0  ;;  %v3405_v46 = vmul.f32 %v4606_v18, %v3486_v9  ;;  %vm3422_vm7 = vcmask 5120  }
 0xc41   :  { %3407 = vadd.xlane.f32.xlu0 %v3406_v1 }
 0xc42   :  { %v3409_v16 = vsel %vm3387_vm14, %v3405_v46, 0.0 }
 0xc45   :  { %3410 = vadd.xlane.f32.xlu0 %v3409_v16 }
 0xcce   :  { %v3408_v43 = vpop.xlane.xlu0 %3407 }
 0xccf   :  { %v3412_v27 = vmax.f32 %v3408_v43, 1e-38 }
 0xcd1   :  { %4607 = vlog2.f32 %v3412_v27 }
 0xcd2   :  { %v3411_v8 = vpop.xlane.xlu0 %3410 }
 0xcd3   :  { %v3413_v3 = vmax.f32 %v3411_v8, 1e-38 }
 0xcd5   :  { %4609 = vlog2.f32 %v3413_v3 }
 0xcdb   :  { %v4608_v44 = vpop.eup %4607 }
 0xcdc   :  { %v3415_v61 = vmul.f32 0.6931472, %v4608_v44 }
 0xcde   :  { %v3418_v48 = vadd.f32 %v3415_v61, %v3386_v37 }
 0xcdf   :  { %v4610_v40 = vpop.eup %4609 }
 0xce0   :  { %3421 = vst.msk [vmem:[%s7077_s6] sm:$0xff] %vm3420_vm15, %v3418_v48  ;;  %v3417_v56 = vmul.f32 0.6931472, %v4610_v40 }
 0xce2   :  { %v3419_v22 = vadd.f32 %v3417_v56, %v3390_v42 }
 0xce4   :  { %3423 = vst.msk [vmem:[%s7077_s6 + $0x8] sm:$0x3f] %vm3422_vm7, %v3419_v22 }

</bundles_post_ra>
